<compile_context>
chip_gen: v7x
topology: tpu7x:2x2x1
jax: 0.10.0
libtpu: 0.0.40
codegen_flags: <defaults>
</compile_context>

<pallas_src>
import math

import jax
import jax.numpy as jnp
from jax.experimental import pallas as pl
from jax.experimental.pallas import tpu as pltpu

_INV_SQRT2 = 0.7071067811865476
_LN_EPS = 1e-5
_N_LAYERS = 13                      # hidden1..hidden12 + hiddenfinal
_MAX_TB = 512                       # batch-tile cap (v7x VMEM-friendly)
_VMEM_LIMIT = 48 * 1024 * 1024      # <= review's v7x guidance, plenty for tb=512


def _cdiv(a, b):
    return (a + b - 1) // b


def _round_up(v, m):
    return _cdiv(v, m) * m


def _layer_dims(n_inputs):
    # Input -> output width of each Linear in MLP.__init__.
    return [n_inputs, n_inputs, 1000, 800, 600, 400, 200, 100,
            64, 32, 16, 8, 4, 1]


def _padded_layer_dims(n_inputs):
    # Pad ONLY the GELU-only internal widths (1000..100) to 128 multiples.
    # n_inputs (feeds LayerNorm(n_inputs)), the width-4 layer (feeds
    # LayerNorm(4)) and the final width-1 output must stay unpadded.
    dims = _layer_dims(n_inputs)
    padded = list(dims)
    for idx in range(2, 8):                 # 1000, 800, 600, 400, 200, 100
        padded[idx] = _round_up(dims[idx], 128)
    return padded


# ------------------------------ fused kernel ------------------------------- #

def _mlp_fused_kernel(x_ref, *refs):
    """refs = (w0, b0, ..., w12, b12, gamma1, beta1, gamma2, beta2, o_ref)."""
    o_ref = refs[-1]
    wb = refs[:2 * _N_LAYERS]
    g1_ref, be1_ref, g2_ref, be2_ref = refs[2 * _N_LAYERS:2 * _N_LAYERS + 4]

    def gelu(v):
        # Exact (erf) GELU — matches PyTorch nn.GELU() default.
        # TODO(synk): tanh-form GELU would move the transcendental to the EUP
        #             slot; kept exact-erf for parity with the reference module.
        return 0.5 * v * (1.0 + jax.lax.erf(v * _INV_SQRT2))

    def layernorm(v, g, b):
        mu = jnp.mean(v, axis=-1, keepdims=True)
        var = jnp.mean(jnp.square(v - mu), axis=-1, keepdims=True)
        return (v - mu) * jax.lax.rsqrt(var + _LN_EPS) * g[...] + b[...]

    def dense(v, li):
        w_ref = wb[2 * li]
        b_ref = wb[2 * li + 1]
        # bf16 x bf16 on the MXU, f32 accumulation; bias added in f32.
        y = jnp.dot(v.astype(w_ref.dtype), w_ref[...],
                    preferred_element_type=jnp.float32)
        return y + b_ref[...]

    y = x_ref[...]                                            # f32 (tb, n_in)

    # hidden1 -> GELU -> LayerNorm(n_inputs) -> (dropout = identity)
    y = layernorm(gelu(dense(y, 0)), g1_ref, be1_ref)

    # hidden2 .. hidden11 : Linear -> GELU (dropouts are identity in eval)
    for li in range(1, 11):
        y = gelu(dense(y, li))

    # hidden12 -> GELU -> LayerNorm(4)
    y = layernorm(gelu(dense(y, 11)), g2_ref, be2_ref)

    # hiddenfinal : Linear(4, 1), no activation
    y = dense(y, 12)

    o_ref[...] = y.astype(o_ref.dtype)


# ------------------------------ forward pass -------------------------------- #

def _resident_spec(shape):
    """Full-array block, same index every grid step, single-buffered."""
    idx_map = lambda i: (0,) * len(shape)
    try:
        return pl.BlockSpec(shape, idx_map, pipeline_mode=pl.Buffered(1))
    except Exception:                       # older jax without pipeline_mode
        return pl.BlockSpec(shape, idx_map)


@jax.jit
def mlp_forward(x, params):
    linears = params["linears"]
    g1, be1 = params["ln1"]
    g2, be2 = params["ln2"]

    batch, n_inputs = x.shape

    # Balanced batch tiling: as few grid steps as possible with minimal padding.
    num_tiles = _cdiv(batch, _MAX_TB)
    tb = _round_up(_cdiv(batch, num_tiles), 8)
    padded_batch = tb * num_tiles
    if padded_batch != batch:
        x = jnp.pad(x, ((0, padded_batch - batch), (0, 0)))
    grid = (num_tiles,)

    flat_params = []
    in_specs = [pl.BlockSpec((tb, n_inputs), lambda i: (i, 0))]
    for w, b in linears:
        flat_params.append(w)
        flat_params.append(b)
        in_specs.append(_resident_spec(w.shape))
        in_specs.append(_resident_spec(b.shape))
    for p in (g1, be1, g2, be2):
        flat_params.append(p)
        in_specs.append(_resident_spec(p.shape))

    dims = [linears[0][0].shape[0]] + [w.shape[1] for w, _ in linears]
    flops = 2 * padded_batch * sum(di * do for di, do in zip(dims[:-1], dims[1:]))
    transcendentals = padded_batch * sum(dims[1:13])  # one erf per GELU output
    bytes_accessed = (x.size * x.dtype.itemsize
                      + sum(int(p.size) * p.dtype.itemsize for p in flat_params)
                      + padded_batch * 4)

    out = pl.pallas_call(
        _mlp_fused_kernel,
        out_shape=jax.ShapeDtypeStruct((padded_batch, 1), jnp.float32),
        grid=grid,
        in_specs=in_specs,
        out_specs=pl.BlockSpec((tb, 1), lambda i: (i, 0)),
        compiler_params=pltpu.CompilerParams(
            dimension_semantics=("parallel",),
            vmem_limit_bytes=_VMEM_LIMIT,
        ),
        cost_estimate=pl.CostEstimate(
            flops=int(flops),
            transcendentals=int(transcendentals),
            bytes_accessed=int(bytes_accessed),
        ),
    )(x, *flat_params)

    return out[:batch]


# --------------------------- parameter creation ----------------------------- #

def init_params(n_inputs, key):
    dims = _layer_dims(n_inputs)
    pdims = _padded_layer_dims(n_inputs)
    params = {"linears": [], "ln1": None, "ln2": None}
    for i in range(len(dims) - 1):
        fan_in, fan_out = dims[i], dims[i + 1]
        p_in, p_out = pdims[i], pdims[i + 1]
        key, kw, kb = jax.random.split(key, 3)
        # kaiming_uniform_ (a=0 -> leaky_relu gain sqrt(2)): bound = sqrt(6/fan_in).
        w_bound = math.sqrt(6.0 / fan_in)
        b_bound = 1.0 / math.sqrt(fan_in)
        # Stored transposed (in, out) so the kernel computes x @ W directly.
        w = jax.random.uniform(kw, (fan_in, fan_out), jnp.float32,
                               minval=-w_bound, maxval=w_bound)
        b = jax.random.uniform(kb, (1, fan_out), jnp.float32,
                               minval=-b_bound, maxval=b_bound)
        # Zero-pad to MXU/vreg-aligned widths; padded slots stay exactly 0
        # through bias-add + GELU, so the math is unchanged.
        w = jnp.pad(w, ((0, p_in - fan_in), (0, p_out - fan_out)))
        b = jnp.pad(b, ((0, 0), (0, p_out - fan_out)))
        params["linears"].append((w.astype(jnp.bfloat16), b))
    # LayerNorm(n_inputs) and LayerNorm(4): gamma=1, beta=0 at init (f32).
    params["ln1"] = (jnp.ones((1, n_inputs), jnp.float32),
                     jnp.zeros((1, n_inputs), jnp.float32))
    params["ln2"] = (jnp.ones((1, 4), jnp.float32),
                     jnp.zeros((1, 4), jnp.float32))
    return params


# ---------------------------------- main ------------------------------------ #

if __name__ == "__main__":
    n_inputs = 32
    batch = 8

    key = jax.random.PRNGKey(0)
    key, kx, kp = jax.random.split(key, 3)
    x = jax.random.normal(kx, (batch, n_inputs), jnp.float32)
    params = init_params(n_inputs, kp)

    out = mlp_forward(x, params)
    out = jax.block_until_ready(out)
    assert out.shape == (batch, 1), out.shape
    assert out.dtype == jnp.float32
    assert bool(jnp.all(jnp.isfinite(out)))
    print("KERNEL_OK")
</pallas_src>

<mosaic_0001>
module attributes {stable_mosaic.version = 11 : i64} {
  func.func @_mlp_fused_kernel(%arg0: i32, %arg1: memref<8x32xf32, #tpu.memory_space<vmem>>, %arg2: memref<32x32xbf16, #tpu.memory_space<vmem>>, %arg3: memref<1x32xf32, #tpu.memory_space<vmem>>, %arg4: memref<32x1024xbf16, #tpu.memory_space<vmem>>, %arg5: memref<1x1024xf32, #tpu.memory_space<vmem>>, %arg6: memref<1024x896xbf16, #tpu.memory_space<vmem>>, %arg7: memref<1x896xf32, #tpu.memory_space<vmem>>, %arg8: memref<896x640xbf16, #tpu.memory_space<vmem>>, %arg9: memref<1x640xf32, #tpu.memory_space<vmem>>, %arg10: memref<640x512xbf16, #tpu.memory_space<vmem>>, %arg11: memref<1x512xf32, #tpu.memory_space<vmem>>, %arg12: memref<512x256xbf16, #tpu.memory_space<vmem>>, %arg13: memref<1x256xf32, #tpu.memory_space<vmem>>, %arg14: memref<256x128xbf16, #tpu.memory_space<vmem>>, %arg15: memref<1x128xf32, #tpu.memory_space<vmem>>, %arg16: memref<128x64xbf16, #tpu.memory_space<vmem>>, %arg17: memref<1x64xf32, #tpu.memory_space<vmem>>, %arg18: memref<64x32xbf16, #tpu.memory_space<vmem>>, %arg19: memref<1x32xf32, #tpu.memory_space<vmem>>, %arg20: memref<32x16xbf16, #tpu.memory_space<vmem>>, %arg21: memref<1x16xf32, #tpu.memory_space<vmem>>, %arg22: memref<16x8xbf16, #tpu.memory_space<vmem>>, %arg23: memref<1x8xf32, #tpu.memory_space<vmem>>, %arg24: memref<8x4xbf16, #tpu.memory_space<vmem>>, %arg25: memref<1x4xf32, #tpu.memory_space<vmem>>, %arg26: memref<4x1xbf16, #tpu.memory_space<vmem>>, %arg27: memref<1x1xf32, #tpu.memory_space<vmem>>, %arg28: memref<1x32xf32, #tpu.memory_space<vmem>>, %arg29: memref<1x32xf32, #tpu.memory_space<vmem>>, %arg30: memref<1x4xf32, #tpu.memory_space<vmem>>, %arg31: memref<1x4xf32, #tpu.memory_space<vmem>>, %arg32: memref<8x1xf32, #tpu.memory_space<vmem>>) attributes {dimension_semantics = [#tpu.dimension_semantics<parallel>], iteration_bounds = array<i64: 1>, scalar_prefetch = 0 : i64, scratch_operands = 0 : i64, tpu.core_type = #tpu.core_type<tc>, window_params = [{transform_indices = @transform_0, window_bounds = array<i64: 8, 32>}, {pipeline_mode = #tpu.pipeline_mode<synchronous>, transform_indices = @transform_1, window_bounds = array<i64: 32, 32>}, {pipeline_mode = #tpu.pipeline_mode<synchronous>, transform_indices = @transform_2, window_bounds = array<i64: 1, 32>}, {pipeline_mode = #tpu.pipeline_mode<synchronous>, transform_indices = @transform_3, window_bounds = array<i64: 32, 1024>}, {pipeline_mode = #tpu.pipeline_mode<synchronous>, transform_indices = @transform_4, window_bounds = array<i64: 1, 1024>}, {pipeline_mode = #tpu.pipeline_mode<synchronous>, transform_indices = @transform_5, window_bounds = array<i64: 1024, 896>}, {pipeline_mode = #tpu.pipeline_mode<synchronous>, transform_indices = @transform_6, window_bounds = array<i64: 1, 896>}, {pipeline_mode = #tpu.pipeline_mode<synchronous>, transform_indices = @transform_7, window_bounds = array<i64: 896, 640>}, {pipeline_mode = #tpu.pipeline_mode<synchronous>, transform_indices = @transform_8, window_bounds = array<i64: 1, 640>}, {pipeline_mode = #tpu.pipeline_mode<synchronous>, transform_indices = @transform_9, window_bounds = array<i64: 640, 512>}, {pipeline_mode = #tpu.pipeline_mode<synchronous>, transform_indices = @transform_10, window_bounds = array<i64: 1, 512>}, {pipeline_mode = #tpu.pipeline_mode<synchronous>, transform_indices = @transform_11, window_bounds = array<i64: 512, 256>}, {pipeline_mode = #tpu.pipeline_mode<synchronous>, transform_indices = @transform_12, window_bounds = array<i64: 1, 256>}, {pipeline_mode = #tpu.pipeline_mode<synchronous>, transform_indices = @transform_13, window_bounds = array<i64: 256, 128>}, {pipeline_mode = #tpu.pipeline_mode<synchronous>, transform_indices = @transform_14, window_bounds = array<i64: 1, 128>}, {pipeline_mode = #tpu.pipeline_mode<synchronous>, transform_indices = @transform_15, window_bounds = array<i64: 128, 64>}, {pipeline_mode = #tpu.pipeline_mode<synchronous>, transform_indices = @transform_16, window_bounds = array<i64: 1, 64>}, {pipeline_mode = #tpu.pipeline_mode<synchronous>, transform_indices = @transform_17, window_bounds = array<i64: 64, 32>}, {pipeline_mode = #tpu.pipeline_mode<synchronous>, transform_indices = @transform_18, window_bounds = array<i64: 1, 32>}, {pipeline_mode = #tpu.pipeline_mode<synchronous>, transform_indices = @transform_19, window_bounds = array<i64: 32, 16>}, {pipeline_mode = #tpu.pipeline_mode<synchronous>, transform_indices = @transform_20, window_bounds = array<i64: 1, 16>}, {pipeline_mode = #tpu.pipeline_mode<synchronous>, transform_indices = @transform_21, window_bounds = array<i64: 16, 8>}, {pipeline_mode = #tpu.pipeline_mode<synchronous>, transform_indices = @transform_22, window_bounds = array<i64: 1, 8>}, {pipeline_mode = #tpu.pipeline_mode<synchronous>, transform_indices = @transform_23, window_bounds = array<i64: 8, 4>}, {pipeline_mode = #tpu.pipeline_mode<synchronous>, transform_indices = @transform_24, window_bounds = array<i64: 1, 4>}, {pipeline_mode = #tpu.pipeline_mode<synchronous>, transform_indices = @transform_25, window_bounds = array<i64: 4, 1>}, {pipeline_mode = #tpu.pipeline_mode<synchronous>, transform_indices = @transform_26, window_bounds = array<i64: 1, 1>}, {pipeline_mode = #tpu.pipeline_mode<synchronous>, transform_indices = @transform_27, window_bounds = array<i64: 1, 32>}, {pipeline_mode = #tpu.pipeline_mode<synchronous>, transform_indices = @transform_28, window_bounds = array<i64: 1, 32>}, {pipeline_mode = #tpu.pipeline_mode<synchronous>, transform_indices = @transform_29, window_bounds = array<i64: 1, 4>}, {pipeline_mode = #tpu.pipeline_mode<synchronous>, transform_indices = @transform_30, window_bounds = array<i64: 1, 4>}, {transform_indices = @transform_31, window_bounds = array<i64: 8, 1>}]} {
    %c0 = arith.constant 0 : index
    %c0_0 = arith.constant 0 : index
    %0 = vector.load %arg1[%c0, %c0_0] : memref<8x32xf32, #tpu.memory_space<vmem>>, vector<8x32xf32>
    %1 = arith.truncf %0 : vector<8x32xf32> to vector<8x32xbf16>
    %c0_1 = arith.constant 0 : index
    %c0_2 = arith.constant 0 : index
    %2 = vector.load %arg2[%c0_1, %c0_2] : memref<32x32xbf16, #tpu.memory_space<vmem>>, vector<32x32xbf16>
    %cst = arith.constant dense<0.000000e+00> : vector<8x32xf32>
    %3 = tpu.matmul %1, %2, %cst {dimension_numbers = #tpu.dot_dimension_numbers<[1], [0], [0], [1], [0, 0, 1, 1], [], []>} : vector<8x32xbf16>, vector<32x32xbf16>, vector<8x32xf32> -> vector<8x32xf32>
    %c0_3 = arith.constant 0 : index
    %c0_4 = arith.constant 0 : index
    %4 = vector.load %arg3[%c0_3, %c0_4] : memref<1x32xf32, #tpu.memory_space<vmem>>, vector<1x32xf32>
    %5 = vector.broadcast %4 : vector<1x32xf32> to vector<8x32xf32>
    %6 = arith.addf %3, %5 : vector<8x32xf32>
    %cst_5 = arith.constant 5.000000e-01 : f32
    %7 = vector.broadcast %cst_5 : f32 to vector<8x32xf32>
    %8 = arith.mulf %7, %6 : vector<8x32xf32>
    %cst_6 = arith.constant 0.707106769 : f32
    %9 = vector.broadcast %cst_6 : f32 to vector<8x32xf32>
    %10 = arith.mulf %6, %9 : vector<8x32xf32>
    %11 = math.erf %10 : vector<8x32xf32>
    %cst_7 = arith.constant 1.000000e+00 : f32
    %12 = vector.broadcast %cst_7 : f32 to vector<8x32xf32>
    %13 = arith.addf %12, %11 : vector<8x32xf32>
    %14 = arith.mulf %8, %13 : vector<8x32xf32>
    %cst_8 = arith.constant dense<0.000000e+00> : vector<8xf32>
    %15 = vector.multi_reduction <add>, %14, %cst_8 [1] : vector<8x32xf32> to vector<8xf32>
    %16 = vector.shape_cast %15 : vector<8xf32> to vector<8x1xf32>
    %cst_9 = arith.constant 3.200000e+01 : f32
    %17 = vector.broadcast %cst_9 : f32 to vector<8x1xf32>
    %18 = arith.divf %16, %17 : vector<8x1xf32>
    %19 = vector.broadcast %18 : vector<8x1xf32> to vector<8x32xf32>
    %20 = arith.subf %14, %19 : vector<8x32xf32>
    %21 = arith.mulf %20, %20 : vector<8x32xf32>
    %cst_10 = arith.constant dense<0.000000e+00> : vector<8xf32>
    %22 = vector.multi_reduction <add>, %21, %cst_10 [1] : vector<8x32xf32> to vector<8xf32>
    %23 = vector.shape_cast %22 : vector<8xf32> to vector<8x1xf32>
    %cst_11 = arith.constant 3.200000e+01 : f32
    %24 = vector.broadcast %cst_11 : f32 to vector<8x1xf32>
    %25 = arith.divf %23, %24 : vector<8x1xf32>
    %26 = vector.broadcast %18 : vector<8x1xf32> to vector<8x32xf32>
    %27 = arith.subf %14, %26 : vector<8x32xf32>
    %cst_12 = arith.constant 9.99999974E-6 : f32
    %28 = vector.broadcast %cst_12 : f32 to vector<8x1xf32>
    %29 = arith.addf %25, %28 : vector<8x1xf32>
    %30 = math.rsqrt %29 : vector<8x1xf32>
    %31 = vector.broadcast %30 : vector<8x1xf32> to vector<8x32xf32>
    %32 = arith.mulf %27, %31 : vector<8x32xf32>
    %c0_13 = arith.constant 0 : index
    %c0_14 = arith.constant 0 : index
    %33 = vector.load %arg28[%c0_13, %c0_14] : memref<1x32xf32, #tpu.memory_space<vmem>>, vector<1x32xf32>
    %34 = vector.broadcast %33 : vector<1x32xf32> to vector<8x32xf32>
    %35 = arith.mulf %32, %34 : vector<8x32xf32>
    %c0_15 = arith.constant 0 : index
    %c0_16 = arith.constant 0 : index
    %36 = vector.load %arg29[%c0_15, %c0_16] : memref<1x32xf32, #tpu.memory_space<vmem>>, vector<1x32xf32>
    %37 = vector.broadcast %36 : vector<1x32xf32> to vector<8x32xf32>
    %38 = arith.addf %35, %37 : vector<8x32xf32>
    %39 = arith.truncf %38 : vector<8x32xf32> to vector<8x32xbf16>
    %c0_17 = arith.constant 0 : index
    %c0_18 = arith.constant 0 : index
    %40 = vector.load %arg4[%c0_17, %c0_18] : memref<32x1024xbf16, #tpu.memory_space<vmem>>, vector<32x1024xbf16>
    %cst_19 = arith.constant dense<0.000000e+00> : vector<8x1024xf32>
    %41 = tpu.matmul %39, %40, %cst_19 {dimension_numbers = #tpu.dot_dimension_numbers<[1], [0], [0], [1], [0, 0, 1, 1], [], []>} : vector<8x32xbf16>, vector<32x1024xbf16>, vector<8x1024xf32> -> vector<8x1024xf32>
    %c0_20 = arith.constant 0 : index
    %c0_21 = arith.constant 0 : index
    %42 = vector.load %arg5[%c0_20, %c0_21] : memref<1x1024xf32, #tpu.memory_space<vmem>>, vector<1x1024xf32>
    %43 = vector.broadcast %42 : vector<1x1024xf32> to vector<8x1024xf32>
    %44 = arith.addf %41, %43 : vector<8x1024xf32>
    %cst_22 = arith.constant 5.000000e-01 : f32
    %45 = vector.broadcast %cst_22 : f32 to vector<8x1024xf32>
    %46 = arith.mulf %45, %44 : vector<8x1024xf32>
    %cst_23 = arith.constant 0.707106769 : f32
    %47 = vector.broadcast %cst_23 : f32 to vector<8x1024xf32>
    %48 = arith.mulf %44, %47 : vector<8x1024xf32>
    %49 = math.erf %48 : vector<8x1024xf32>
    %cst_24 = arith.constant 1.000000e+00 : f32
    %50 = vector.broadcast %cst_24 : f32 to vector<8x1024xf32>
    %51 = arith.addf %50, %49 : vector<8x1024xf32>
    %52 = arith.mulf %46, %51 : vector<8x1024xf32>
    %53 = arith.truncf %52 : vector<8x1024xf32> to vector<8x1024xbf16>
    %c0_25 = arith.constant 0 : index
    %c0_26 = arith.constant 0 : index
    %54 = vector.load %arg6[%c0_25, %c0_26] : memref<1024x896xbf16, #tpu.memory_space<vmem>>, vector<1024x896xbf16>
    %cst_27 = arith.constant dense<0.000000e+00> : vector<8x896xf32>
    %55 = tpu.matmul %53, %54, %cst_27 {dimension_numbers = #tpu.dot_dimension_numbers<[1], [0], [0], [1], [0, 0, 1, 1], [], []>} : vector<8x1024xbf16>, vector<1024x896xbf16>, vector<8x896xf32> -> vector<8x896xf32>
    %c0_28 = arith.constant 0 : index
    %c0_29 = arith.constant 0 : index
    %56 = vector.load %arg7[%c0_28, %c0_29] : memref<1x896xf32, #tpu.memory_space<vmem>>, vector<1x896xf32>
    %57 = vector.broadcast %56 : vector<1x896xf32> to vector<8x896xf32>
    %58 = arith.addf %55, %57 : vector<8x896xf32>
    %cst_30 = arith.constant 5.000000e-01 : f32
    %59 = vector.broadcast %cst_30 : f32 to vector<8x896xf32>
    %60 = arith.mulf %59, %58 : vector<8x896xf32>
    %cst_31 = arith.constant 0.707106769 : f32
    %61 = vector.broadcast %cst_31 : f32 to vector<8x896xf32>
    %62 = arith.mulf %58, %61 : vector<8x896xf32>
    %63 = math.erf %62 : vector<8x896xf32>
    %cst_32 = arith.constant 1.000000e+00 : f32
    %64 = vector.broadcast %cst_32 : f32 to vector<8x896xf32>
    %65 = arith.addf %64, %63 : vector<8x896xf32>
    %66 = arith.mulf %60, %65 : vector<8x896xf32>
    %67 = arith.truncf %66 : vector<8x896xf32> to vector<8x896xbf16>
    %c0_33 = arith.constant 0 : index
    %c0_34 = arith.constant 0 : index
    %68 = vector.load %arg8[%c0_33, %c0_34] : memref<896x640xbf16, #tpu.memory_space<vmem>>, vector<896x640xbf16>
    %cst_35 = arith.constant dense<0.000000e+00> : vector<8x640xf32>
    %69 = tpu.matmul %67, %68, %cst_35 {dimension_numbers = #tpu.dot_dimension_numbers<[1], [0], [0], [1], [0, 0, 1, 1], [], []>} : vector<8x896xbf16>, vector<896x640xbf16>, vector<8x640xf32> -> vector<8x640xf32>
    %c0_36 = arith.constant 0 : index
    %c0_37 = arith.constant 0 : index
    %70 = vector.load %arg9[%c0_36, %c0_37] : memref<1x640xf32, #tpu.memory_space<vmem>>, vector<1x640xf32>
    %71 = vector.broadcast %70 : vector<1x640xf32> to vector<8x640xf32>
    %72 = arith.addf %69, %71 : vector<8x640xf32>
    %cst_38 = arith.constant 5.000000e-01 : f32
    %73 = vector.broadcast %cst_38 : f32 to vector<8x640xf32>
    %74 = arith.mulf %73, %72 : vector<8x640xf32>
    %cst_39 = arith.constant 0.707106769 : f32
    %75 = vector.broadcast %cst_39 : f32 to vector<8x640xf32>
    %76 = arith.mulf %72, %75 : vector<8x640xf32>
    %77 = math.erf %76 : vector<8x640xf32>
    %cst_40 = arith.constant 1.000000e+00 : f32
    %78 = vector.broadcast %cst_40 : f32 to vector<8x640xf32>
    %79 = arith.addf %78, %77 : vector<8x640xf32>
    %80 = arith.mulf %74, %79 : vector<8x640xf32>
    %81 = arith.truncf %80 : vector<8x640xf32> to vector<8x640xbf16>
    %c0_41 = arith.constant 0 : index
    %c0_42 = arith.constant 0 : index
    %82 = vector.load %arg10[%c0_41, %c0_42] : memref<640x512xbf16, #tpu.memory_space<vmem>>, vector<640x512xbf16>
    %cst_43 = arith.constant dense<0.000000e+00> : vector<8x512xf32>
    %83 = tpu.matmul %81, %82, %cst_43 {dimension_numbers = #tpu.dot_dimension_numbers<[1], [0], [0], [1], [0, 0, 1, 1], [], []>} : vector<8x640xbf16>, vector<640x512xbf16>, vector<8x512xf32> -> vector<8x512xf32>
    %c0_44 = arith.constant 0 : index
    %c0_45 = arith.constant 0 : index
    %84 = vector.load %arg11[%c0_44, %c0_45] : memref<1x512xf32, #tpu.memory_space<vmem>>, vector<1x512xf32>
    %85 = vector.broadcast %84 : vector<1x512xf32> to vector<8x512xf32>
    %86 = arith.addf %83, %85 : vector<8x512xf32>
    %cst_46 = arith.constant 5.000000e-01 : f32
    %87 = vector.broadcast %cst_46 : f32 to vector<8x512xf32>
    %88 = arith.mulf %87, %86 : vector<8x512xf32>
    %cst_47 = arith.constant 0.707106769 : f32
    %89 = vector.broadcast %cst_47 : f32 to vector<8x512xf32>
    %90 = arith.mulf %86, %89 : vector<8x512xf32>
    %91 = math.erf %90 : vector<8x512xf32>
    %cst_48 = arith.constant 1.000000e+00 : f32
    %92 = vector.broadcast %cst_48 : f32 to vector<8x512xf32>
    %93 = arith.addf %92, %91 : vector<8x512xf32>
    %94 = arith.mulf %88, %93 : vector<8x512xf32>
    %95 = arith.truncf %94 : vector<8x512xf32> to vector<8x512xbf16>
    %c0_49 = arith.constant 0 : index
    %c0_50 = arith.constant 0 : index
    %96 = vector.load %arg12[%c0_49, %c0_50] : memref<512x256xbf16, #tpu.memory_space<vmem>>, vector<512x256xbf16>
    %cst_51 = arith.constant dense<0.000000e+00> : vector<8x256xf32>
    %97 = tpu.matmul %95, %96, %cst_51 {dimension_numbers = #tpu.dot_dimension_numbers<[1], [0], [0], [1], [0, 0, 1, 1], [], []>} : vector<8x512xbf16>, vector<512x256xbf16>, vector<8x256xf32> -> vector<8x256xf32>
    %c0_52 = arith.constant 0 : index
    %c0_53 = arith.constant 0 : index
    %98 = vector.load %arg13[%c0_52, %c0_53] : memref<1x256xf32, #tpu.memory_space<vmem>>, vector<1x256xf32>
    %99 = vector.broadcast %98 : vector<1x256xf32> to vector<8x256xf32>
    %100 = arith.addf %97, %99 : vector<8x256xf32>
    %cst_54 = arith.constant 5.000000e-01 : f32
    %101 = vector.broadcast %cst_54 : f32 to vector<8x256xf32>
    %102 = arith.mulf %101, %100 : vector<8x256xf32>
    %cst_55 = arith.constant 0.707106769 : f32
    %103 = vector.broadcast %cst_55 : f32 to vector<8x256xf32>
    %104 = arith.mulf %100, %103 : vector<8x256xf32>
    %105 = math.erf %104 : vector<8x256xf32>
    %cst_56 = arith.constant 1.000000e+00 : f32
    %106 = vector.broadcast %cst_56 : f32 to vector<8x256xf32>
    %107 = arith.addf %106, %105 : vector<8x256xf32>
    %108 = arith.mulf %102, %107 : vector<8x256xf32>
    %109 = arith.truncf %108 : vector<8x256xf32> to vector<8x256xbf16>
    %c0_57 = arith.constant 0 : index
    %c0_58 = arith.constant 0 : index
    %110 = vector.load %arg14[%c0_57, %c0_58] : memref<256x128xbf16, #tpu.memory_space<vmem>>, vector<256x128xbf16>
    %cst_59 = arith.constant dense<0.000000e+00> : vector<8x128xf32>
    %111 = tpu.matmul %109, %110, %cst_59 {dimension_numbers = #tpu.dot_dimension_numbers<[1], [0], [0], [1], [0, 0, 1, 1], [], []>} : vector<8x256xbf16>, vector<256x128xbf16>, vector<8x128xf32> -> vector<8x128xf32>
    %c0_60 = arith.constant 0 : index
    %c0_61 = arith.constant 0 : index
    %112 = vector.load %arg15[%c0_60, %c0_61] : memref<1x128xf32, #tpu.memory_space<vmem>>, vector<1x128xf32>
    %113 = vector.broadcast %112 : vector<1x128xf32> to vector<8x128xf32>
    %114 = arith.addf %111, %113 : vector<8x128xf32>
    %cst_62 = arith.constant 5.000000e-01 : f32
    %115 = vector.broadcast %cst_62 : f32 to vector<8x128xf32>
    %116 = arith.mulf %115, %114 : vector<8x128xf32>
    %cst_63 = arith.constant 0.707106769 : f32
    %117 = vector.broadcast %cst_63 : f32 to vector<8x128xf32>
    %118 = arith.mulf %114, %117 : vector<8x128xf32>
    %119 = math.erf %118 : vector<8x128xf32>
    %cst_64 = arith.constant 1.000000e+00 : f32
    %120 = vector.broadcast %cst_64 : f32 to vector<8x128xf32>
    %121 = arith.addf %120, %119 : vector<8x128xf32>
    %122 = arith.mulf %116, %121 : vector<8x128xf32>
    %123 = arith.truncf %122 : vector<8x128xf32> to vector<8x128xbf16>
    %c0_65 = arith.constant 0 : index
    %c0_66 = arith.constant 0 : index
    %124 = vector.load %arg16[%c0_65, %c0_66] : memref<128x64xbf16, #tpu.memory_space<vmem>>, vector<128x64xbf16>
    %cst_67 = arith.constant dense<0.000000e+00> : vector<8x64xf32>
    %125 = tpu.matmul %123, %124, %cst_67 {dimension_numbers = #tpu.dot_dimension_numbers<[1], [0], [0], [1], [0, 0, 1, 1], [], []>} : vector<8x128xbf16>, vector<128x64xbf16>, vector<8x64xf32> -> vector<8x64xf32>
    %c0_68 = arith.constant 0 : index
    %c0_69 = arith.constant 0 : index
    %126 = vector.load %arg17[%c0_68, %c0_69] : memref<1x64xf32, #tpu.memory_space<vmem>>, vector<1x64xf32>
    %127 = vector.broadcast %126 : vector<1x64xf32> to vector<8x64xf32>
    %128 = arith.addf %125, %127 : vector<8x64xf32>
    %cst_70 = arith.constant 5.000000e-01 : f32
    %129 = vector.broadcast %cst_70 : f32 to vector<8x64xf32>
    %130 = arith.mulf %129, %128 : vector<8x64xf32>
    %cst_71 = arith.constant 0.707106769 : f32
    %131 = vector.broadcast %cst_71 : f32 to vector<8x64xf32>
    %132 = arith.mulf %128, %131 : vector<8x64xf32>
    %133 = math.erf %132 : vector<8x64xf32>
    %cst_72 = arith.constant 1.000000e+00 : f32
    %134 = vector.broadcast %cst_72 : f32 to vector<8x64xf32>
    %135 = arith.addf %134, %133 : vector<8x64xf32>
    %136 = arith.mulf %130, %135 : vector<8x64xf32>
    %137 = arith.truncf %136 : vector<8x64xf32> to vector<8x64xbf16>
    %c0_73 = arith.constant 0 : index
    %c0_74 = arith.constant 0 : index
    %138 = vector.load %arg18[%c0_73, %c0_74] : memref<64x32xbf16, #tpu.memory_space<vmem>>, vector<64x32xbf16>
    %cst_75 = arith.constant dense<0.000000e+00> : vector<8x32xf32>
    %139 = tpu.matmul %137, %138, %cst_75 {dimension_numbers = #tpu.dot_dimension_numbers<[1], [0], [0], [1], [0, 0, 1, 1], [], []>} : vector<8x64xbf16>, vector<64x32xbf16>, vector<8x32xf32> -> vector<8x32xf32>
    %c0_76 = arith.constant 0 : index
    %c0_77 = arith.constant 0 : index
    %140 = vector.load %arg19[%c0_76, %c0_77] : memref<1x32xf32, #tpu.memory_space<vmem>>, vector<1x32xf32>
    %141 = vector.broadcast %140 : vector<1x32xf32> to vector<8x32xf32>
    %142 = arith.addf %139, %141 : vector<8x32xf32>
    %cst_78 = arith.constant 5.000000e-01 : f32
    %143 = vector.broadcast %cst_78 : f32 to vector<8x32xf32>
    %144 = arith.mulf %143, %142 : vector<8x32xf32>
    %cst_79 = arith.constant 0.707106769 : f32
    %145 = vector.broadcast %cst_79 : f32 to vector<8x32xf32>
    %146 = arith.mulf %142, %145 : vector<8x32xf32>
    %147 = math.erf %146 : vector<8x32xf32>
    %cst_80 = arith.constant 1.000000e+00 : f32
    %148 = vector.broadcast %cst_80 : f32 to vector<8x32xf32>
    %149 = arith.addf %148, %147 : vector<8x32xf32>
    %150 = arith.mulf %144, %149 : vector<8x32xf32>
    %151 = arith.truncf %150 : vector<8x32xf32> to vector<8x32xbf16>
    %c0_81 = arith.constant 0 : index
    %c0_82 = arith.constant 0 : index
    %152 = vector.load %arg20[%c0_81, %c0_82] : memref<32x16xbf16, #tpu.memory_space<vmem>>, vector<32x16xbf16>
    %cst_83 = arith.constant dense<0.000000e+00> : vector<8x16xf32>
    %153 = tpu.matmul %151, %152, %cst_83 {dimension_numbers = #tpu.dot_dimension_numbers<[1], [0], [0], [1], [0, 0, 1, 1], [], []>} : vector<8x32xbf16>, vector<32x16xbf16>, vector<8x16xf32> -> vector<8x16xf32>
    %c0_84 = arith.constant 0 : index
    %c0_85 = arith.constant 0 : index
    %154 = vector.load %arg21[%c0_84, %c0_85] : memref<1x16xf32, #tpu.memory_space<vmem>>, vector<1x16xf32>
    %155 = vector.broadcast %154 : vector<1x16xf32> to vector<8x16xf32>
    %156 = arith.addf %153, %155 : vector<8x16xf32>
    %cst_86 = arith.constant 5.000000e-01 : f32
    %157 = vector.broadcast %cst_86 : f32 to vector<8x16xf32>
    %158 = arith.mulf %157, %156 : vector<8x16xf32>
    %cst_87 = arith.constant 0.707106769 : f32
    %159 = vector.broadcast %cst_87 : f32 to vector<8x16xf32>
    %160 = arith.mulf %156, %159 : vector<8x16xf32>
    %161 = math.erf %160 : vector<8x16xf32>
    %cst_88 = arith.constant 1.000000e+00 : f32
    %162 = vector.broadcast %cst_88 : f32 to vector<8x16xf32>
    %163 = arith.addf %162, %161 : vector<8x16xf32>
    %164 = arith.mulf %158, %163 : vector<8x16xf32>
    %165 = arith.truncf %164 : vector<8x16xf32> to vector<8x16xbf16>
    %c0_89 = arith.constant 0 : index
    %c0_90 = arith.constant 0 : index
    %166 = vector.load %arg22[%c0_89, %c0_90] : memref<16x8xbf16, #tpu.memory_space<vmem>>, vector<16x8xbf16>
    %cst_91 = arith.constant dense<0.000000e+00> : vector<8x8xf32>
    %167 = tpu.matmul %165, %166, %cst_91 {dimension_numbers = #tpu.dot_dimension_numbers<[1], [0], [0], [1], [0, 0, 1, 1], [], []>} : vector<8x16xbf16>, vector<16x8xbf16>, vector<8x8xf32> -> vector<8x8xf32>
    %c0_92 = arith.constant 0 : index
    %c0_93 = arith.constant 0 : index
    %168 = vector.load %arg23[%c0_92, %c0_93] : memref<1x8xf32, #tpu.memory_space<vmem>>, vector<1x8xf32>
    %169 = vector.broadcast %168 : vector<1x8xf32> to vector<8x8xf32>
    %170 = arith.addf %167, %169 : vector<8x8xf32>
    %cst_94 = arith.constant 5.000000e-01 : f32
    %171 = vector.broadcast %cst_94 : f32 to vector<8x8xf32>
    %172 = arith.mulf %171, %170 : vector<8x8xf32>
    %cst_95 = arith.constant 0.707106769 : f32
    %173 = vector.broadcast %cst_95 : f32 to vector<8x8xf32>
    %174 = arith.mulf %170, %173 : vector<8x8xf32>
    %175 = math.erf %174 : vector<8x8xf32>
    %cst_96 = arith.constant 1.000000e+00 : f32
    %176 = vector.broadcast %cst_96 : f32 to vector<8x8xf32>
    %177 = arith.addf %176, %175 : vector<8x8xf32>
    %178 = arith.mulf %172, %177 : vector<8x8xf32>
    %179 = arith.truncf %178 : vector<8x8xf32> to vector<8x8xbf16>
    %c0_97 = arith.constant 0 : index
    %c0_98 = arith.constant 0 : index
    %180 = vector.load %arg24[%c0_97, %c0_98] : memref<8x4xbf16, #tpu.memory_space<vmem>>, vector<8x4xbf16>
    %cst_99 = arith.constant dense<0.000000e+00> : vector<8x4xf32>
    %181 = tpu.matmul %179, %180, %cst_99 {dimension_numbers = #tpu.dot_dimension_numbers<[1], [0], [0], [1], [0, 0, 1, 1], [], []>} : vector<8x8xbf16>, vector<8x4xbf16>, vector<8x4xf32> -> vector<8x4xf32>
    %c0_100 = arith.constant 0 : index
    %c0_101 = arith.constant 0 : index
    %182 = vector.load %arg25[%c0_100, %c0_101] : memref<1x4xf32, #tpu.memory_space<vmem>>, vector<1x4xf32>
    %183 = vector.broadcast %182 : vector<1x4xf32> to vector<8x4xf32>
    %184 = arith.addf %181, %183 : vector<8x4xf32>
    %cst_102 = arith.constant 5.000000e-01 : f32
    %185 = vector.broadcast %cst_102 : f32 to vector<8x4xf32>
    %186 = arith.mulf %185, %184 : vector<8x4xf32>
    %cst_103 = arith.constant 0.707106769 : f32
    %187 = vector.broadcast %cst_103 : f32 to vector<8x4xf32>
    %188 = arith.mulf %184, %187 : vector<8x4xf32>
    %189 = math.erf %188 : vector<8x4xf32>
    %cst_104 = arith.constant 1.000000e+00 : f32
    %190 = vector.broadcast %cst_104 : f32 to vector<8x4xf32>
    %191 = arith.addf %190, %189 : vector<8x4xf32>
    %192 = arith.mulf %186, %191 : vector<8x4xf32>
    %cst_105 = arith.constant dense<0.000000e+00> : vector<8xf32>
    %193 = vector.multi_reduction <add>, %192, %cst_105 [1] : vector<8x4xf32> to vector<8xf32>
    %194 = vector.shape_cast %193 : vector<8xf32> to vector<8x1xf32>
    %cst_106 = arith.constant 4.000000e+00 : f32
    %195 = vector.broadcast %cst_106 : f32 to vector<8x1xf32>
    %196 = arith.divf %194, %195 : vector<8x1xf32>
    %197 = vector.broadcast %196 : vector<8x1xf32> to vector<8x4xf32>
    %198 = arith.subf %192, %197 : vector<8x4xf32>
    %199 = arith.mulf %198, %198 : vector<8x4xf32>
    %cst_107 = arith.constant dense<0.000000e+00> : vector<8xf32>
    %200 = vector.multi_reduction <add>, %199, %cst_107 [1] : vector<8x4xf32> to vector<8xf32>
    %201 = vector.shape_cast %200 : vector<8xf32> to vector<8x1xf32>
    %cst_108 = arith.constant 4.000000e+00 : f32
    %202 = vector.broadcast %cst_108 : f32 to vector<8x1xf32>
    %203 = arith.divf %201, %202 : vector<8x1xf32>
    %204 = vector.broadcast %196 : vector<8x1xf32> to vector<8x4xf32>
    %205 = arith.subf %192, %204 : vector<8x4xf32>
    %cst_109 = arith.constant 9.99999974E-6 : f32
    %206 = vector.broadcast %cst_109 : f32 to vector<8x1xf32>
    %207 = arith.addf %203, %206 : vector<8x1xf32>
    %208 = math.rsqrt %207 : vector<8x1xf32>
    %209 = vector.broadcast %208 : vector<8x1xf32> to vector<8x4xf32>
    %210 = arith.mulf %205, %209 : vector<8x4xf32>
    %c0_110 = arith.constant 0 : index
    %c0_111 = arith.constant 0 : index
    %211 = vector.load %arg30[%c0_110, %c0_111] : memref<1x4xf32, #tpu.memory_space<vmem>>, vector<1x4xf32>
    %212 = vector.broadcast %211 : vector<1x4xf32> to vector<8x4xf32>
    %213 = arith.mulf %210, %212 : vector<8x4xf32>
    %c0_112 = arith.constant 0 : index
    %c0_113 = arith.constant 0 : index
    %214 = vector.load %arg31[%c0_112, %c0_113] : memref<1x4xf32, #tpu.memory_space<vmem>>, vector<1x4xf32>
    %215 = vector.broadcast %214 : vector<1x4xf32> to vector<8x4xf32>
    %216 = arith.addf %213, %215 : vector<8x4xf32>
    %217 = arith.truncf %216 : vector<8x4xf32> to vector<8x4xbf16>
    %c0_114 = arith.constant 0 : index
    %c0_115 = arith.constant 0 : index
    %218 = vector.load %arg26[%c0_114, %c0_115] : memref<4x1xbf16, #tpu.memory_space<vmem>>, vector<4x1xbf16>
    %cst_116 = arith.constant dense<0.000000e+00> : vector<8x1xf32>
    %219 = tpu.matmul %217, %218, %cst_116 {dimension_numbers = #tpu.dot_dimension_numbers<[1], [0], [0], [1], [0, 0, 1, 1], [], []>} : vector<8x4xbf16>, vector<4x1xbf16>, vector<8x1xf32> -> vector<8x1xf32>
    %c0_117 = arith.constant 0 : index
    %c0_118 = arith.constant 0 : index
    %220 = vector.load %arg27[%c0_117, %c0_118] : memref<1x1xf32, #tpu.memory_space<vmem>>, vector<1x1xf32>
    %221 = vector.broadcast %220 : vector<1x1xf32> to vector<8x1xf32>
    %222 = arith.addf %219, %221 : vector<8x1xf32>
    %c0_119 = arith.constant 0 : index
    %c0_120 = arith.constant 0 : index
    %223 = vector.load %arg32[%c0_119, %c0_120] : memref<8x1xf32, #tpu.memory_space<vmem>>, vector<8x1xf32>
    tpu.vector_store %arg32[%c0_119, %c0_120], %222 {strides = array<i32>} : memref<8x1xf32, #tpu.memory_space<vmem>>, vector<8x1xf32>,
    return
  }
  func.func @transform_0(%arg0: i32) -> (i32, i32) {
    %c0_i32 = arith.constant 0 : i32
    %c0_i32_0 = arith.constant 0 : i32
    return %arg0, %c0_i32 : i32, i32
  }
  func.func @transform_1(%arg0: i32) -> (i32, i32) {
    %c0_i32 = arith.constant 0 : i32
    %c0_i32_0 = arith.constant 0 : i32
    %c0_i32_1 = arith.constant 0 : i32
    return %c0_i32, %c0_i32_0 : i32, i32
  }
  func.func @transform_2(%arg0: i32) -> (i32, i32) {
    %c0_i32 = arith.constant 0 : i32
    %c0_i32_0 = arith.constant 0 : i32
    %c0_i32_1 = arith.constant 0 : i32
    return %c0_i32, %c0_i32_0 : i32, i32
  }
  func.func @transform_3(%arg0: i32) -> (i32, i32) {
    %c0_i32 = arith.constant 0 : i32
    %c0_i32_0 = arith.constant 0 : i32
    %c0_i32_1 = arith.constant 0 : i32
    return %c0_i32, %c0_i32_0 : i32, i32
  }
  func.func @transform_4(%arg0: i32) -> (i32, i32) {
    %c0_i32 = arith.constant 0 : i32
    %c0_i32_0 = arith.constant 0 : i32
    %c0_i32_1 = arith.constant 0 : i32
    return %c0_i32, %c0_i32_0 : i32, i32
  }
  func.func @transform_5(%arg0: i32) -> (i32, i32) {
    %c0_i32 = arith.constant 0 : i32
    %c0_i32_0 = arith.constant 0 : i32
    %c0_i32_1 = arith.constant 0 : i32
    return %c0_i32, %c0_i32_0 : i32, i32
  }
  func.func @transform_6(%arg0: i32) -> (i32, i32) {
    %c0_i32 = arith.constant 0 : i32
    %c0_i32_0 = arith.constant 0 : i32
    %c0_i32_1 = arith.constant 0 : i32
    return %c0_i32, %c0_i32_0 : i32, i32
  }
  func.func @transform_7(%arg0: i32) -> (i32, i32) {
    %c0_i32 = arith.constant 0 : i32
    %c0_i32_0 = arith.constant 0 : i32
    %c0_i32_1 = arith.constant 0 : i32
    return %c0_i32, %c0_i32_0 : i32, i32
  }
  func.func @transform_8(%arg0: i32) -> (i32, i32) {
    %c0_i32 = arith.constant 0 : i32
    %c0_i32_0 = arith.constant 0 : i32
    %c0_i32_1 = arith.constant 0 : i32
    return %c0_i32, %c0_i32_0 : i32, i32
  }
  func.func @transform_9(%arg0: i32) -> (i32, i32) {
    %c0_i32 = arith.constant 0 : i32
    %c0_i32_0 = arith.constant 0 : i32
    %c0_i32_1 = arith.constant 0 : i32
    return %c0_i32, %c0_i32_0 : i32, i32
  }
  func.func @transform_10(%arg0: i32) -> (i32, i32) {
    %c0_i32 = arith.constant 0 : i32
    %c0_i32_0 = arith.constant 0 : i32
    %c0_i32_1 = arith.constant 0 : i32
    return %c0_i32, %c0_i32_0 : i32, i32
  }
  func.func @transform_11(%arg0: i32) -> (i32, i32) {
    %c0_i32 = arith.constant 0 : i32
    %c0_i32_0 = arith.constant 0 : i32
    %c0_i32_1 = arith.constant 0 : i32
    return %c0_i32, %c0_i32_0 : i32, i32
  }
  func.func @transform_12(%arg0: i32) -> (i32, i32) {
    %c0_i32 = arith.constant 0 : i32
    %c0_i32_0 = arith.constant 0 : i32
    %c0_i32_1 = arith.constant 0 : i32
    return %c0_i32, %c0_i32_0 : i32, i32
  }
  func.func @transform_13(%arg0: i32) -> (i32, i32) {
    %c0_i32 = arith.constant 0 : i32
    %c0_i32_0 = arith.constant 0 : i32
    %c0_i32_1 = arith.constant 0 : i32
    return %c0_i32, %c0_i32_0 : i32, i32
  }
  func.func @transform_14(%arg0: i32) -> (i32, i32) {
    %c0_i32 = arith.constant 0 : i32
    %c0_i32_0 = arith.constant 0 : i32
    %c0_i32_1 = arith.constant 0 : i32
    return %c0_i32, %c0_i32_0 : i32, i32
  }
  func.func @transform_15(%arg0: i32) -> (i32, i32) {
    %c0_i32 = arith.constant 0 : i32
    %c0_i32_0 = arith.constant 0 : i32
    %c0_i32_1 = arith.constant 0 : i32
    return %c0_i32, %c0_i32_0 : i32, i32
  }
  func.func @transform_16(%arg0: i32) -> (i32, i32) {
    %c0_i32 = arith.constant 0 : i32
    %c0_i32_0 = arith.constant 0 : i32
    %c0_i32_1 = arith.constant 0 : i32
    return %c0_i32, %c0_i32_0 : i32, i32
  }
  func.func @transform_17(%arg0: i32) -> (i32, i32) {
    %c0_i32 = arith.constant 0 : i32
    %c0_i32_0 = arith.constant 0 : i32
    %c0_i32_1 = arith.constant 0 : i32
    return %c0_i32, %c0_i32_0 : i32, i32
  }
  func.func @transform_18(%arg0: i32) -> (i32, i32) {
    %c0_i32 = arith.constant 0 : i32
    %c0_i32_0 = arith.constant 0 : i32
    %c0_i32_1 = arith.constant 0 : i32
    return %c0_i32, %c0_i32_0 : i32, i32
  }
  func.func @transform_19(%arg0: i32) -> (i32, i32) {
    %c0_i32 = arith.constant 0 : i32
    %c0_i32_0 = arith.constant 0 : i32
    %c0_i32_1 = arith.constant 0 : i32
    return %c0_i32, %c0_i32_0 : i32, i32
  }
  func.func @transform_20(%arg0: i32) -> (i32, i32) {
    %c0_i32 = arith.constant 0 : i32
    %c0_i32_0 = arith.constant 0 : i32
    %c0_i32_1 = arith.constant 0 : i32
    return %c0_i32, %c0_i32_0 : i32, i32
  }
  func.func @transform_21(%arg0: i32) -> (i32, i32) {
    %c0_i32 = arith.constant 0 : i32
    %c0_i32_0 = arith.constant 0 : i32
    %c0_i32_1 = arith.constant 0 : i32
    return %c0_i32, %c0_i32_0 : i32, i32
  }
  func.func @transform_22(%arg0: i32) -> (i32, i32) {
    %c0_i32 = arith.constant 0 : i32
    %c0_i32_0 = arith.constant 0 : i32
    %c0_i32_1 = arith.constant 0 : i32
    return %c0_i32, %c0_i32_0 : i32, i32
  }
  func.func @transform_23(%arg0: i32) -> (i32, i32) {
    %c0_i32 = arith.constant 0 : i32
    %c0_i32_0 = arith.constant 0 : i32
    %c0_i32_1 = arith.constant 0 : i32
    return %c0_i32, %c0_i32_0 : i32, i32
  }
  func.func @transform_24(%arg0: i32) -> (i32, i32) {
    %c0_i32 = arith.constant 0 : i32
    %c0_i32_0 = arith.constant 0 : i32
    %c0_i32_1 = arith.constant 0 : i32
    return %c0_i32, %c0_i32_0 : i32, i32
  }
  func.func @transform_25(%arg0: i32) -> (i32, i32) {
    %c0_i32 = arith.constant 0 : i32
    %c0_i32_0 = arith.constant 0 : i32
    %c0_i32_1 = arith.constant 0 : i32
    return %c0_i32, %c0_i32_0 : i32, i32
  }
  func.func @transform_26(%arg0: i32) -> (i32, i32) {
    %c0_i32 = arith.constant 0 : i32
    %c0_i32_0 = arith.constant 0 : i32
    %c0_i32_1 = arith.constant 0 : i32
    return %c0_i32, %c0_i32_0 : i32, i32
  }
  func.func @transform_27(%arg0: i32) -> (i32, i32) {
    %c0_i32 = arith.constant 0 : i32
    %c0_i32_0 = arith.constant 0 : i32
    %c0_i32_1 = arith.constant 0 : i32
    return %c0_i32, %c0_i32_0 : i32, i32
  }
  func.func @transform_28(%arg0: i32) -> (i32, i32) {
    %c0_i32 = arith.constant 0 : i32
    %c0_i32_0 = arith.constant 0 : i32
    %c0_i32_1 = arith.constant 0 : i32
    return %c0_i32, %c0_i32_0 : i32, i32
  }
  func.func @transform_29(%arg0: i32) -> (i32, i32) {
    %c0_i32 = arith.constant 0 : i32
    %c0_i32_0 = arith.constant 0 : i32
    %c0_i32_1 = arith.constant 0 : i32
    return %c0_i32, %c0_i32_0 : i32, i32
  }
  func.func @transform_30(%arg0: i32) -> (i32, i32) {
    %c0_i32 = arith.constant 0 : i32
    %c0_i32_0 = arith.constant 0 : i32
    %c0_i32_1 = arith.constant 0 : i32
    return %c0_i32, %c0_i32_0 : i32, i32
  }
  func.func @transform_31(%arg0: i32) -> (i32, i32) {
    %c0_i32 = arith.constant 0 : i32
    %c0_i32_0 = arith.constant 0 : i32
    return %arg0, %c0_i32 : i32, i32
  }
}

</mosaic_0001>

<bundles_post_ra>
// kernel: mlp_forward.1
= control target key start
LH: loop header
LB: loop body
LE: loop exit
PB: predicated region body
PF: predicated region fallthrough
CT: control target
= control target key end

     0   :  { %s12741_s6 = smov 1   ;;  %s12742_s10 = smov 2   ;;  %s13363_s0 = inlined_call_operand.smem [shape: u32[32], index: -1, kind: input, shape index: {}] }
   0x1   :  { %s12819_s5 = sld [smem:[%s13363_s0]]   ;;  %s12743_s14 = smov 3  }
   0x2   :  { %s12824_s9 = sld [smem:[%s13363_s0 + %s12741_s6]]   ;;  %s12744_s18 = smov 4  }
   0x3   :  { %s12829_s13 = sld [smem:[%s13363_s0 + %s12742_s10]]   ;;  %s12745_s22 = smov 5  }
   0x4   :  { %s12834_s17 = sld [smem:[%s13363_s0 + %s12743_s14]]   ;;  %s12746_s26 = smov 6  }
   0x5   :  { %s12839_s21 = sld [smem:[%s13363_s0 + %s12744_s18]]   ;;  %s12747_s30 = smov 7  }
   0x6   :  { %s12844_s25 = sld [smem:[%s13363_s0 + %s12745_s22]]   ;;  %s12748_s4 = smov 8  }
   0x7   :  { %s12849_s29 = sld [smem:[%s13363_s0 + %s12746_s26]]   ;;  %s12749_s10 = smov 9  }
   0x8   :  { %s12854_s3 = sld [smem:[%s13363_s0 + %s12747_s30]]   ;;  %s12750_s15 = smov 10  }
   0x9   :  { %s12859_s8 = sld [smem:[%s13363_s0 + %s12748_s4]]   ;;  %s12751_s20 = smov 11  }
   0xa   :  { %s12864_s14 = sld [smem:[%s13363_s0 + %s12749_s10]]   ;;  %s12752_s26 = smov 12  }
   0xb   :  { %s12869_s19 = sld [smem:[%s13363_s0 + %s12750_s15]]   ;;  %s12753_s1 = smov 13  }
   0xc   :  { %s12874_s24 = sld [smem:[%s13363_s0 + %s12751_s20]]   ;;  %s12754_s7 = smov 14  }
   0xd   :  { %13375 = sst [smem:[#allocation53_spill]] %s12849_s29  ;;  %s12755_s15 = smov 15  }
   0xe   :  { %s12879_s30 = sld [smem:[%s13363_s0 + %s12752_s26]]   ;;  %s12756_s22 = smov 16  }
   0xf   :  { %13376 = sst [smem:[#allocation54_spill]] %s12859_s8  ;;  %s12757_s28 = smov 17  }
  0x10   :  { %s12884_s6 = sld [smem:[%s13363_s0 + %s12753_s1]]   ;;  %s12767_s16 = smov 27  }
  0x11   :  { %13377 = sst [smem:[#allocation55_spill]] %s12869_s19  ;;  %s12768_s23 = smov 28  }
  0x12   :  { %s12889_s12 = sld [smem:[%s13363_s0 + %s12754_s7]]   ;;  %s12758_s7 = smov 18  }
  0x13   :  { %s12894_s20 = sld [smem:[%s13363_s0 + %s12755_s15]]   ;;  %s12759_s15 = smov 19  }
  0x14   :  { %13378 = sst [smem:[#allocation56_spill]] %s12879_s30  ;;  %s12769_s1 = smov 29  }
  0x15   :  { %s12899_s27 = sld [smem:[%s13363_s0 + %s12756_s22]]   ;;  %s12760_s22 = smov 20  }
  0x16   :  { %s12904_s4 = sld [smem:[%s13363_s0 + %s12757_s28]]   ;;  %s12761_s28 = smov 21  }
  0x17   :  { %s12919_s30 = sld [smem:[%s13363_s0 + %s12760_s22]]   ;;  %s12764_s22 = smov 24  }
  0x18   :  { %13379 = sst [smem:[#allocation57_spill]] %s12889_s12  ;;  %s12770_s10 = smov 30  }
  0x19   :  { %13380 = sst [smem:[#allocation58_spill]] %s12894_s20 }
  0x1a   :  { %s12909_s12 = sld [smem:[%s13363_s0 + %s12758_s7]]   ;;  %s12762_s7 = smov 22  }
  0x1b   :  { %s12914_s20 = sld [smem:[%s13363_s0 + %s12759_s15]]   ;;  %s12763_s15 = smov 23  }
  0x1c   :  { %13381 = sst [smem:[#allocation59_spill]] %s12904_s4 }
  0x1d   :  { %s12924_s4 = sld [smem:[%s13363_s0 + %s12761_s28]]   ;;  %s12765_s28 = smov 25  }
  0x1e   :  { %s12939_s19 = sld [smem:[%s13363_s0 + %s12764_s22]]  }
  0x1f   :  { %s12957_s8 = sld [smem:[%s13363_s0 + %s12768_s23]]  }
  0x20   :  { %13382 = sst [smem:[#allocation60_spill]] %s12909_s12 }
  0x21   :  { %13383 = sst [smem:[#allocation61_spill]] %s12914_s20 }
  0x22   :  { %s12929_s12 = sld [smem:[%s13363_s0 + %s12762_s7]]   ;;  %s12766_s7 = smov 26  }
  0x23   :  { %13384 = sst [smem:[#allocation62_spill]] %s12924_s4 }
  0x24   :  { %s12934_s20 = sld [smem:[%s13363_s0 + %s12763_s15]]  }
  0x25   :  { %s12944_s4 = sld [smem:[%s13363_s0 + %s12765_s28]]  }
  0x26   :  { %s12967_s29 = sld [smem:[%s13363_s0 + %s12770_s10]]  }
  0x28   :  { %13385 = sst [smem:[#allocation63_spill]] %s12929_s12 }
  0x29   :  { %s9224_s12 = sld [smem:[%s13363_s0 + %s12766_s7]]  }
  0x2a   :  { %13386 = sst [smem:[#allocation64_spill]] %s12934_s20 }
  0x2b   :  { %13387 = sst [smem:[#allocation65_spill]] %s12944_s4 }
  0x2c   :  { %s12952_s20 = sld [smem:[%s13363_s0 + %s12767_s16]]   ;;  %s12771_s16 = smov 31  }
  0x2d   :  { %s12962_s4 = sld [smem:[%s13363_s0 + %s12769_s1]]  }
  0x2f   :  { %v68_v0 = vstv %s9224_s12 }
  0x30   :  { %69 = vst [vmem:[#allocation2] sm:$0x1] %v68_v0 }
  0x32   :  { %13388 = sst [smem:[#allocation66_spill]] %s12952_s20 }
  0x33   :  { %s12972_s20 = sld [smem:[%s13363_s0 + %s12771_s16]]  }
  0x34   :  { %70 = vsyncpa [#allocation4], 0 }
  0x35   :  { %71 = vsyncpa [#allocation6], 0 }
  0x36   :  { %72 = vsyncpa [#allocation9], 0 }
  0x37   :  { %73 = vsyncpa [#allocation12], 0 }
  0x38   :  { %74 = vsyncpa [#allocation15], 0 }
  0x39   :  { %75 = vsyncpa [#allocation18], 0 }
  0x3a   :  { %76 = vsyncpa [#allocation21], 0 }
  0x3b   :  { %77 = vsyncpa [#allocation24], 0 }
  0x3c   :  { %78 = vsyncpa [#allocation27], 0 }
  0x3d   :  { %79 = vsyncpa [#allocation30], 0 }
  0x3e   :  { %80 = vsyncpa [#allocation33], 0 }
  0x3f   :  { %81 = vsyncpa [#allocation36], 0 }
  0x40   :  { %82 = vsyncpa [#allocation39], 0  ;;  %s12772_s0 = smov [#allocation5]   ;;  %s12187_s12 = scalar_lea.hbm %s12824_s9, 256 }
  0x41   :  { %s98_s23 = sshll.u32 %s12772_s0, 4  ;;  %p12188_p0 = scmp.ne.s32.totalorder %s12824_s9, %s12187_s12  ;;  %s99_s23 = int_to_ptr.vmem [resolvable:$true] %s98_s23 }
  0x42   :  { %p12191_p1 = scmp.lt.u32.totalorder %s12187_s12, %s12824_s9 }
  0x44   :  { %p12193_p2 = pnand %p12191_p1, %p12188_p0 }
  0x46   :  { %12196 = shalt.err (!%p12193_p2)
}
  0x47   :  { %s12197_s22 = scalar_lea.vmem %s99_s23, 256  ;;  %p12202_p4 = scmp.lt.s32.totalorder %s99_s23, %s99_s23 }
  0x48   :  { %p12198_p3 = scmp.ne.s32.totalorder %s99_s23, %s12197_s22  ;;  %p12203_p5 = scmp.lt.s32.totalorder %s12197_s22, %s12197_s22 }
  0x4a   :  { %p12204_p6 = por %p12203_p5, %p12202_p4 }
  0x4c   :  { %p12205_p7 = pnand %p12204_p6, %p12198_p3 }
  0x4e   :  { %12208 = shalt.err (!%p12205_p7)
}
  0x4f   :  { %s12773_s26 = smov 64   ;;  %s12774_s1 = smov 4  }
  0x50   :  { %104 = dma.hbm_to_vmem [thread:$0]  %s12824_s9, 256, %s99_s23, [#allocation6], %s12773_s26, %s12773_s26, %s12774_s1  }
  0x51   :  { %s12775_s28 = smov [#allocation8]   ;;  %s12209_s10 = scalar_lea.hbm %s12834_s17, 2048 }
  0x52   :  { %s120_s2 = sshll.u32 %s12775_s28, 4  ;;  %p12210_p8 = scmp.ne.s32.totalorder %s12834_s17, %s12209_s10  ;;  %s121_s2 = int_to_ptr.vmem [resolvable:$true] %s120_s2 }
  0x53   :  { %p12213_p9 = scmp.lt.u32.totalorder %s12209_s10, %s12834_s17 }
  0x55   :  { %p12215_p10 = pnand %p12213_p9, %p12210_p8 }
  0x57   :  { %12218 = shalt.err (!%p12215_p10)
}
  0x58   :  { %s12219_s7 = scalar_lea.vmem %s121_s2, 2048  ;;  %p12224_p12 = scmp.lt.s32.totalorder %s121_s2, %s121_s2 }
  0x59   :  { %p12220_p11 = scmp.ne.s32.totalorder %s121_s2, %s12219_s7  ;;  %p12225_p13 = scmp.lt.s32.totalorder %s12219_s7, %s12219_s7 }
  0x5b   :  { %p12226_p0 = por %p12225_p13, %p12224_p12 }
  0x5d   :  { %p12227_p1 = pnand %p12226_p0, %p12220_p11 }
  0x5f   :  { %12230 = shalt.err (!%p12227_p1)
}
  0x60   :  { %s12776_s11 = smov 512   ;;  %s12777_s9 = smov 32  }
  0x61   :  { %126 = dma.hbm_to_vmem [thread:$0]  %s12834_s17, 2048, %s121_s2, [#allocation9], %s12776_s11, %s12776_s11, %s12777_s9  }
  0x62   :  { %s12778_s16 = smov [#allocation11]   ;;  %s12231_s18 = scalar_lea.hbm %s12844_s25, 57344 }
  0x63   :  { %s142_s15 = sshll.u32 %s12778_s16, 4  ;;  %p12232_p2 = scmp.ne.s32.totalorder %s12844_s25, %s12231_s18  ;;  %s143_s15 = int_to_ptr.vmem [resolvable:$true] %s142_s15 }
  0x64   :  { %p12235_p3 = scmp.lt.u32.totalorder %s12231_s18, %s12844_s25 }
  0x66   :  { %p12237_p4 = pnand %p12235_p3, %p12232_p2 }
  0x68   :  { %12240 = shalt.err (!%p12237_p4)
}
  0x69   :  { %s12241_s0 = scalar_lea.vmem %s143_s15, 57344  ;;  %p12246_p6 = scmp.lt.s32.totalorder %s143_s15, %s143_s15 }
  0x6a   :  { %p12242_p5 = scmp.ne.s32.totalorder %s143_s15, %s12241_s0  ;;  %p12247_p7 = scmp.lt.s32.totalorder %s12241_s0, %s12241_s0 }
  0x6c   :  { %p12248_p8 = por %p12247_p7, %p12246_p6 }
  0x6e   :  { %p12249_p9 = pnand %p12248_p8, %p12242_p5 }
  0x70   :  { %12252 = shalt.err (!%p12249_p9)
}
  0x71   :  { %s12779_s23 = smov 448   ;;  %s12780_s17 = smov 28  }
  0x72   :  { %148 = dma.hbm_to_vmem [thread:$0]  %s12844_s25, 57344, %s143_s15, [#allocation12], %s12779_s23, %s12779_s23, %s12780_s17  }
  0x73   :  { %s12781_s12 = smov [#allocation14]   ;;  %s12253_s28 = scalar_lea.hbm %s12854_s3, 35840 }
  0x74   :  { %s164_s22 = sshll.u32 %s12781_s12, 4  ;;  %p12254_p10 = scmp.ne.s32.totalorder %s12854_s3, %s12253_s28  ;;  %s165_s22 = int_to_ptr.vmem [resolvable:$true] %s164_s22 }
  0x75   :  { %p12257_p11 = scmp.lt.u32.totalorder %s12253_s28, %s12854_s3 }
  0x77   :  { %p12259_p12 = pnand %p12257_p11, %p12254_p10 }
  0x79   :  { %12262 = shalt.err (!%p12259_p12)
}
  0x7a   :  { %s12263_s2 = scalar_lea.vmem %s165_s22, 35840  ;;  %p12268_p0 = scmp.lt.s32.totalorder %s165_s22, %s165_s22 }
  0x7b   :  { %p12264_p13 = scmp.ne.s32.totalorder %s165_s22, %s12263_s2  ;;  %p12269_p1 = scmp.lt.s32.totalorder %s12263_s2, %s12263_s2 }
  0x7d   :  { %p12270_p2 = por %p12269_p1, %p12268_p0 }
  0x7f   :  { %p12271_p3 = pnand %p12270_p2, %p12264_p13 }
  0x81   :  { %12274 = shalt.err (!%p12271_p3)
}
  0x82   :  { %s12782_s10 = smov 320   ;;  %s12783_s25 = smov 20  }
  0x83   :  { %170 = dma.hbm_to_vmem [thread:$0]  %s12854_s3, 35840, %s165_s22, [#allocation15], %s12782_s10, %s12782_s10, %s12783_s25  }
  0x84   :  { %s12784_s7 = smov [#allocation17]   ;;  %s12275_s9 = scalar_lea.hbm %s12864_s14, 20480 }
  0x85   :  { %s186_s11 = sshll.u32 %s12784_s7, 4  ;;  %p12276_p4 = scmp.ne.s32.totalorder %s12864_s14, %s12275_s9  ;;  %s187_s11 = int_to_ptr.vmem [resolvable:$true] %s186_s11 }
  0x86   :  { %p12279_p5 = scmp.lt.u32.totalorder %s12275_s9, %s12864_s14 }
  0x88   :  { %p12281_p6 = pnand %p12279_p5, %p12276_p4 }
  0x8a   :  { %12284 = shalt.err (!%p12281_p6)
}
  0x8b   :  { %s12285_s16 = scalar_lea.vmem %s187_s11, 20480  ;;  %p12290_p8 = scmp.lt.s32.totalorder %s187_s11, %s187_s11 }
  0x8c   :  { %p12286_p7 = scmp.ne.s32.totalorder %s187_s11, %s12285_s16  ;;  %p12291_p9 = scmp.lt.s32.totalorder %s12285_s16, %s12285_s16 }
  0x8e   :  { %p12292_p10 = por %p12291_p9, %p12290_p8 }
  0x90   :  { %p12293_p11 = pnand %p12292_p10, %p12286_p7 }
  0x92   :  { %12296 = shalt.err (!%p12293_p11)
}
  0x93   :  { %s12785_s15 = smov 256   ;;  %s12786_s3 = smov 16  }
  0x94   :  { %192 = dma.hbm_to_vmem [thread:$0]  %s12864_s14, 20480, %s187_s11, [#allocation18], %s12785_s15, %s12785_s15, %s12786_s3  }
  0x95   :  { %s12787_s18 = smov [#allocation20]   ;;  %s12297_s23 = scalar_lea.hbm %s12874_s24, 8192 }
  0x96   :  { %s208_s0 = sshll.u32 %s12787_s18, 4  ;;  %p12298_p12 = scmp.ne.s32.totalorder %s12874_s24, %s12297_s23  ;;  %s209_s0 = int_to_ptr.vmem [resolvable:$true] %s208_s0 }
  0x97   :  { %p12301_p13 = scmp.lt.u32.totalorder %s12297_s23, %s12874_s24 }
  0x99   :  { %p12303_p0 = pnand %p12301_p13, %p12298_p12 }
  0x9b   :  { %12306 = shalt.err (!%p12303_p0)
}
  0x9c   :  { %s12307_s17 = scalar_lea.vmem %s209_s0, 8192  ;;  %p12312_p2 = scmp.lt.s32.totalorder %s209_s0, %s209_s0 }
  0x9d   :  { %p12308_p1 = scmp.ne.s32.totalorder %s209_s0, %s12307_s17  ;;  %p12313_p3 = scmp.lt.s32.totalorder %s12307_s17, %s12307_s17 }
  0x9f   :  { %p12314_p4 = por %p12313_p3, %p12312_p2 }
  0xa1   :  { %p12315_p5 = pnand %p12314_p4, %p12308_p1 }
  0xa3   :  { %12318 = shalt.err (!%p12315_p5)
}
  0xa4   :  { %s12788_s12 = smov 128   ;;  %s12789_s14 = smov 8  }
  0xa5   :  { %214 = dma.hbm_to_vmem [thread:$0]  %s12874_s24, 8192, %s209_s0, [#allocation21], %s12788_s12, %s12788_s12, %s12789_s14  }
  0xa6   :  { %s12790_s22 = smov [#allocation23]   ;;  %s12791_s2 = smov [#allocation26]  }
  0xa7   :  { %s230_s28 = sshll.u32 %s12790_s22, 4  ;;  %s255_s10 = sshll.u32 %s12791_s2, 4  ;;  %s231_s28 = int_to_ptr.vmem [resolvable:$true] %s230_s28  ;;  %s256_s10 = int_to_ptr.vmem [resolvable:$true] %s255_s10 }
  0xa8   :  { %s12319_s25 = scalar_lea.hbm %s12884_s6, 2048 }
  0xa9   :  { %p12320_p6 = scmp.ne.s32.totalorder %s12884_s6, %s12319_s25  ;;  %p12323_p7 = scmp.lt.u32.totalorder %s12319_s25, %s12884_s6 }
  0xab   :  { %p12325_p8 = pnand %p12323_p7, %p12320_p6 }
  0xad   :  { %12328 = shalt.err (!%p12325_p8)
}
  0xae   :  { %s12329_s7 = scalar_lea.vmem %s231_s28, 2048  ;;  %p12334_p10 = scmp.lt.s32.totalorder %s231_s28, %s231_s28 }
  0xaf   :  { %p12330_p9 = scmp.ne.s32.totalorder %s231_s28, %s12329_s7  ;;  %p12335_p11 = scmp.lt.s32.totalorder %s12329_s7, %s12329_s7 }
  0xb1   :  { %p12336_p12 = por %p12335_p11, %p12334_p10 }
  0xb3   :  { %p12337_p13 = pnand %p12336_p12, %p12330_p9 }
  0xb5   :  { %12340 = shalt.err (!%p12337_p13)
}
  0xb6   :  { %236 = dma.hbm_to_vmem [thread:$0]  %s12884_s6, 2048, %s231_s28, [#allocation24], %s12773_s26, %s12773_s26, %s12774_s1  }
  0xb7   :  { %s12341_s24 = scalar_lea.hbm %s12899_s27, 16 }
  0xb8   :  { %p12342_p0 = scmp.ne.s32.totalorder %s12899_s27, %s12341_s24  ;;  %p12345_p1 = scmp.lt.u32.totalorder %s12341_s24, %s12899_s27 }
  0xba   :  { %p12347_p2 = pnand %p12345_p1, %p12342_p0 }
  0xbc   :  { %12350 = shalt.err (!%p12347_p2)
}
  0xbd   :  { %s12351_s11 = scalar_lea.vmem %s256_s10, 16  ;;  %s12355_s9 = scalar_lea.vmem %s256_s10, 32 }
  0xbe   :  { %p12352_p3 = scmp.ne.s32.totalorder %s256_s10, %s12351_s11  ;;  %p12356_p4 = scmp.lt.s32.totalorder %s256_s10, %s256_s10 }
  0xbf   :  { %p12357_p5 = scmp.lt.s32.totalorder %s12355_s9, %s12351_s11 }
  0xc1   :  { %p12358_p6 = por %p12357_p5, %p12356_p4 }
  0xc3   :  { %p12359_p7 = pnand %p12358_p6, %p12352_p3 }
  0xc5   :  { %12362 = shalt.err (!%p12359_p7)
}
  0xc6   :  { %258 = dma.hbm_to_vmem [thread:$0]  %s12899_s27, 16, %s256_s10, [#allocation27]  }
  0xc7   :  { %s12792_s16 = smov [#allocation29]   ;;  %s12793_s26 = smov [#allocation32]  }
  0xc8   :  { %s279_s6 = sshll.u32 %s12792_s16, 4  ;;  %s303_s1 = sshll.u32 %s12793_s26, 4  ;;  %s280_s6 = int_to_ptr.vmem [resolvable:$true] %s279_s6  ;;  %s304_s1 = int_to_ptr.vmem [resolvable:$true] %s303_s1 }
  0xc9   :  { %s12363_s15 = scalar_lea.hbm %s12919_s30, 16 }
  0xca   :  { %p12364_p8 = scmp.ne.s32.totalorder %s12919_s30, %s12363_s15  ;;  %p12367_p9 = scmp.lt.u32.totalorder %s12363_s15, %s12919_s30 }
  0xcc   :  { %p12369_p10 = pnand %p12367_p9, %p12364_p8 }
  0xce   :  { %12372 = shalt.err (!%p12369_p10)
}
  0xcf   :  { %s12373_s3 = scalar_lea.vmem %s280_s6, 16  ;;  %s12377_s18 = scalar_lea.vmem %s280_s6, 32 }
  0xd0   :  { %p12374_p11 = scmp.ne.s32.totalorder %s280_s6, %s12373_s3  ;;  %p12378_p12 = scmp.lt.s32.totalorder %s280_s6, %s280_s6 }
  0xd1   :  { %p12379_p13 = scmp.lt.s32.totalorder %s12377_s18, %s12373_s3 }
  0xd3   :  { %p12380_p0 = por %p12379_p13, %p12378_p12 }
  0xd5   :  { %p12381_p1 = pnand %p12380_p0, %p12374_p11 }
  0xd7   :  { %12384 = shalt.err (!%p12381_p1)
}
  0xd8   :  { %282 = dma.hbm_to_vmem [thread:$0]  %s12919_s30, 16, %s280_s6, [#allocation30]  }
  0xd9   :  { %s12385_s27 = scalar_lea.hbm %s12939_s19, 16 }
  0xda   :  { %p12386_p2 = scmp.ne.s32.totalorder %s12939_s19, %s12385_s27  ;;  %p12389_p3 = scmp.lt.u32.totalorder %s12385_s27, %s12939_s19 }
  0xdc   :  { %p12391_p4 = pnand %p12389_p3, %p12386_p2 }
  0xde   :  { %12394 = shalt.err (!%p12391_p4)
}
  0xdf   :  { %s12395_s0 = scalar_lea.vmem %s304_s1, 16  ;;  %s12399_s23 = scalar_lea.vmem %s304_s1, 32 }
  0xe0   :  { %p12396_p5 = scmp.ne.s32.totalorder %s304_s1, %s12395_s0  ;;  %p12400_p6 = scmp.lt.s32.totalorder %s304_s1, %s304_s1 }
  0xe1   :  { %p12401_p7 = scmp.lt.s32.totalorder %s12399_s23, %s12395_s0 }
  0xe3   :  { %p12402_p8 = por %p12401_p7, %p12400_p6 }
  0xe5   :  { %p12403_p9 = pnand %p12402_p8, %p12396_p5 }
  0xe7   :  { %12406 = shalt.err (!%p12403_p9)
}
  0xe8   :  { %306 = dma.hbm_to_vmem [thread:$0]  %s12939_s19, 16, %s304_s1, [#allocation33]  }
  0xe9   :  { %s12794_s17 = smov [#allocation35]   ;;  %s12795_s12 = smov [#allocation3]  }
  0xea   :  { %s327_s30 = sshll.u32 %s12794_s17, 4  ;;  %s89_s14 = sshll.u32 %s12795_s12, 4  ;;  %s328_s30 = int_to_ptr.vmem [resolvable:$true] %s327_s30  ;;  %s90_s14 = int_to_ptr.vmem [resolvable:$true] %s89_s14 }
  0xeb   :  { %s12407_s22 = scalar_lea.hbm %s12957_s8, 16 }
  0xec   :  { %p12408_p10 = scmp.ne.s32.totalorder %s12957_s8, %s12407_s22  ;;  %p12411_p11 = scmp.lt.u32.totalorder %s12407_s22, %s12957_s8 }
  0xee   :  { %p12413_p12 = pnand %p12411_p11, %p12408_p10 }
  0xf0   :  { %12416 = shalt.err (!%p12413_p12)
}
  0xf1   :  { %s12417_s28 = scalar_lea.vmem %s328_s30, 16  ;;  %s12421_s2 = scalar_lea.vmem %s328_s30, 32 }
  0xf2   :  { %p12418_p13 = scmp.ne.s32.totalorder %s328_s30, %s12417_s28  ;;  %p12422_p0 = scmp.lt.s32.totalorder %s328_s30, %s328_s30 }
  0xf3   :  { %p12423_p1 = scmp.lt.s32.totalorder %s12421_s2, %s12417_s28 }
  0xf5   :  { %p12424_p2 = por %p12423_p1, %p12422_p0 }
  0xf7   :  { %p12425_p3 = pnand %p12424_p2, %p12418_p13 }
  0xf9   :  { %12428 = shalt.err (!%p12425_p3)
}
  0xfa   :  { %330 = dma.hbm_to_vmem [thread:$0]  %s12957_s8, 16, %s328_s30, [#allocation36]  }
  0xfb   :  { %s12429_s19 = scalar_lea.hbm %s12819_s5, 128 }
  0xfc   :  { %p12430_p4 = scmp.ne.s32.totalorder %s12819_s5, %s12429_s19  ;;  %p12433_p5 = scmp.lt.u32.totalorder %s12429_s19, %s12819_s5 }
  0xfe   :  { %p12435_p6 = pnand %p12433_p5, %p12430_p4 }
 0x100   :  { %12438 = shalt.err (!%p12435_p6)
}
 0x101   :  { %s12439_s10 = scalar_lea.vmem %s90_s14, 128  ;;  %p12444_p8 = scmp.lt.s32.totalorder %s90_s14, %s90_s14 }
 0x102   :  { %p12440_p7 = scmp.ne.s32.totalorder %s90_s14, %s12439_s10  ;;  %p12445_p9 = scmp.lt.s32.totalorder %s12439_s10, %s12439_s10 }
 0x104   :  { %p12446_p10 = por %p12445_p9, %p12444_p8 }
 0x106   :  { %p12447_p11 = pnand %p12446_p10, %p12440_p7 }
 0x108   :  { %12450 = shalt.err (!%p12447_p11)
}
 0x109   :  { %92 = dma.hbm_to_vmem [thread:$0]  %s12819_s5, 128, %s90_s14, [#allocation4]  }
 0x10a   :  { %s12796_s25 = smov [#allocation7]   ;;  %s12797_s8 = smov [#allocation10]  }
 0x10b   :  { %s111_s7 = sshll.u32 %s12796_s25, 4  ;;  %s133_s24 = sshll.u32 %s12797_s8, 4  ;;  %s112_s7 = int_to_ptr.vmem [resolvable:$true] %s111_s7  ;;  %s134_s24 = int_to_ptr.vmem [resolvable:$true] %s133_s24 }
 0x10c   :  { %s12451_s11 = scalar_lea.hbm %s12829_s13, 16 }
 0x10d   :  { %p12452_p12 = scmp.ne.s32.totalorder %s12829_s13, %s12451_s11  ;;  %p12455_p13 = scmp.lt.u32.totalorder %s12451_s11, %s12829_s13 }
 0x10f   :  { %p12457_p0 = pnand %p12455_p13, %p12452_p12 }
 0x111   :  { %12460 = shalt.err (!%p12457_p0)
}
 0x112   :  { %s12461_s9 = scalar_lea.vmem %s112_s7, 16  ;;  %s12465_s16 = scalar_lea.vmem %s112_s7, 32 }
 0x113   :  { %p12462_p1 = scmp.ne.s32.totalorder %s112_s7, %s12461_s9  ;;  %p12466_p2 = scmp.lt.s32.totalorder %s112_s7, %s112_s7 }
 0x114   :  { %p12467_p3 = scmp.lt.s32.totalorder %s12465_s16, %s12461_s9 }
 0x116   :  { %p12468_p4 = por %p12467_p3, %p12466_p2 }
 0x118   :  { %p12469_p5 = pnand %p12468_p4, %p12462_p1 }
 0x11a   :  { %12472 = shalt.err (!%p12469_p5)
}
 0x11b   :  { %114 = dma.hbm_to_vmem [thread:$0]  %s12829_s13, 16, %s112_s7, [#allocation6]  }
 0x11c   :  { %s12473_s5 = scalar_lea.hbm %s12839_s21, 128 }
 0x11d   :  { %p12474_p6 = scmp.ne.s32.totalorder %s12839_s21, %s12473_s5  ;;  %p12477_p7 = scmp.lt.u32.totalorder %s12473_s5, %s12839_s21 }
 0x11f   :  { %p12479_p8 = pnand %p12477_p7, %p12474_p6 }
 0x121   :  { %12482 = shalt.err (!%p12479_p8)
}
 0x122   :  { %s12483_s6 = scalar_lea.vmem %s134_s24, 128  ;;  %p12488_p10 = scmp.lt.s32.totalorder %s134_s24, %s134_s24 }
 0x123   :  { %p12484_p9 = scmp.ne.s32.totalorder %s134_s24, %s12483_s6  ;;  %p12489_p11 = scmp.lt.s32.totalorder %s12483_s6, %s12483_s6 }
 0x125   :  { %p12490_p12 = por %p12489_p11, %p12488_p10 }
 0x127   :  { %p12491_p13 = pnand %p12490_p12, %p12484_p9 }
 0x129   :  { %12494 = shalt.err (!%p12491_p13)
}
 0x12a   :  { %s13389_s26 = sld [smem:[#allocation53_spill]]  ;;  %s12798_s1 = smov [#allocation13]  }
 0x12b   :  { %136 = dma.hbm_to_vmem [thread:$0]  %s12839_s21, 128, %s134_s24, [#allocation9]  }
 0x12c   :  { %s155_s15 = sshll.u32 %s12798_s1, 4  ;;  %s12799_s13 = smov [#allocation16]   ;;  %s156_s15 = int_to_ptr.vmem [resolvable:$true] %s155_s15 }
 0x12d   :  { %s177_s3 = sshll.u32 %s12799_s13, 4  ;;  %s178_s3 = int_to_ptr.vmem [resolvable:$true] %s177_s3 }
 0x130   :  { %s12495_s18 = scalar_lea.hbm %s13389_s26, 112 }
 0x131   :  { %p12496_p0 = scmp.ne.s32.totalorder %s13389_s26, %s12495_s18  ;;  %p12499_p1 = scmp.lt.u32.totalorder %s12495_s18, %s13389_s26 }
 0x133   :  { %p12501_p2 = pnand %p12499_p1, %p12496_p0 }
 0x135   :  { %12504 = shalt.err (!%p12501_p2)
}
 0x136   :  { %s12505_s27 = scalar_lea.vmem %s156_s15, 112  ;;  %s12509_s0 = scalar_lea.vmem %s156_s15, 128 }
 0x137   :  { %p12506_p3 = scmp.ne.s32.totalorder %s156_s15, %s12505_s27  ;;  %p12510_p4 = scmp.lt.s32.totalorder %s156_s15, %s156_s15 }
 0x138   :  { %p12511_p5 = scmp.lt.s32.totalorder %s12509_s0, %s12505_s27 }
 0x13a   :  { %p12512_p6 = por %p12511_p5, %p12510_p4 }
 0x13c   :  { %p12513_p7 = pnand %p12512_p6, %p12506_p3 }
 0x13e   :  { %12516 = shalt.err (!%p12513_p7)
}
 0x13f   :  { %s13390_s21 = sld [smem:[#allocation54_spill]] }
 0x140   :  { %158 = dma.hbm_to_vmem [thread:$0]  %s13389_s26, 112, %s156_s15, [#allocation12]  }
 0x145   :  { %s12517_s23 = scalar_lea.hbm %s13390_s21, 80 }
 0x146   :  { %p12518_p8 = scmp.ne.s32.totalorder %s13390_s21, %s12517_s23  ;;  %p12521_p9 = scmp.lt.u32.totalorder %s12517_s23, %s13390_s21 }
 0x148   :  { %p12523_p10 = pnand %p12521_p9, %p12518_p8 }
 0x14a   :  { %12526 = shalt.err (!%p12523_p10)
}
 0x14b   :  { %s12527_s17 = scalar_lea.vmem %s178_s3, 80  ;;  %s12531_s30 = scalar_lea.vmem %s178_s3, 96 }
 0x14c   :  { %p12528_p11 = scmp.ne.s32.totalorder %s178_s3, %s12527_s17  ;;  %p12532_p12 = scmp.lt.s32.totalorder %s178_s3, %s178_s3 }
 0x14d   :  { %p12533_p13 = scmp.lt.s32.totalorder %s12531_s30, %s12527_s17 }
 0x14f   :  { %p12534_p0 = por %p12533_p13, %p12532_p12 }
 0x151   :  { %p12535_p1 = pnand %p12534_p0, %p12528_p11 }
 0x153   :  { %12538 = shalt.err (!%p12535_p1)
}
 0x154   :  { %s13391_s12 = sld [smem:[#allocation55_spill]]  ;;  %s12800_s14 = smov [#allocation19]  }
 0x155   :  { %180 = dma.hbm_to_vmem [thread:$0]  %s13390_s21, 80, %s178_s3, [#allocation15]  }
 0x156   :  { %s199_s22 = sshll.u32 %s12800_s14, 4  ;;  %s12801_s28 = smov [#allocation22]   ;;  %s200_s22 = int_to_ptr.vmem [resolvable:$true] %s199_s22 }
 0x157   :  { %s221_s2 = sshll.u32 %s12801_s28, 4  ;;  %s222_s2 = int_to_ptr.vmem [resolvable:$true] %s221_s2 }
 0x15a   :  { %s12539_s19 = scalar_lea.hbm %s13391_s12, 64 }
 0x15b   :  { %p12540_p2 = scmp.ne.s32.totalorder %s13391_s12, %s12539_s19  ;;  %p12543_p3 = scmp.lt.u32.totalorder %s12539_s19, %s13391_s12 }
 0x15d   :  { %p12545_p4 = pnand %p12543_p3, %p12540_p2 }
 0x15f   :  { %12548 = shalt.err (!%p12545_p4)
}
 0x160   :  { %s12549_s10 = scalar_lea.vmem %s200_s22, 64  ;;  %p12554_p6 = scmp.lt.s32.totalorder %s200_s22, %s200_s22 }
 0x161   :  { %p12550_p5 = scmp.ne.s32.totalorder %s200_s22, %s12549_s10  ;;  %p12555_p7 = scmp.lt.s32.totalorder %s12549_s10, %s12549_s10 }
 0x163   :  { %p12556_p8 = por %p12555_p7, %p12554_p6 }
 0x165   :  { %p12557_p9 = pnand %p12556_p8, %p12550_p5 }
 0x167   :  { %12560 = shalt.err (!%p12557_p9)
}
 0x168   :  { %s13392_s25 = sld [smem:[#allocation56_spill]] }
 0x169   :  { %202 = dma.hbm_to_vmem [thread:$0]  %s13391_s12, 64, %s200_s22, [#allocation18]  }
 0x16e   :  { %s12561_s7 = scalar_lea.hbm %s13392_s25, 32 }
 0x16f   :  { %p12562_p10 = scmp.ne.s32.totalorder %s13392_s25, %s12561_s7  ;;  %p12565_p11 = scmp.lt.u32.totalorder %s12561_s7, %s13392_s25 }
 0x171   :  { %p12567_p12 = pnand %p12565_p11, %p12562_p10 }
 0x173   :  { %12570 = shalt.err (!%p12567_p12)
}
 0x174   :  { %s12571_s8 = scalar_lea.vmem %s222_s2, 32  ;;  %p12576_p0 = scmp.lt.s32.totalorder %s222_s2, %s222_s2 }
 0x175   :  { %p12572_p13 = scmp.ne.s32.totalorder %s222_s2, %s12571_s8  ;;  %p12577_p1 = scmp.lt.s32.totalorder %s12571_s8, %s12571_s8 }
 0x177   :  { %p12578_p2 = por %p12577_p1, %p12576_p0 }
 0x179   :  { %p12579_p3 = pnand %p12578_p2, %p12572_p13 }
 0x17b   :  { %12582 = shalt.err (!%p12579_p3)
}
 0x17c   :  { %s13393_s24 = sld [smem:[#allocation57_spill]]  ;;  %s12802_s11 = smov [#allocation25]  }
 0x17d   :  { %224 = dma.hbm_to_vmem [thread:$0]  %s13392_s25, 32, %s222_s2, [#allocation21]  }
 0x17e   :  { %s243_s9 = sshll.u32 %s12802_s11, 4  ;;  %s12803_s16 = smov [#allocation28]   ;;  %s244_s9 = int_to_ptr.vmem [resolvable:$true] %s243_s9 }
 0x17f   :  { %s267_s5 = sshll.u32 %s12803_s16, 4  ;;  %s268_s5 = int_to_ptr.vmem [resolvable:$true] %s267_s5 }
 0x182   :  { %s12583_s6 = scalar_lea.hbm %s13393_s24, 16 }
 0x183   :  { %p12584_p4 = scmp.ne.s32.totalorder %s13393_s24, %s12583_s6  ;;  %p12587_p5 = scmp.lt.u32.totalorder %s12583_s6, %s13393_s24 }
 0x185   :  { %p12589_p6 = pnand %p12587_p5, %p12584_p4 }
 0x187   :  { %12592 = shalt.err (!%p12589_p6)
}
 0x188   :  { %s12593_s26 = scalar_lea.vmem %s244_s9, 16  ;;  %s12597_s1 = scalar_lea.vmem %s244_s9, 32 }
 0x189   :  { %p12594_p7 = scmp.ne.s32.totalorder %s244_s9, %s12593_s26  ;;  %p12598_p8 = scmp.lt.s32.totalorder %s244_s9, %s244_s9 }
 0x18a   :  { %p12599_p9 = scmp.lt.s32.totalorder %s12597_s1, %s12593_s26 }
 0x18c   :  { %p12600_p10 = por %p12599_p9, %p12598_p8 }
 0x18e   :  { %p12601_p11 = pnand %p12600_p10, %p12594_p7 }
 0x190   :  { %12604 = shalt.err (!%p12601_p11)
}
 0x191   :  { %s13394_s15 = sld [smem:[#allocation60_spill]] }
 0x192   :  { %246 = dma.hbm_to_vmem [thread:$0]  %s13393_s24, 16, %s244_s9, [#allocation24]  }
 0x197   :  { %s12605_s13 = scalar_lea.hbm %s13394_s15, 16 }
 0x198   :  { %p12606_p12 = scmp.ne.s32.totalorder %s13394_s15, %s12605_s13  ;;  %p12609_p13 = scmp.lt.u32.totalorder %s12605_s13, %s13394_s15 }
 0x19a   :  { %p12611_p0 = pnand %p12609_p13, %p12606_p12 }
 0x19c   :  { %12614 = shalt.err (!%p12611_p0)
}
 0x19d   :  { %s12615_s3 = scalar_lea.vmem %s268_s5, 16  ;;  %s12619_s18 = scalar_lea.vmem %s268_s5, 32 }
 0x19e   :  { %p12616_p1 = scmp.ne.s32.totalorder %s268_s5, %s12615_s3  ;;  %p12620_p2 = scmp.lt.s32.totalorder %s268_s5, %s268_s5 }
 0x19f   :  { %p12621_p3 = scmp.lt.s32.totalorder %s12619_s18, %s12615_s3 }
 0x1a1   :  { %p12622_p4 = por %p12621_p3, %p12620_p2 }
 0x1a3   :  { %p12623_p5 = pnand %p12622_p4, %p12616_p1 }
 0x1a5   :  { %12626 = shalt.err (!%p12623_p5)
}
 0x1a6   :  { %s13395_s27 = sld [smem:[#allocation63_spill]]  ;;  %s12804_s0 = smov [#allocation31]  }
 0x1a7   :  { %270 = dma.hbm_to_vmem [thread:$0]  %s13394_s15, 16, %s268_s5, [#allocation27]  }
 0x1a8   :  { %s291_s21 = sshll.u32 %s12804_s0, 4  ;;  %s12805_s23 = smov [#allocation34]   ;;  %s292_s21 = int_to_ptr.vmem [resolvable:$true] %s291_s21 }
 0x1a9   :  { %s317_s17 = sshll.u32 %s12805_s23, 4  ;;  %s318_s17 = int_to_ptr.vmem [resolvable:$true] %s317_s17 }
 0x1ac   :  { %s12627_s30 = scalar_lea.hbm %s13395_s27, 16 }
 0x1ad   :  { %p12628_p6 = scmp.ne.s32.totalorder %s13395_s27, %s12627_s30  ;;  %p12631_p7 = scmp.lt.u32.totalorder %s12627_s30, %s13395_s27 }
 0x1af   :  { %p12633_p8 = pnand %p12631_p7, %p12628_p6 }
 0x1b1   :  { %12636 = shalt.err (!%p12633_p8)
}
 0x1b2   :  { %s12637_s12 = scalar_lea.vmem %s292_s21, 16  ;;  %s12641_s14 = scalar_lea.vmem %s292_s21, 32 }
 0x1b3   :  { %p12638_p9 = scmp.ne.s32.totalorder %s292_s21, %s12637_s12  ;;  %p12642_p10 = scmp.lt.s32.totalorder %s292_s21, %s292_s21 }
 0x1b4   :  { %p12643_p11 = scmp.lt.s32.totalorder %s12641_s14, %s12637_s12 }
 0x1b6   :  { %p12644_p12 = por %p12643_p11, %p12642_p10 }
 0x1b8   :  { %p12645_p13 = pnand %p12644_p12, %p12638_p9 }
 0x1ba   :  { %12648 = shalt.err (!%p12645_p13)
}
 0x1bb   :  { %s13396_s22 = sld [smem:[#allocation66_spill]] }
 0x1bc   :  { %294 = dma.hbm_to_vmem [thread:$0]  %s13395_s27, 16, %s292_s21, [#allocation30]  }
 0x1c1   :  { %s12649_s28 = scalar_lea.hbm %s13396_s22, 16 }
 0x1c2   :  { %p12650_p0 = scmp.ne.s32.totalorder %s13396_s22, %s12649_s28  ;;  %p12653_p1 = scmp.lt.u32.totalorder %s12649_s28, %s13396_s22 }
 0x1c4   :  { %p12655_p2 = pnand %p12653_p1, %p12650_p0 }
 0x1c6   :  { %12658 = shalt.err (!%p12655_p2)
}
 0x1c7   :  { %s12659_s2 = scalar_lea.vmem %s318_s17, 16  ;;  %s12663_s19 = scalar_lea.vmem %s318_s17, 32 }
 0x1c8   :  { %p12660_p3 = scmp.ne.s32.totalorder %s318_s17, %s12659_s2  ;;  %p12664_p4 = scmp.lt.s32.totalorder %s318_s17, %s318_s17 }
 0x1c9   :  { %p12665_p5 = scmp.lt.s32.totalorder %s12663_s19, %s12659_s2 }
 0x1cb   :  { %p12666_p6 = por %p12665_p5, %p12664_p4 }
 0x1cd   :  { %p12667_p7 = pnand %p12666_p6, %p12660_p3 }
 0x1cf   :  { %12670 = shalt.err (!%p12667_p7)
}
 0x1d0   :  { %320 = dma.hbm_to_vmem [thread:$0]  %s13396_s22, 16, %s318_s17, [#allocation33]  }
 0x1d1   :  { %s12806_s10 = smov [#allocation37]   ;;  %s12807_s7 = smov [#allocation38]  }
 0x1d2   :  { %s337_s25 = sshll.u32 %s12806_s10, 4  ;;  %s347_s8 = sshll.u32 %s12807_s7, 4  ;;  %s338_s25 = int_to_ptr.vmem [resolvable:$true] %s337_s25  ;;  %s348_s8 = int_to_ptr.vmem [resolvable:$true] %s347_s8 }
 0x1d3   :  { %s12671_s24 = scalar_lea.hbm %s12962_s4, 16 }
 0x1d4   :  { %p12672_p8 = scmp.ne.s32.totalorder %s12962_s4, %s12671_s24  ;;  %p12675_p9 = scmp.lt.u32.totalorder %s12671_s24, %s12962_s4 }
 0x1d6   :  { %p12677_p10 = pnand %p12675_p9, %p12672_p8 }
 0x1d8   :  { %12680 = shalt.err (!%p12677_p10)
}
 0x1d9   :  { %s12681_s11 = scalar_lea.vmem %s338_s25, 16  ;;  %s12685_s9 = scalar_lea.vmem %s338_s25, 32 }
 0x1da   :  { %p12682_p11 = scmp.ne.s32.totalorder %s338_s25, %s12681_s11  ;;  %p12686_p12 = scmp.lt.s32.totalorder %s338_s25, %s338_s25 }
 0x1db   :  { %p12687_p13 = scmp.lt.s32.totalorder %s12685_s9, %s12681_s11 }
 0x1dd   :  { %p12688_p0 = por %p12687_p13, %p12686_p12 }
 0x1df   :  { %p12689_p1 = pnand %p12688_p0, %p12682_p11 }
 0x1e1   :  { %12692 = shalt.err (!%p12689_p1)
}
 0x1e2   :  { %340 = dma.hbm_to_vmem [thread:$0]  %s12962_s4, 16, %s338_s25, [#allocation36]  }
 0x1e3   :  { %s12693_s16 = scalar_lea.hbm %s12967_s29, 16 }
 0x1e4   :  { %p12694_p2 = scmp.ne.s32.totalorder %s12967_s29, %s12693_s16  ;;  %p12697_p3 = scmp.lt.u32.totalorder %s12693_s16, %s12967_s29 }
 0x1e6   :  { %p12699_p4 = pnand %p12697_p3, %p12694_p2 }
 0x1e8   :  { %12702 = shalt.err (!%p12699_p4)
}
 0x1e9   :  { %s12703_s5 = scalar_lea.vmem %s348_s8, 16  ;;  %s12707_s6 = scalar_lea.vmem %s348_s8, 32 }
 0x1ea   :  { %p12704_p5 = scmp.ne.s32.totalorder %s348_s8, %s12703_s5  ;;  %p12708_p6 = scmp.lt.s32.totalorder %s348_s8, %s348_s8 }
 0x1eb   :  { %p12709_p7 = scmp.lt.s32.totalorder %s12707_s6, %s12703_s5 }
 0x1ed   :  { %p12710_p8 = por %p12709_p7, %p12708_p6 }
 0x1ef   :  { %p12711_p9 = pnand %p12710_p8, %p12704_p5 }
 0x1f1   :  { %12714 = shalt.err (!%p12711_p9)
}
 0x1f2   :  { %350 = dma.hbm_to_vmem [thread:$0]  %s12967_s29, 16, %s348_s8, [#allocation39]  }
 0x1f3   :  { %12715 = dma.done.wait [#allocation4], 128  }
 0x1f4   :  { %12716 = vsyncadd [#allocation4], 4294967168 }
 0x1f5   :  { %12717 = dma.done.wait [#allocation6], 272  }
 0x1f6   :  { %12718 = vsyncadd [#allocation6], 4294967024 }
 0x1f7   :  { %12719 = dma.done.wait [#allocation9], 2176  }
 0x1f8   :  { %12720 = vsyncadd [#allocation9], 4294965120 }
 0x1f9   :  { %12721 = dma.done.wait [#allocation12], 57456  }
 0x1fa   :  { %12722 = vsyncadd [#allocation12], 4294909840 }
 0x1fb   :  { %12723 = dma.done.wait [#allocation15], 35920  }
 0x1fc   :  { %12724 = vsyncadd [#allocation15], 4294931376 }
 0x1fd   :  { %12725 = dma.done.wait [#allocation18], 20544  }
 0x1fe   :  { %12726 = vsyncadd [#allocation18], 4294946752 }
 0x1ff   :  { %12727 = dma.done.wait [#allocation21], 8224  }
 0x200   :  { %12728 = vsyncadd [#allocation21], 4294959072 }
 0x201   :  { %12729 = dma.done.wait [#allocation24], 2064  }
 0x202   :  { %12730 = vsyncadd [#allocation24], 4294965232 }
 0x203   :  { %12731 = dma.done.wait [#allocation27], 32  }
 0x204   :  { %12732 = vsyncadd [#allocation27], 4294967264 }
 0x205   :  { %12733 = dma.done.wait [#allocation30], 32  }
 0x206   :  { %12734 = vsyncadd [#allocation30], 4294967264 }
 0x207   :  { %12735 = dma.done.wait [#allocation33], 32  }
 0x208   :  { %12736 = vsyncadd [#allocation33], 4294967264 }
 0x209   :  { %12737 = dma.done.wait [#allocation36], 32  }
 0x20a   :  { %12738 = vsyncadd [#allocation36], 4294967264 }
 0x20b   :  { %12739 = dma.done.wait [#allocation39], 16  }
 0x20c   :  { %12740 = vsyncadd [#allocation39], 4294967280  ;;  %v12808_v1 = vmov 0.0   ;;  %vm12809_vm0 = vmmov 0   ;;  %v10716_v2 = vld [vmem:[#allocation5] sm:$0xff]   ;;  %v10717_v3 = vld [vmem:[#allocation5 + $0x8] sm:$0xff]  }
 0x20d   :  { %10464 = vmatprep.subr.bf16.mxu0 %v12808_v1  ;;  %10468 = vmatprep.mubr.msk.bf16.mxu0 %vm12809_vm0, %v12808_v1  ;;  %v424_v4 = vld [vmem:[#allocation3] sm:$0xff]  ;;  %vm449_vm1 = vcmask 261120   ;;  %v9230_v6 = vld [vmem:[#allocation7] ss:$0 sm:$0xff]  ;;  %v12810_v39 = vmov 0   ;;  %v531_v40 = vld [vmem:[#allocation8 + $0x10] sm:$0xff] }
 0x20e   :  { %10465 = vmatpush3.bf16.msra.mxu0 %v10716_v2  ;;  %v425_v5 = vpack.c.bf16 %v424_v4, %v424_v4  ;;  %v529_v23 = vld [vmem:[#allocation8] sm:$0xff]  ;;  %v530_v25 = vld [vmem:[#allocation8 + $0x8] sm:$0xff]  ;;  %702 = vmatprep.mubr.bf16.mxu1 %v12810_v39  ;;  %v535_v41 = vld [vmem:[#allocation8 + $0x30] sm:$0xff]  ;;  %s13397_s29 = sld [smem:[#allocation58_spill]]  ;;  %s13398_s4 = sld [smem:[#allocation59_spill]]  ;;  %vm8845_vm2 = vcmask 523264  }
 0x20f   :  { %10466 = vmatprep.subr.bf16.mxu0 %v12808_v1  ;;  %v533_v24 = vld [vmem:[#allocation8 + $0x20] sm:$0xff]  ;;  %v534_v27 = vld [vmem:[#allocation8 + $0x28] sm:$0xff]  ;;  %v532_v42 = vld [vmem:[#allocation8 + $0x18] sm:$0xff]  ;;  %v9241_v43 = vcombine.high %v531_v40, %v535_v41  ;;  %v9240_v45 = vcombine.low %v531_v40, %v535_v41  ;;  %s13399_s26 = sld [smem:[#allocation61_spill]]  ;;  %s13400_s1 = sld [smem:[#allocation62_spill]]  ;;  %vm8982_vm3 = vcmask 130048  }
 0x210   :  { %v9237_v26 = vcombine.high %v529_v23, %v533_v24  ;;  %v9238_v28 = vcombine.low %v530_v25, %v534_v27  ;;  %v9239_v29 = vcombine.high %v530_v25, %v534_v27  ;;  %v9236_v30 = vcombine.low %v529_v23, %v533_v24  ;;  %v537_v31 = vld [vmem:[#allocation8 + $0x40] sm:$0xff]  ;;  %v538_v33 = vld [vmem:[#allocation8 + $0x48] sm:$0xff]  ;;  %v536_v44 = vld [vmem:[#allocation8 + $0x38] sm:$0xff]  ;;  %s13401_s15 = sld [smem:[#allocation64_spill]]  ;;  %s13402_s13 = sld [smem:[#allocation65_spill]] }
 0x211   :  { %v541_v32 = vld [vmem:[#allocation8 + $0x60] sm:$0xff]  ;;  %v542_v35 = vld [vmem:[#allocation8 + $0x68] sm:$0xff]  ;;  %v9242_v46 = vcombine.low %v532_v42, %v536_v44  ;;  %v9243_v47 = vcombine.high %v532_v42, %v536_v44  ;;  %v539_v56 = vld [vmem:[#allocation8 + $0x50] sm:$0xff]  ;;  %vm9044_vm4 = vcmask 1043456   ;;  %vm9040_vm5 = vcmask 64512  }
 0x212   :  { %10467 = vmatpush3.bf16.msra.mxu0 %v10717_v3  ;;  %670 = vmatprep.subr.bf16.mxu1 %v9237_v26  ;;  %v9245_v34 = vcombine.high %v537_v31, %v541_v32  ;;  %v9244_v36 = vcombine.low %v537_v31, %v541_v32  ;;  %v9246_v37 = vcombine.low %v538_v33, %v542_v35  ;;  %v9234_v52 = vld [vmem:[#allocation34] ss:$0 sm:$0xff]  ;;  %v9235_v54 = vld [vmem:[#allocation35] ss:$0 sm:$0xff]  ;;  %v543_v57 = vld [vmem:[#allocation8 + $0x70] sm:$0xff]  ;;  %vm9093_vm6 = vcmask 31744  }
 0x213   :  { %711 = vmatprep.subr.bf16.mxu0 %v9239_v29  ;;  %671 = vmatpush1.bf16.msra.mxu1 %v9236_v30  ;;  %v9247_v38 = vcombine.high %v538_v33, %v542_v35  ;;  %v540_v58 = vld [vmem:[#allocation8 + $0x58] sm:$0xff]  ;;  %v9249_v62 = vcombine.high %v539_v56, %v543_v57  ;;  %v9248_v0 = vcombine.low %v539_v56, %v543_v57  ;;  %v10720_v3 = vld [vmem:[#allocation11 + $0x4] ss:$28 sps:$4 sm:$0xff]   ;;  %v10723_v4 = vld [vmem:[#allocation11 + $0xc] ss:$28 sps:$4 sm:$0xff]   ;;  %vm9136_vm7 = vcmask 1041408  }
 0x214   :  { %672 = vmatprep.subr.bf16.mxu1 %v9245_v34  ;;  %v544_v59 = vld [vmem:[#allocation8 + $0x78] sm:$0xff]  ;;  %v10750_v23 = vld [vmem:[#allocation11 + $0x11c] ss:$28 sps:$4 sm:$0xff]   ;;  %v10753_v24 = vld [vmem:[#allocation11 + $0x124] ss:$28 sps:$4 sm:$0xff]   ;;  %vm9180_vm8 = vcmask 7168  }
 0x215   :  { %10469 = vmatmul.mubr.msk.bf16.vlgmr.msra.gmra.mrb[0].mxu0 %vm449_vm1, %v425_v5  ;;  %v9251_v63 = vcombine.high %v540_v58, %v544_v59  ;;  %v9250_v2 = vcombine.low %v540_v58, %v544_v59  ;;  %v10718_v5 = vld [vmem:[#allocation11] ss:$28 sps:$4 sm:$0xff]   ;;  %v10748_v25 = vld [vmem:[#allocation11 + $0x118] ss:$28 sps:$4 sm:$0xff]   ;;  %v10754_v29 = vld [vmem:[#allocation11 + $0x150] ss:$28 sps:$4 sm:$0xff]  }
 0x216   :  { %712 = vmatpush1.bf16.msra.mxu0 %v9238_v28  ;;  %743 = vmatprep.mubr.bf16.mxu0 %v12810_v39  ;;  %v10751_v26 = vld [vmem:[#allocation11 + $0x120] ss:$28 sps:$4 sm:$0xff]   ;;  %v10756_v27 = vld [vmem:[#allocation11 + $0x154] ss:$28 sps:$4 sm:$0xff]   ;;  %v10762_v31 = vld [vmem:[#allocation11 + $0x18c] ss:$28 sps:$4 sm:$0xff]  }
 0x217   :  { %713 = vmatprep.subr.bf16.mxu0 %v9247_v38  ;;  %673 = vmatpush1.bf16.msra.mxu1 %v9244_v36  ;;  %v10759_v28 = vld [vmem:[#allocation11 + $0x15c] ss:$28 sps:$4 sm:$0xff]   ;;  %v10765_v32 = vld [vmem:[#allocation11 + $0x194] ss:$28 sps:$4 sm:$0xff]   ;;  %v10760_v33 = vld [vmem:[#allocation11 + $0x188] ss:$28 sps:$4 sm:$0xff]  }
 0x218   :  { %752 = vmatprep.subr.bf16.mxu1 %v9241_v43  ;;  %v10757_v30 = vld [vmem:[#allocation11 + $0x158] ss:$28 sps:$4 sm:$0xff]   ;;  %v10763_v34 = vld [vmem:[#allocation11 + $0x190] ss:$28 sps:$4 sm:$0xff]   ;;  %v10768_v35 = vld [vmem:[#allocation11 + $0x1c4] ss:$28 sps:$4 sm:$0xff]  }
 0x219   :  { %v10771_v36 = vld [vmem:[#allocation11 + $0x1cc] ss:$28 sps:$4 sm:$0xff]   ;;  %v10774_v40 = vld [vmem:[#allocation11 + $0x1fc] ss:$28 sps:$4 sm:$0xff]   ;;  %v10777_v41 = vld [vmem:[#allocation11 + $0x204] ss:$28 sps:$4 sm:$0xff]  }
 0x21a   :  { %714 = vmatpush1.bf16.msra.mxu0 %v9246_v37  ;;  %v10766_v37 = vld [vmem:[#allocation11 + $0x1c0] ss:$28 sps:$4 sm:$0xff]   ;;  %v10769_v38 = vld [vmem:[#allocation11 + $0x1c8] ss:$28 sps:$4 sm:$0xff]   ;;  %v10772_v42 = vld [vmem:[#allocation11 + $0x1f8] ss:$28 sps:$4 sm:$0xff]  }
 0x21b   :  { %793 = vmatprep.subr.bf16.mxu0 %v9243_v47  ;;  %v10775_v43 = vld [vmem:[#allocation11 + $0x200] ss:$28 sps:$4 sm:$0xff]   ;;  %v10780_v44 = vld [vmem:[#allocation11 + $0x234] ss:$28 sps:$4 sm:$0xff]  }
 0x21c   :  { %v10781_v47 = vld [vmem:[#allocation11 + $0x238] ss:$28 sps:$4 sm:$0xff]   ;;  %v10801_v57 = vld [vmem:[#allocation11 + $0x2e4] ss:$28 sps:$4 sm:$0xff]  }
 0x21d   :  { %v10798_v56 = vld [vmem:[#allocation11 + $0x2dc] ss:$28 sps:$4 sm:$0xff]  }
 0x21e   :  { %v10796_v58 = vld [vmem:[#allocation11 + $0x2d8] ss:$28 sps:$4 sm:$0xff]   ;;  %v10799_v59 = vld [vmem:[#allocation11 + $0x2e0] ss:$28 sps:$4 sm:$0xff]  }
 0x2e8   :  { %v487_v7 = vpop.f32.mrb[0].mxu0 }
 0x2e9   :  { %v488_v8 = vadd.f32 %v9230_v6, %v487_v7  ;;  %v10470_v9 = vpop.f32.mrb[1].mxu0  ;;  %v10721_v6 = vld [vmem:[#allocation11 + $0x8] ss:$28 sps:$4 sm:$0xff]   ;;  %v10726_v7 = vld [vmem:[#allocation11 + $0x3c] ss:$28 sps:$4 sm:$0xff]  }
 0x2ea   :  { %v490_v10 = vpop.f32.mrb[2].mxu0  ;;  %v10724_v9 = vld [vmem:[#allocation11 + $0x38] ss:$28 sps:$4 sm:$0xff]  }
 0x2eb   :  { %v494_v11 = vmul.f32 0.70710677, %v488_v8  ;;  %v10471_v12 = vpop.f32.mrb[3].mxu0  ;;  %v493_v14 = vmul.f32 0.5, %v488_v8  ;;  %v10729_v8 = vld [vmem:[#allocation11 + $0x44] ss:$28 sps:$4 sm:$0xff]  }
 0x2ec   :  { %v10727_v10 = vld [vmem:[#allocation11 + $0x40] ss:$28 sps:$4 sm:$0xff]  }
 0x2ed   :  { %12117 = verf.f32 %v494_v11  ;;  %v10732_v11 = vld [vmem:[#allocation11 + $0x74] ss:$28 sps:$4 sm:$0xff]   ;;  %v10735_v12 = vld [vmem:[#allocation11 + $0x7c] ss:$28 sps:$4 sm:$0xff]  }
 0x2f7   :  { %v12118_v13 = vpop.eup %12117 }
 0x2f8   :  { %v496_v15 = vadd.f32 1.0, %v12118_v13  ;;  %v10730_v13 = vld [vmem:[#allocation11 + $0x70] ss:$28 sps:$4 sm:$0xff]  }
 0x2fa   :  { %v497_v16 = vmul.f32 %v496_v15, %v493_v14  ;;  %v10733_v14 = vld [vmem:[#allocation11 + $0x78] ss:$28 sps:$4 sm:$0xff]   ;;  %v10738_v15 = vld [vmem:[#allocation11 + $0xac] ss:$28 sps:$4 sm:$0xff]  }
 0x2fc   :  { %v498_v17 = vsel %vm449_vm1, %v497_v16, 0.0 }
 0x2fd   :  { %499 = vadd.xlane.f32.xlu0 %v498_v17  ;;  %v10736_v17 = vld [vmem:[#allocation11 + $0xa8] ss:$28 sps:$4 sm:$0xff]  }
 0x38a   :  { %v500_v18 = vpop.xlane.xlu0 %499 }
 0x38b   :  { %v502_v19 = vmul.f32 0.03125, %v500_v18  ;;  %v10739_v18 = vld [vmem:[#allocation11 + $0xb0] ss:$28 sps:$4 sm:$0xff]  }
 0x38d   :  { %v503_v20 = vsub.f32 %v497_v16, %v502_v19  ;;  %v10741_v16 = vld [vmem:[#allocation11 + $0xb4] ss:$28 sps:$4 sm:$0xff]   ;;  %v10744_v19 = vld [vmem:[#allocation11 + $0xe4] ss:$28 sps:$4 sm:$0xff]  }
 0x38f   :  { %v504_v21 = vmul.f32 %v503_v20, %v503_v20 }
 0x391   :  { %v505_v22 = vsel %vm449_vm1, %v504_v21, 0.0  ;;  %v10742_v21 = vld [vmem:[#allocation11 + $0xe0] ss:$28 sps:$4 sm:$0xff]  }
 0x392   :  { %506 = vadd.xlane.f32.xlu0 %v505_v22  ;;  %v10745_v22 = vld [vmem:[#allocation11 + $0xe8] ss:$28 sps:$4 sm:$0xff]  }
 0x41f   :  { %v507_v48 = vpop.xlane.xlu0 %506 }
 0x420   :  { %v508_v49 = vmul.f32 0.03125, %v507_v48  ;;  %v10786_v48 = vld [vmem:[#allocation11 + $0x26c] ss:$28 sps:$4 sm:$0xff]  }
 0x422   :  { %v509_v50 = vadd.f32 1e-05, %v508_v49  ;;  %v10789_v49 = vld [vmem:[#allocation11 + $0x274] ss:$28 sps:$4 sm:$0xff]  }
 0x424   :  { %12119 = vrsqrt.f32 %v509_v50  ;;  %v10784_v50 = vld [vmem:[#allocation11 + $0x268] ss:$28 sps:$4 sm:$0xff]  }
 0x42e   :  { %v12120_v51 = vpop.eup %12119 }
 0x42f   :  { %v511_v53 = vmul.f32 %v12120_v51, %v503_v20  ;;  %v10747_v20 = vld [vmem:[#allocation11 + $0xec] ss:$28 sps:$4 sm:$0xff]  }
 0x430   :  { %v10787_v51 = vld [vmem:[#allocation11 + $0x270] ss:$28 sps:$4 sm:$0xff]  }
 0x431   :  { %v519_v55 = vmul.f32 %v9234_v52, %v511_v53  ;;  %v10792_v52 = vld [vmem:[#allocation11 + $0x2a4] ss:$28 sps:$4 sm:$0xff]   ;;  %v10795_v53 = vld [vmem:[#allocation11 + $0x2ac] ss:$28 sps:$4 sm:$0xff]  }
 0x433   :  { %v527_v60 = vadd.f32 %v9235_v54, %v519_v55  ;;  %v10790_v54 = vld [vmem:[#allocation11 + $0x2a0] ss:$28 sps:$4 sm:$0xff]   ;;  %v10793_v55 = vld [vmem:[#allocation11 + $0x2a8] ss:$28 sps:$4 sm:$0xff]  }
 0x435   :  { %v528_v61 = vpack.c.bf16 %v527_v60, %v527_v60  ;;  %v10804_v60 = vld [vmem:[#allocation11 + $0x314] ss:$28 sps:$4 sm:$0xff]  }
 0x437   :  { %9252 = vmatmul.mubr.msk.bf16.vlgmr.msra.gmra.mrb[0].mxu1 %vm449_vm1, %v528_v61  ;;  %9253 = vmatmul.mubr.msk.bf16.vlgmr.msra.gmra.mrb[4].mxu0 %vm449_vm1, %v528_v61 }
 0x438   :  { %753 = vmatpush1.bf16.msra.mxu1 %v9240_v45  ;;  %794 = vmatpush1.bf16.msra.mxu0 %v9242_v46  ;;  %v10783_v45 = vld [vmem:[#allocation11 + $0x23c] ss:$28 sps:$4 sm:$0xff]   ;;  %v10778_v46 = vld [vmem:[#allocation11 + $0x230] ss:$28 sps:$4 sm:$0xff]  }
 0x439   :  { %754 = vmatprep.subr.bf16.mxu1 %v9249_v62  ;;  %795 = vmatprep.subr.bf16.mxu0 %v9251_v63  ;;  %v10802_v62 = vld [vmem:[#allocation11 + $0x310] ss:$28 sps:$4 sm:$0xff]   ;;  %v10805_v63 = vld [vmem:[#allocation11 + $0x318] ss:$28 sps:$4 sm:$0xff]  }
 0x43a   :  { %784 = vmatprep.mubr.bf16.mxu1 %v12810_v39  ;;  %825 = vmatprep.mubr.bf16.mxu0 %v12810_v39 }
 0x43c   :  { %755 = vmatpush1.bf16.msra.mxu1 %v9248_v0  ;;  %796 = vmatpush1.bf16.msra.mxu0 %v9250_v2  ;;  %v10810_v0 = vld [vmem:[#allocation11 + $0x34c] ss:$28 sps:$4 sm:$0xff]   ;;  %v10813_v2 = vld [vmem:[#allocation11 + $0x354] ss:$28 sps:$4 sm:$0xff]  }
 0x43d   :  { %3735 = vmatprep.subr.bf16.mxu1 %v10720_v3  ;;  %3899 = vmatprep.subr.bf16.mxu0 %v10723_v4  ;;  %v10808_v3 = vld [vmem:[#allocation11 + $0x348] ss:$28 sps:$4 sm:$0xff]   ;;  %v10811_v4 = vld [vmem:[#allocation11 + $0x350] ss:$28 sps:$4 sm:$0xff]  }
 0x43f   :  { %9254 = vmatmul.mubr.msk.bf16.vlgmr.msra.gmra.mrb[4].mxu1 %vm449_vm1, %v528_v61  ;;  %9255 = vmatmul.mubr.msk.bf16.vlgmr.msra.gmra.mrb[8].mxu0 %vm449_vm1, %v528_v61  ;;  %v10807_v61 = vld [vmem:[#allocation11 + $0x31c] ss:$28 sps:$4 sm:$0xff]  }
 0x440   :  { %3736 = vmatpush1.bf16.msra.mxu1 %v10718_v5  ;;  %3900 = vmatpush1.bf16.msra.mxu0 %v10721_v6  ;;  %v10816_v5 = vld [vmem:[#allocation11 + $0x384] ss:$28 sps:$4 sm:$0xff]   ;;  %v10819_v6 = vld [vmem:[#allocation11 + $0x38c] ss:$28 sps:$4 sm:$0xff]  }
 0x441   :  { %3737 = vmatprep.subr.bf16.mxu1 %v10726_v7  ;;  %3901 = vmatprep.subr.bf16.mxu0 %v10729_v8  ;;  %v547_v7 = vlaneseq }
 0x443   :  { %v13091_v8 = vshrl.u32 %v547_v7, 7  ;;  %v10838_v7 = vld [vmem:[#allocation11 + $0x460] ss:$28 sps:$4 sm:$0xff]  }
 0x444   :  { %3738 = vmatpush1.bf16.msra.mxu1 %v10724_v9  ;;  %3902 = vmatpush1.bf16.msra.mxu0 %v10727_v10  ;;  %v13096_v10 = vld [vmem:[#allocation10] sm:$0xff] }
 0x445   :  { %3739 = vmatprep.subr.bf16.mxu1 %v10732_v11  ;;  %3903 = vmatprep.subr.bf16.mxu0 %v10735_v12  ;;  %v13094_v9 = vsub.s32 0, %v13091_v8  ;;  %v13099_v11 = vsub.s32 1, %v13091_v8  ;;  %v13102_v12 = vsub.s32 3, %v13091_v8 }
 0x448   :  { %3740 = vmatpush1.bf16.msra.mxu1 %v10730_v13  ;;  %3904 = vmatpush1.bf16.msra.mxu0 %v10733_v14  ;;  %v550_v13 = vrot.slane %v13096_v10, %v13094_v9  ;;  %v554_v14 = vrot.slane %v13096_v10, %v13099_v11 }
 0x449   :  { %3741 = vmatprep.subr.bf16.mxu1 %v10738_v15  ;;  %3905 = vmatprep.subr.bf16.mxu0 %v10741_v16  ;;  %v562_v15 = vrot.slane %v13096_v10, %v13102_v12 }
 0x44c   :  { %3742 = vmatpush1.bf16.msra.mxu1 %v10736_v17  ;;  %3906 = vmatpush1.bf16.msra.mxu0 %v10739_v18 }
 0x44d   :  { %3743 = vmatprep.subr.bf16.mxu1 %v10744_v19  ;;  %3907 = vmatprep.subr.bf16.mxu0 %v10747_v20 }
 0x450   :  { %3744 = vmatpush1.bf16.msra.mxu1 %v10742_v21  ;;  %3908 = vmatpush1.bf16.msra.mxu0 %v10745_v22 }
 0x451   :  { %3745 = vmatprep.subr.bf16.mxu1 %v10750_v23  ;;  %3909 = vmatprep.subr.bf16.mxu0 %v10753_v24 }
 0x454   :  { %3746 = vmatpush1.bf16.msra.mxu1 %v10748_v25  ;;  %3910 = vmatpush1.bf16.msra.mxu0 %v10751_v26 }
 0x455   :  { %3747 = vmatprep.subr.bf16.mxu1 %v10756_v27  ;;  %3911 = vmatprep.subr.bf16.mxu0 %v10759_v28 }
 0x458   :  { %3748 = vmatpush1.bf16.msra.mxu1 %v10754_v29  ;;  %3912 = vmatpush1.bf16.msra.mxu0 %v10757_v30 }
 0x459   :  { %3749 = vmatprep.subr.bf16.mxu1 %v10762_v31  ;;  %3913 = vmatprep.subr.bf16.mxu0 %v10765_v32 }
 0x45c   :  { %3750 = vmatpush1.bf16.msra.mxu1 %v10760_v33  ;;  %3914 = vmatpush1.bf16.msra.mxu0 %v10763_v34 }
 0x45d   :  { %3751 = vmatprep.subr.bf16.mxu1 %v10768_v35  ;;  %3915 = vmatprep.subr.bf16.mxu0 %v10771_v36 }
 0x460   :  { %3752 = vmatpush1.bf16.msra.mxu1 %v10766_v37  ;;  %3916 = vmatpush1.bf16.msra.mxu0 %v10769_v38 }
 0x461   :  { %3753 = vmatprep.subr.bf16.mxu1 %v10774_v40  ;;  %3917 = vmatprep.subr.bf16.mxu0 %v10777_v41 }
 0x464   :  { %3754 = vmatpush1.bf16.msra.mxu1 %v10772_v42  ;;  %3918 = vmatpush1.bf16.msra.mxu0 %v10775_v43 }
 0x465   :  { %3755 = vmatprep.subr.bf16.mxu1 %v10780_v44  ;;  %3919 = vmatprep.subr.bf16.mxu0 %v10783_v45 }
 0x468   :  { %3756 = vmatpush1.bf16.msra.mxu1 %v10778_v46  ;;  %3920 = vmatpush1.bf16.msra.mxu0 %v10781_v47 }
 0x469   :  { %3757 = vmatprep.subr.bf16.mxu1 %v10786_v48  ;;  %3921 = vmatprep.subr.bf16.mxu0 %v10789_v49 }
 0x46c   :  { %3758 = vmatpush1.bf16.msra.mxu1 %v10784_v50  ;;  %3922 = vmatpush1.bf16.msra.mxu0 %v10787_v51 }
 0x46d   :  { %3759 = vmatprep.subr.bf16.mxu1 %v10792_v52  ;;  %3923 = vmatprep.subr.bf16.mxu0 %v10795_v53  ;;  %v10814_v52 = vld [vmem:[#allocation11 + $0x380] ss:$28 sps:$4 sm:$0xff]   ;;  %v10817_v53 = vld [vmem:[#allocation11 + $0x388] ss:$28 sps:$4 sm:$0xff]  }
 0x470   :  { %3760 = vmatpush1.bf16.msra.mxu1 %v10790_v54  ;;  %3924 = vmatpush1.bf16.msra.mxu0 %v10793_v55  ;;  %v10822_v55 = vld [vmem:[#allocation11 + $0x3bc] ss:$28 sps:$4 sm:$0xff]  }
 0x471   :  { %3761 = vmatprep.subr.bf16.mxu1 %v10798_v56  ;;  %3925 = vmatprep.subr.bf16.mxu0 %v10801_v57  ;;  %v10825_v56 = vld [vmem:[#allocation11 + $0x3c4] ss:$28 sps:$4 sm:$0xff]  }
 0x474   :  { %3762 = vmatpush1.bf16.msra.mxu1 %v10796_v58  ;;  %3926 = vmatpush1.bf16.msra.mxu0 %v10799_v59  ;;  %v10820_v58 = vld [vmem:[#allocation11 + $0x3b8] ss:$28 sps:$4 sm:$0xff]   ;;  %v10823_v59 = vld [vmem:[#allocation11 + $0x3c0] ss:$28 sps:$4 sm:$0xff]  }
 0x475   :  { %3763 = vmatprep.subr.bf16.mxu1 %v10804_v60  ;;  %3927 = vmatprep.subr.bf16.mxu0 %v10807_v61  ;;  %v10828_v60 = vld [vmem:[#allocation11 + $0x3f4] ss:$28 sps:$4 sm:$0xff]   ;;  %v10831_v61 = vld [vmem:[#allocation11 + $0x3fc] ss:$28 sps:$4 sm:$0xff]  }
 0x478   :  { %3764 = vmatpush1.bf16.msra.mxu1 %v10802_v62  ;;  %3928 = vmatpush1.bf16.msra.mxu0 %v10805_v63  ;;  %v10826_v62 = vld [vmem:[#allocation11 + $0x3f0] ss:$28 sps:$4 sm:$0xff]   ;;  %v10829_v63 = vld [vmem:[#allocation11 + $0x3f8] ss:$28 sps:$4 sm:$0xff]  }
 0x479   :  { %3765 = vmatprep.subr.bf16.mxu1 %v10810_v0  ;;  %3929 = vmatprep.subr.bf16.mxu0 %v10813_v2  ;;  %v10834_v0 = vld [vmem:[#allocation11 + $0x42c] ss:$28 sps:$4 sm:$0xff]   ;;  %v10837_v2 = vld [vmem:[#allocation11 + $0x434] ss:$28 sps:$4 sm:$0xff]  }
 0x47c   :  { %3766 = vmatpush1.bf16.msra.mxu1 %v10808_v3  ;;  %3930 = vmatpush1.bf16.msra.mxu0 %v10811_v4  ;;  %v10832_v3 = vld [vmem:[#allocation11 + $0x428] ss:$28 sps:$4 sm:$0xff]   ;;  %v10835_v4 = vld [vmem:[#allocation11 + $0x430] ss:$28 sps:$4 sm:$0xff]  }
 0x47d   :  { %3776 = vmatprep.subr.bf16.mxu1 %v10816_v5  ;;  %3940 = vmatprep.subr.bf16.mxu0 %v10819_v6  ;;  %v10840_v5 = vld [vmem:[#allocation11 + $0x464] ss:$28 sps:$4 sm:$0xff]   ;;  %v10843_v6 = vld [vmem:[#allocation11 + $0x46c] ss:$28 sps:$4 sm:$0xff]  }
 0x50a   :  { %v704_v16 = vpop.f32.mrb[0].mxu1  ;;  %v13110_v17 = vpop.f32.mrb[4].mxu0 }
 0x50b   :  { %v705_v18 = vadd.f32 %v704_v16, %v550_v13  ;;  %v706_v19 = vpop.f32.mrb[1].mxu1  ;;  %v747_v20 = vpop.f32.mrb[5].mxu0  ;;  %v10841_v13 = vld [vmem:[#allocation11 + $0x468] ss:$28 sps:$4 sm:$0xff]   ;;  %v10844_v16 = vld [vmem:[#allocation11 + $0x498] ss:$28 sps:$4 sm:$0xff]  }
 0x50c   :  { %v707_v21 = vadd.f32 %v706_v19, %v554_v14  ;;  %v748_v22 = vadd.f32 %v747_v20, %v562_v15  ;;  %v708_v23 = vpop.f32.mrb[2].mxu1  ;;  %v749_v24 = vpop.f32.mrb[6].mxu0  ;;  %v10846_v14 = vld [vmem:[#allocation11 + $0x49c] ss:$28 sps:$4 sm:$0xff]   ;;  %v10849_v15 = vld [vmem:[#allocation11 + $0x4a4] ss:$28 sps:$4 sm:$0xff]  }
 0x50d   :  { %v842_v25 = vmul.f32 0.70710677, %v705_v18  ;;  %v709_v28 = vpop.f32.mrb[3].mxu1  ;;  %v750_v29 = vpop.f32.mrb[7].mxu0  ;;  %v834_v42 = vmul.f32 0.5, %v705_v18 }
 0x50e   :  { %v843_v26 = vmul.f32 0.70710677, %v707_v21  ;;  %v845_v27 = vmul.f32 0.70710677, %v748_v22  ;;  %v835_v44 = vmul.f32 0.5, %v707_v21  ;;  %v837_v47 = vmul.f32 0.5, %v748_v22 }
 0x50f   :  { %12121 = verf.f32 %v842_v25  ;;  %v10847_v18 = vld [vmem:[#allocation11 + $0x4a0] ss:$28 sps:$4 sm:$0xff]   ;;  %v10852_v19 = vld [vmem:[#allocation11 + $0x4d4] ss:$28 sps:$4 sm:$0xff]   ;;  %v10858_v23 = vld [vmem:[#allocation11 + $0x50c] ss:$28 sps:$4 sm:$0xff]  }
 0x510   :  { %12123 = verf.f32 %v843_v26  ;;  %v10855_v20 = vld [vmem:[#allocation11 + $0x4dc] ss:$28 sps:$4 sm:$0xff]   ;;  %v10850_v21 = vld [vmem:[#allocation11 + $0x4d0] ss:$28 sps:$4 sm:$0xff]   ;;  %v13133_v25 = vsub.s32 2, %v13091_v8  ;;  %v569_v28 = vsub.s32 5, %v13091_v8 }
 0x511   :  { %12125 = verf.f32 %v845_v27  ;;  %v10853_v22 = vld [vmem:[#allocation11 + $0x4d8] ss:$28 sps:$4 sm:$0xff]   ;;  %v10856_v26 = vld [vmem:[#allocation11 + $0x508] ss:$28 sps:$4 sm:$0xff]   ;;  %v10859_v27 = vld [vmem:[#allocation11 + $0x510] ss:$28 sps:$4 sm:$0xff]  }
 0x512   :  { %v13112_v30 = vpop.f32.mrb[4].mxu1  ;;  %v13114_v31 = vpop.f32.mrb[8].mxu0  ;;  %v10861_v24 = vld [vmem:[#allocation11 + $0x514] ss:$28 sps:$4 sm:$0xff]   ;;  %v10864_v29 = vld [vmem:[#allocation11 + $0x544] ss:$28 sps:$4 sm:$0xff]  }
 0x513   :  { %v13116_v32 = vpop.f32.mrb[5].mxu1  ;;  %v13118_v33 = vpop.f32.mrb[9].mxu0 }
 0x514   :  { %v790_v34 = vpop.f32.mrb[6].mxu1  ;;  %v831_v35 = vpop.f32.mrb[10].mxu0 }
 0x515   :  { %v791_v36 = vpop.f32.mrb[7].mxu1  ;;  %v832_v37 = vpop.f32.mrb[11].mxu0  ;;  %v10867_v34 = vld [vmem:[#allocation11 + $0x54c] ss:$28 sps:$4 sm:$0xff]   ;;  %v558_v35 = vrot.slane %v13096_v10, %v13133_v25 }
 0x516   :  { %v10862_v36 = vld [vmem:[#allocation11 + $0x540] ss:$28 sps:$4 sm:$0xff]   ;;  %v10865_v37 = vld [vmem:[#allocation11 + $0x548] ss:$28 sps:$4 sm:$0xff]  }
 0x519   :  { %v12122_v38 = vpop.eup %12121 }
 0x51a   :  { %v858_v40 = vadd.f32 1.0, %v12122_v38  ;;  %v12124_v41 = vpop.eup %12123  ;;  %v570_v38 = vrot.slane %v13096_v10, %v569_v28 }
 0x51b   :  { %v12126_v43 = vpop.eup %12125  ;;  %v859_v45 = vadd.f32 1.0, %v12124_v41  ;;  %v10873_v41 = vld [vmem:[#allocation11 + $0x584] ss:$28 sps:$4 sm:$0xff]  }
 0x51c   :  { %v866_v46 = vmul.f32 %v858_v40, %v834_v42  ;;  %v861_v48 = vadd.f32 1.0, %v12126_v43  ;;  %v10870_v40 = vld [vmem:[#allocation11 + $0x57c] ss:$28 sps:$4 sm:$0xff]   ;;  %v746_v42 = vadd.f32 %v13110_v17, %v558_v35  ;;  %v10885_v17 = vld [vmem:[#allocation11 + $0x5f4] ss:$28 sps:$4 sm:$0xff]  }
 0x51d   :  { %v867_v49 = vmul.f32 %v859_v45, %v835_v44  ;;  %v10868_v43 = vld [vmem:[#allocation11 + $0x578] ss:$28 sps:$4 sm:$0xff]   ;;  %v10871_v44 = vld [vmem:[#allocation11 + $0x580] ss:$28 sps:$4 sm:$0xff]   ;;  %v789_v45 = vadd.f32 %v13116_v32, %v570_v38 }
 0x51e   :  { %v869_v50 = vmul.f32 %v861_v48, %v837_v47  ;;  %v13122_v54 = vpack.c.bf16 %v866_v46, %v866_v46  ;;  %v10876_v46 = vld [vmem:[#allocation11 + $0x5b4] ss:$28 sps:$4 sm:$0xff]   ;;  %v10879_v47 = vld [vmem:[#allocation11 + $0x5bc] ss:$28 sps:$4 sm:$0xff]   ;;  %v844_v48 = vmul.f32 0.70710677, %v746_v42 }
 0x51f   :  { %v13120_v51 = vpack.c.bf16 %v867_v49, %v867_v49  ;;  %v10874_v49 = vld [vmem:[#allocation11 + $0x5b0] ss:$28 sps:$4 sm:$0xff]   ;;  %v10888_v32 = vld [vmem:[#allocation11 + $0x624] ss:$28 sps:$4 sm:$0xff]   ;;  %v10916_v38 = vld [vmem:[#allocation11 + $0x738] ss:$28 sps:$4 sm:$0xff]  }
 0x520   :  { %v13126_v57 = vpack.c.bf16 %v869_v50, %v869_v50  ;;  %v10877_v50 = vld [vmem:[#allocation11 + $0x5b8] ss:$28 sps:$4 sm:$0xff]   ;;  %12127 = verf.f32 %v844_v48  ;;  %v10931_v48 = vld [vmem:[#allocation11 + $0x7b0] ss:$28 sps:$4 sm:$0xff]  }
 0x521   :  { %3767 = vmatprep.mubr.bf16.mxu1 %v13120_v51  ;;  %3931 = vmatprep.mubr.bf16.mxu0 %v13120_v51 }
 0x522   :  { %3768 = vmatmul.mubr.bf16.vlgmr.msra.gmra.mrb[8].mxu1 %v13122_v54  ;;  %3932 = vmatmul.mubr.bf16.vlgmr.msra.gmra.mrb[12].mxu0 %v13122_v54 }
 0x523   :  { %3777 = vmatpush1.bf16.msra.mxu1 %v10814_v52  ;;  %3941 = vmatpush1.bf16.msra.mxu0 %v10817_v53  ;;  %v847_v52 = vmul.f32 0.70710677, %v789_v45  ;;  %v10882_v53 = vld [vmem:[#allocation11 + $0x5ec] ss:$28 sps:$4 sm:$0xff]  }
 0x524   :  { %3808 = vmatprep.mubr.bf16.mxu1 %v13126_v57  ;;  %3972 = vmatprep.mubr.bf16.mxu0 %v13126_v57 }
 0x525   :  { %3778 = vmatprep.subr.bf16.mxu1 %v10822_v55  ;;  %3942 = vmatprep.subr.bf16.mxu0 %v10825_v56  ;;  %v10880_v55 = vld [vmem:[#allocation11 + $0x5e8] ss:$28 sps:$4 sm:$0xff]   ;;  %v10883_v56 = vld [vmem:[#allocation11 + $0x5f0] ss:$28 sps:$4 sm:$0xff]   ;;  %12129 = verf.f32 %v847_v52  ;;  %v10934_v52 = vld [vmem:[#allocation11 + $0x7e0] ss:$28 sps:$4 sm:$0xff]  }
 0x527   :  { %3779 = vmatpush1.bf16.msra.mxu1 %v10820_v58  ;;  %3943 = vmatpush1.bf16.msra.mxu0 %v10823_v59  ;;  %v10891_v58 = vld [vmem:[#allocation11 + $0x62c] ss:$28 sps:$4 sm:$0xff]   ;;  %v10886_v59 = vld [vmem:[#allocation11 + $0x620] ss:$28 sps:$4 sm:$0xff]  }
 0x528   :  { %3780 = vmatprep.subr.bf16.mxu1 %v10828_v60  ;;  %3944 = vmatprep.subr.bf16.mxu0 %v10831_v61  ;;  %v10889_v60 = vld [vmem:[#allocation11 + $0x628] ss:$28 sps:$4 sm:$0xff]   ;;  %v10894_v61 = vld [vmem:[#allocation11 + $0x65c] ss:$28 sps:$4 sm:$0xff]  }
 0x52b   :  { %3781 = vmatpush1.bf16.msra.mxu1 %v10826_v62  ;;  %3945 = vmatpush1.bf16.msra.mxu0 %v10829_v63  ;;  %v10897_v62 = vld [vmem:[#allocation11 + $0x664] ss:$28 sps:$4 sm:$0xff]   ;;  %v10892_v63 = vld [vmem:[#allocation11 + $0x658] ss:$28 sps:$4 sm:$0xff]  }
 0x52c   :  { %3782 = vmatprep.subr.bf16.mxu1 %v10834_v0  ;;  %3946 = vmatprep.subr.bf16.mxu0 %v10837_v2  ;;  %v10895_v0 = vld [vmem:[#allocation11 + $0x660] ss:$28 sps:$4 sm:$0xff]   ;;  %v10900_v2 = vld [vmem:[#allocation11 + $0x694] ss:$28 sps:$4 sm:$0xff]  }
 0x52f   :  { %3783 = vmatpush1.bf16.msra.mxu1 %v10832_v3  ;;  %3947 = vmatpush1.bf16.msra.mxu0 %v10835_v4  ;;  %v10903_v3 = vld [vmem:[#allocation11 + $0x69c] ss:$28 sps:$4 sm:$0xff]   ;;  %v12128_v4 = vpop.eup %12127 }
 0x530   :  { %3784 = vmatprep.subr.bf16.mxu1 %v10840_v5  ;;  %3948 = vmatprep.subr.bf16.mxu0 %v10843_v6  ;;  %v12130_v5 = vpop.eup %12129  ;;  %v10898_v6 = vld [vmem:[#allocation11 + $0x690] ss:$28 sps:$4 sm:$0xff]  }
 0x533   :  { %3785 = vmatpush1.bf16.msra.mxu1 %v10838_v7  ;;  %3949 = vmatpush1.bf16.msra.mxu0 %v10841_v13  ;;  %v10901_v7 = vld [vmem:[#allocation11 + $0x698] ss:$28 sps:$4 sm:$0xff]   ;;  %v860_v13 = vadd.f32 1.0, %v12128_v4  ;;  %v10960_v4 = vld [vmem:[#allocation11 + $0x8c4] ss:$28 sps:$4 sm:$0xff]  }
 0x534   :  { %3786 = vmatprep.subr.bf16.mxu1 %v10846_v14  ;;  %3950 = vmatprep.subr.bf16.mxu0 %v10849_v15  ;;  %v10906_v14 = vld [vmem:[#allocation11 + $0x6cc] ss:$28 sps:$4 sm:$0xff]   ;;  %v10909_v15 = vld [vmem:[#allocation11 + $0x6d4] ss:$28 sps:$4 sm:$0xff]  }
 0x537   :  { %3787 = vmatpush1.bf16.msra.mxu1 %v10844_v16  ;;  %3951 = vmatpush1.bf16.msra.mxu0 %v10847_v18  ;;  %v863_v16 = vadd.f32 1.0, %v12130_v5  ;;  %v836_v18 = vmul.f32 0.5, %v746_v42  ;;  %v10927_v42 = vld [vmem:[#allocation11 + $0x77c] ss:$28 sps:$4 sm:$0xff]   ;;  %v577_v5 = vsub.s32 7, %v13091_v8 }
 0x538   :  { %3788 = vmatprep.subr.bf16.mxu1 %v10852_v19  ;;  %3952 = vmatprep.subr.bf16.mxu0 %v10855_v20  ;;  %v839_v19 = vmul.f32 0.5, %v789_v45  ;;  %v10904_v20 = vld [vmem:[#allocation11 + $0x6c8] ss:$28 sps:$4 sm:$0xff]  }
 0x539   :  { %v10930_v45 = vld [vmem:[#allocation11 + $0x7ac] ss:$28 sps:$4 sm:$0xff]  }
 0x53b   :  { %3789 = vmatpush1.bf16.msra.mxu1 %v10850_v21  ;;  %3953 = vmatpush1.bf16.msra.mxu0 %v10853_v22  ;;  %v10907_v21 = vld [vmem:[#allocation11 + $0x6d0] ss:$28 sps:$4 sm:$0xff]   ;;  %v868_v22 = vmul.f32 %v860_v13, %v836_v18  ;;  %v10958_v13 = vld [vmem:[#allocation11 + $0x8c0] ss:$28 sps:$4 sm:$0xff]  }
 0x53c   :  { %3790 = vmatprep.subr.bf16.mxu1 %v10858_v23  ;;  %3954 = vmatprep.subr.bf16.mxu0 %v10861_v24  ;;  %v10912_v23 = vld [vmem:[#allocation11 + $0x704] ss:$28 sps:$4 sm:$0xff]   ;;  %v10915_v24 = vld [vmem:[#allocation11 + $0x70c] ss:$28 sps:$4 sm:$0xff]  }
 0x53d   :  { %v10969_v18 = vld [vmem:[#allocation11 + $0x904] ss:$28 sps:$4 sm:$0xff]  }
 0x53f   :  { %3791 = vmatpush1.bf16.msra.mxu1 %v10856_v26  ;;  %3955 = vmatpush1.bf16.msra.mxu0 %v10859_v27  ;;  %v871_v26 = vmul.f32 %v863_v16, %v839_v19  ;;  %v10910_v27 = vld [vmem:[#allocation11 + $0x700] ss:$28 sps:$4 sm:$0xff]   ;;  %v578_v16 = vrot.slane %v13096_v10, %v577_v5 }
 0x540   :  { %3792 = vmatprep.subr.bf16.mxu1 %v10864_v29  ;;  %3956 = vmatprep.subr.bf16.mxu0 %v10867_v34  ;;  %v13143_v29 = vpack.c.bf16 %v868_v22, %v868_v22  ;;  %v10913_v34 = vld [vmem:[#allocation11 + $0x708] ss:$28 sps:$4 sm:$0xff]   ;;  %v10972_v22 = vld [vmem:[#allocation11 + $0x934] ss:$28 sps:$4 sm:$0xff]   ;;  %v11006_v5 = vld [vmem:[#allocation11 + $0xa80] ss:$28 sps:$4 sm:$0xff]  }
 0x541   :  { %v13145_v35 = vpack.c.bf16 %v871_v26, %v871_v26 }
 0x543   :  { %3793 = vmatpush1.bf16.msra.mxu1 %v10862_v36  ;;  %3957 = vmatpush1.bf16.msra.mxu0 %v10865_v37  ;;  %v10918_v36 = vld [vmem:[#allocation11 + $0x73c] ss:$28 sps:$4 sm:$0xff]   ;;  %v10921_v37 = vld [vmem:[#allocation11 + $0x744] ss:$28 sps:$4 sm:$0xff]  }
 0x544   :  { %3794 = vmatprep.subr.bf16.mxu1 %v10870_v40  ;;  %3958 = vmatprep.subr.bf16.mxu0 %v10873_v41  ;;  %v10919_v40 = vld [vmem:[#allocation11 + $0x740] ss:$28 sps:$4 sm:$0xff]   ;;  %v10924_v41 = vld [vmem:[#allocation11 + $0x774] ss:$28 sps:$4 sm:$0xff]  }
 0x547   :  { %3795 = vmatpush1.bf16.msra.mxu1 %v10868_v43  ;;  %3959 = vmatpush1.bf16.msra.mxu0 %v10871_v44  ;;  %v10922_v43 = vld [vmem:[#allocation11 + $0x770] ss:$28 sps:$4 sm:$0xff]   ;;  %v10925_v44 = vld [vmem:[#allocation11 + $0x778] ss:$28 sps:$4 sm:$0xff]  }
 0x548   :  { %3796 = vmatprep.subr.bf16.mxu1 %v10876_v46  ;;  %3960 = vmatprep.subr.bf16.mxu0 %v10879_v47  ;;  %v10933_v46 = vld [vmem:[#allocation11 + $0x7b4] ss:$28 sps:$4 sm:$0xff]   ;;  %v10928_v47 = vld [vmem:[#allocation11 + $0x7a8] ss:$28 sps:$4 sm:$0xff]  }
 0x54b   :  { %3797 = vmatpush1.bf16.msra.mxu1 %v10874_v49  ;;  %3961 = vmatpush1.bf16.msra.mxu0 %v10877_v50  ;;  %v10936_v49 = vld [vmem:[#allocation11 + $0x7e4] ss:$28 sps:$4 sm:$0xff]   ;;  %v10939_v50 = vld [vmem:[#allocation11 + $0x7ec] ss:$28 sps:$4 sm:$0xff]  }
 0x54c   :  { %3798 = vmatprep.subr.bf16.mxu1 %v10882_v53  ;;  %3962 = vmatprep.subr.bf16.mxu0 %v10885_v17  ;;  %v10937_v53 = vld [vmem:[#allocation11 + $0x7e8] ss:$28 sps:$4 sm:$0xff]   ;;  %v10942_v17 = vld [vmem:[#allocation11 + $0x81c] ss:$28 sps:$4 sm:$0xff]  }
 0x54f   :  { %3799 = vmatpush1.bf16.msra.mxu1 %v10880_v55  ;;  %3963 = vmatpush1.bf16.msra.mxu0 %v10883_v56  ;;  %v10945_v55 = vld [vmem:[#allocation11 + $0x824] ss:$28 sps:$4 sm:$0xff]   ;;  %v10940_v56 = vld [vmem:[#allocation11 + $0x818] ss:$28 sps:$4 sm:$0xff]  }
 0x550   :  { %3800 = vmatprep.subr.bf16.mxu1 %v10888_v32  ;;  %3964 = vmatprep.subr.bf16.mxu0 %v10891_v58  ;;  %v10943_v32 = vld [vmem:[#allocation11 + $0x820] ss:$28 sps:$4 sm:$0xff]   ;;  %v10948_v58 = vld [vmem:[#allocation11 + $0x854] ss:$28 sps:$4 sm:$0xff]  }
 0x553   :  { %3801 = vmatpush1.bf16.msra.mxu1 %v10886_v59  ;;  %3965 = vmatpush1.bf16.msra.mxu0 %v10889_v60  ;;  %v10951_v59 = vld [vmem:[#allocation11 + $0x85c] ss:$28 sps:$4 sm:$0xff]   ;;  %v10946_v60 = vld [vmem:[#allocation11 + $0x850] ss:$28 sps:$4 sm:$0xff]  }
 0x554   :  { %3802 = vmatprep.subr.bf16.mxu1 %v10894_v61  ;;  %3966 = vmatprep.subr.bf16.mxu0 %v10897_v62  ;;  %v10949_v61 = vld [vmem:[#allocation11 + $0x858] ss:$28 sps:$4 sm:$0xff]   ;;  %v10954_v62 = vld [vmem:[#allocation11 + $0x88c] ss:$28 sps:$4 sm:$0xff]  }
 0x557   :  { %3803 = vmatpush1.bf16.msra.mxu1 %v10892_v63  ;;  %3967 = vmatpush1.bf16.msra.mxu0 %v10895_v0  ;;  %v10957_v63 = vld [vmem:[#allocation11 + $0x894] ss:$28 sps:$4 sm:$0xff]   ;;  %v13152_v0 = vsub.s32 4, %v13091_v8 }
 0x558   :  { %3804 = vmatprep.subr.bf16.mxu1 %v10900_v2  ;;  %3968 = vmatprep.subr.bf16.mxu0 %v10903_v3  ;;  %v10952_v2 = vld [vmem:[#allocation11 + $0x888] ss:$28 sps:$4 sm:$0xff]   ;;  %v10955_v3 = vld [vmem:[#allocation11 + $0x890] ss:$28 sps:$4 sm:$0xff]  }
 0x55b   :  { %3805 = vmatpush1.bf16.msra.mxu1 %v10898_v6  ;;  %3969 = vmatpush1.bf16.msra.mxu0 %v10901_v7  ;;  %v10963_v6 = vld [vmem:[#allocation11 + $0x8cc] ss:$28 sps:$4 sm:$0xff]   ;;  %v566_v7 = vrot.slane %v13096_v10, %v13152_v0 }
 0x55c   :  { %3806 = vmatprep.subr.bf16.mxu1 %v10906_v14  ;;  %3970 = vmatprep.subr.bf16.mxu0 %v10909_v15  ;;  %v10961_v14 = vld [vmem:[#allocation11 + $0x8c8] ss:$28 sps:$4 sm:$0xff]   ;;  %v10966_v15 = vld [vmem:[#allocation11 + $0x8fc] ss:$28 sps:$4 sm:$0xff]  }
 0x55d   :  { %v787_v19 = vadd.f32 %v13112_v30, %v566_v7  ;;  %v10981_v30 = vld [vmem:[#allocation11 + $0x974] ss:$28 sps:$4 sm:$0xff]   ;;  %v11009_v7 = vld [vmem:[#allocation11 + $0xa88] ss:$28 sps:$4 sm:$0xff]  }
 0x55f   :  { %3807 = vmatpush1.bf16.msra.mxu1 %v10904_v20  ;;  %3971 = vmatpush1.bf16.msra.mxu0 %v10907_v21  ;;  %v10964_v20 = vld [vmem:[#allocation11 + $0x8f8] ss:$28 sps:$4 sm:$0xff]   ;;  %v10967_v21 = vld [vmem:[#allocation11 + $0x900] ss:$28 sps:$4 sm:$0xff]   ;;  %v846_v26 = vmul.f32 0.70710677, %v787_v19 }
 0x560   :  { %3817 = vmatprep.subr.bf16.mxu1 %v10912_v23  ;;  %3981 = vmatprep.subr.bf16.mxu0 %v10915_v24  ;;  %v830_v23 = vadd.f32 %v13118_v33, %v578_v16  ;;  %v10975_v24 = vld [vmem:[#allocation11 + $0x93c] ss:$28 sps:$4 sm:$0xff]   ;;  %v10987_v33 = vld [vmem:[#allocation11 + $0x9ac] ss:$28 sps:$4 sm:$0xff]  }
 0x561   :  { %12131 = verf.f32 %v846_v26  ;;  %v11012_v16 = vld [vmem:[#allocation11 + $0xab8] ss:$28 sps:$4 sm:$0xff]   ;;  %v11024_v26 = vld [vmem:[#allocation11 + $0xb28] ss:$28 sps:$4 sm:$0xff]  }
 0x562   :  { %3809 = vmatmul.mubr.bf16.vlgmr.msra.gmra.mrb[8].mxu1 %v13143_v29  ;;  %3973 = vmatmul.mubr.bf16.vlgmr.msra.gmra.mrb[12].mxu0 %v13143_v29 }
 0x563   :  { %3818 = vmatpush1.bf16.msra.mxu1 %v10910_v27  ;;  %3849 = vmatprep.mubr.bf16.mxu1 %v13145_v35  ;;  %v10970_v27 = vld [vmem:[#allocation11 + $0x930] ss:$28 sps:$4 sm:$0xff]  }
 0x564   :  { %3982 = vmatpush1.bf16.msra.mxu0 %v10913_v34  ;;  %4013 = vmatprep.mubr.bf16.mxu0 %v13145_v35  ;;  %v10973_v34 = vld [vmem:[#allocation11 + $0x938] ss:$28 sps:$4 sm:$0xff]  }
 0x565   :  { %3819 = vmatprep.subr.bf16.mxu1 %v10918_v36  ;;  %3983 = vmatprep.subr.bf16.mxu0 %v10921_v37  ;;  %v10978_v36 = vld [vmem:[#allocation11 + $0x96c] ss:$28 sps:$4 sm:$0xff]   ;;  %v849_v37 = vmul.f32 0.70710677, %v830_v23 }
 0x567   :  { %3820 = vmatpush1.bf16.msra.mxu1 %v10916_v38  ;;  %v10976_v38 = vld [vmem:[#allocation11 + $0x968] ss:$28 sps:$4 sm:$0xff]   ;;  %12133 = verf.f32 %v849_v37  ;;  %v11030_v37 = vld [vmem:[#allocation11 + $0xb60] ss:$28 sps:$4 sm:$0xff]  }
 0x568   :  { %3984 = vmatpush1.bf16.msra.mxu0 %v10919_v40  ;;  %3821 = vmatprep.subr.bf16.mxu1 %v10924_v41  ;;  %v10979_v40 = vld [vmem:[#allocation11 + $0x970] ss:$28 sps:$4 sm:$0xff]   ;;  %v10984_v41 = vld [vmem:[#allocation11 + $0x9a4] ss:$28 sps:$4 sm:$0xff]  }
 0x569   :  { %3985 = vmatprep.subr.bf16.mxu0 %v10927_v42  ;;  %v10982_v42 = vld [vmem:[#allocation11 + $0x9a0] ss:$28 sps:$4 sm:$0xff]  }
 0x56b   :  { %3822 = vmatpush1.bf16.msra.mxu1 %v10922_v43  ;;  %v10985_v43 = vld [vmem:[#allocation11 + $0x9a8] ss:$28 sps:$4 sm:$0xff]  }
 0x56c   :  { %3986 = vmatpush1.bf16.msra.mxu0 %v10925_v44  ;;  %3823 = vmatprep.subr.bf16.mxu1 %v10930_v45  ;;  %v10990_v44 = vld [vmem:[#allocation11 + $0x9dc] ss:$28 sps:$4 sm:$0xff]   ;;  %v10993_v45 = vld [vmem:[#allocation11 + $0x9e4] ss:$28 sps:$4 sm:$0xff]  }
 0x56d   :  { %3987 = vmatprep.subr.bf16.mxu0 %v10933_v46  ;;  %v10988_v46 = vld [vmem:[#allocation11 + $0x9d8] ss:$28 sps:$4 sm:$0xff]  }
 0x56f   :  { %3824 = vmatpush1.bf16.msra.mxu1 %v10928_v47  ;;  %v10991_v47 = vld [vmem:[#allocation11 + $0x9e0] ss:$28 sps:$4 sm:$0xff]  }
 0x570   :  { %3988 = vmatpush1.bf16.msra.mxu0 %v10931_v48  ;;  %3825 = vmatprep.subr.bf16.mxu1 %v10936_v49  ;;  %v10996_v48 = vld [vmem:[#allocation11 + $0xa14] ss:$28 sps:$4 sm:$0xff]   ;;  %v12132_v49 = vpop.eup %12131 }
 0x571   :  { %3989 = vmatprep.subr.bf16.mxu0 %v10939_v50  ;;  %v10999_v50 = vld [vmem:[#allocation11 + $0xa1c] ss:$28 sps:$4 sm:$0xff]  }
 0x573   :  { %3826 = vmatpush1.bf16.msra.mxu1 %v10934_v52  ;;  %v12134_v52 = vpop.eup %12133 }
 0x574   :  { %3990 = vmatpush1.bf16.msra.mxu0 %v10937_v53  ;;  %3827 = vmatprep.subr.bf16.mxu1 %v10942_v17  ;;  %v10994_v53 = vld [vmem:[#allocation11 + $0xa10] ss:$28 sps:$4 sm:$0xff]   ;;  %v862_v17 = vadd.f32 1.0, %v12132_v49  ;;  %v11048_v49 = vld [vmem:[#allocation11 + $0xc08] ss:$28 sps:$4 sm:$0xff]  }
 0x575   :  { %3991 = vmatprep.subr.bf16.mxu0 %v10945_v55  ;;  %v10997_v55 = vld [vmem:[#allocation11 + $0xa18] ss:$28 sps:$4 sm:$0xff]  }
 0x577   :  { %3828 = vmatpush1.bf16.msra.mxu1 %v10940_v56  ;;  %v11002_v56 = vld [vmem:[#allocation11 + $0xa4c] ss:$28 sps:$4 sm:$0xff]  }
 0x578   :  { %3992 = vmatpush1.bf16.msra.mxu0 %v10943_v32  ;;  %3829 = vmatprep.subr.bf16.mxu1 %v10948_v58  ;;  %v11005_v32 = vld [vmem:[#allocation11 + $0xa54] ss:$28 sps:$4 sm:$0xff]   ;;  %v838_v58 = vmul.f32 0.5, %v787_v19 }
 0x579   :  { %3993 = vmatprep.subr.bf16.mxu0 %v10951_v59  ;;  %v865_v59 = vadd.f32 1.0, %v12134_v52  ;;  %v11020_v19 = vld [vmem:[#allocation11 + $0xaf4] ss:$28 sps:$4 sm:$0xff]   ;;  %v11056_v52 = vld [vmem:[#allocation11 + $0xc44] ss:$28 sps:$4 sm:$0xff]  }
 0x57b   :  { %3830 = vmatpush1.bf16.msra.mxu1 %v10946_v60  ;;  %v11000_v60 = vld [vmem:[#allocation11 + $0xa48] ss:$28 sps:$4 sm:$0xff]  }
 0x57c   :  { %3994 = vmatpush1.bf16.msra.mxu0 %v10949_v61  ;;  %3831 = vmatprep.subr.bf16.mxu1 %v10954_v62  ;;  %v870_v61 = vmul.f32 %v862_v17, %v838_v58  ;;  %v841_v62 = vmul.f32 0.5, %v830_v23  ;;  %v11026_v23 = vld [vmem:[#allocation11 + $0xb2c] ss:$28 sps:$4 sm:$0xff]   ;;  %v11065_v58 = vld [vmem:[#allocation11 + $0xc84] ss:$28 sps:$4 sm:$0xff]  }
 0x57d   :  { %3995 = vmatprep.subr.bf16.mxu0 %v10957_v63  ;;  %v11003_v63 = vld [vmem:[#allocation11 + $0xa50] ss:$28 sps:$4 sm:$0xff]  }
 0x57f   :  { %3832 = vmatpush1.bf16.msra.mxu1 %v10952_v2  ;;  %v11008_v2 = vld [vmem:[#allocation11 + $0xa84] ss:$28 sps:$4 sm:$0xff]  }
 0x580   :  { %3996 = vmatpush1.bf16.msra.mxu0 %v10955_v3  ;;  %3833 = vmatprep.subr.bf16.mxu1 %v10960_v4  ;;  %v11011_v3 = vld [vmem:[#allocation11 + $0xa8c] ss:$28 sps:$4 sm:$0xff]   ;;  %v873_v4 = vmul.f32 %v865_v59, %v841_v62  ;;  %v11068_v62 = vld [vmem:[#allocation11 + $0xcb4] ss:$28 sps:$4 sm:$0xff]  }
 0x581   :  { %3997 = vmatprep.subr.bf16.mxu0 %v10963_v6  ;;  %v13160_v6 = vpack.c.bf16 %v870_v61, %v870_v61  ;;  %v11063_v61 = vld [vmem:[#allocation11 + $0xc80] ss:$28 sps:$4 sm:$0xff]  }
 0x583   :  { %3834 = vmatpush1.bf16.msra.mxu1 %v10958_v13  ;;  %v11014_v13 = vld [vmem:[#allocation11 + $0xabc] ss:$28 sps:$4 sm:$0xff]  }
 0x584   :  { %3998 = vmatpush1.bf16.msra.mxu0 %v10961_v14  ;;  %3835 = vmatprep.subr.bf16.mxu1 %v10966_v15  ;;  %v13162_v14 = vpack.c.bf16 %v873_v4, %v873_v4  ;;  %v11017_v15 = vld [vmem:[#allocation11 + $0xac4] ss:$28 sps:$4 sm:$0xff]   ;;  %v11074_v4 = vld [vmem:[#allocation11 + $0xcec] ss:$28 sps:$4 sm:$0xff]  }
 0x585   :  { %3999 = vmatprep.subr.bf16.mxu0 %v10969_v18  ;;  %v11015_v18 = vld [vmem:[#allocation11 + $0xac0] ss:$28 sps:$4 sm:$0xff]  }
 0x587   :  { %3836 = vmatpush1.bf16.msra.mxu1 %v10964_v20  ;;  %v11023_v20 = vld [vmem:[#allocation11 + $0xafc] ss:$28 sps:$4 sm:$0xff]  }
 0x588   :  { %4000 = vmatpush1.bf16.msra.mxu0 %v10967_v21  ;;  %3837 = vmatprep.subr.bf16.mxu1 %v10972_v22  ;;  %v11018_v21 = vld [vmem:[#allocation11 + $0xaf0] ss:$28 sps:$4 sm:$0xff]   ;;  %v11021_v22 = vld [vmem:[#allocation11 + $0xaf8] ss:$28 sps:$4 sm:$0xff]  }
 0x589   :  { %4001 = vmatprep.subr.bf16.mxu0 %v10975_v24  ;;  %v11029_v24 = vld [vmem:[#allocation11 + $0xb34] ss:$28 sps:$4 sm:$0xff]  }
 0x58b   :  { %3838 = vmatpush1.bf16.msra.mxu1 %v10970_v27  ;;  %v11027_v27 = vld [vmem:[#allocation11 + $0xb30] ss:$28 sps:$4 sm:$0xff]  }
 0x58c   :  { %4002 = vmatpush1.bf16.msra.mxu0 %v10973_v34  ;;  %3839 = vmatprep.subr.bf16.mxu1 %v10978_v36  ;;  %v11032_v34 = vld [vmem:[#allocation11 + $0xb64] ss:$28 sps:$4 sm:$0xff]   ;;  %v11035_v36 = vld [vmem:[#allocation11 + $0xb6c] ss:$28 sps:$4 sm:$0xff]  }
 0x58d   :  { %4003 = vmatprep.subr.bf16.mxu0 %v10981_v30  ;;  %v11033_v30 = vld [vmem:[#allocation11 + $0xb68] ss:$28 sps:$4 sm:$0xff]  }
 0x58f   :  { %3840 = vmatpush1.bf16.msra.mxu1 %v10976_v38  ;;  %v11038_v38 = vld [vmem:[#allocation11 + $0xb9c] ss:$28 sps:$4 sm:$0xff]  }
 0x590   :  { %4004 = vmatpush1.bf16.msra.mxu0 %v10979_v40  ;;  %3841 = vmatprep.subr.bf16.mxu1 %v10984_v41  ;;  %v11041_v40 = vld [vmem:[#allocation11 + $0xba4] ss:$28 sps:$4 sm:$0xff]   ;;  %v11036_v41 = vld [vmem:[#allocation11 + $0xb98] ss:$28 sps:$4 sm:$0xff]  }
 0x591   :  { %4005 = vmatprep.subr.bf16.mxu0 %v10987_v33  ;;  %v11039_v33 = vld [vmem:[#allocation11 + $0xba0] ss:$28 sps:$4 sm:$0xff]  }
 0x593   :  { %3842 = vmatpush1.bf16.msra.mxu1 %v10982_v42  ;;  %v11044_v42 = vld [vmem:[#allocation11 + $0xbd4] ss:$28 sps:$4 sm:$0xff]  }
 0x594   :  { %4006 = vmatpush1.bf16.msra.mxu0 %v10985_v43  ;;  %3843 = vmatprep.subr.bf16.mxu1 %v10990_v44  ;;  %v11047_v43 = vld [vmem:[#allocation11 + $0xbdc] ss:$28 sps:$4 sm:$0xff]   ;;  %v11042_v44 = vld [vmem:[#allocation11 + $0xbd0] ss:$28 sps:$4 sm:$0xff]  }
 0x595   :  { %4007 = vmatprep.subr.bf16.mxu0 %v10993_v45  ;;  %v11045_v45 = vld [vmem:[#allocation11 + $0xbd8] ss:$28 sps:$4 sm:$0xff]  }
 0x597   :  { %3844 = vmatpush1.bf16.msra.mxu1 %v10988_v46  ;;  %v11050_v46 = vld [vmem:[#allocation11 + $0xc0c] ss:$28 sps:$4 sm:$0xff]  }
 0x598   :  { %4008 = vmatpush1.bf16.msra.mxu0 %v10991_v47  ;;  %3845 = vmatprep.subr.bf16.mxu1 %v10996_v48  ;;  %v11053_v47 = vld [vmem:[#allocation11 + $0xc14] ss:$28 sps:$4 sm:$0xff]   ;;  %v573_v48 = vsub.s32 6, %v13091_v8 }
 0x599   :  { %4009 = vmatprep.subr.bf16.mxu0 %v10999_v50  ;;  %v11051_v50 = vld [vmem:[#allocation11 + $0xc10] ss:$28 sps:$4 sm:$0xff]  }
 0x59a   :  { %v574_v17 = vrot.slane %v13096_v10, %v573_v48  ;;  %v11066_v10 = vld [vmem:[#allocation11 + $0xcb0] ss:$28 sps:$4 sm:$0xff]  }
 0x59b   :  { %3846 = vmatpush1.bf16.msra.mxu1 %v10994_v53  ;;  %v11059_v53 = vld [vmem:[#allocation11 + $0xc4c] ss:$28 sps:$4 sm:$0xff]  }
 0x59c   :  { %4010 = vmatpush1.bf16.msra.mxu0 %v10997_v55  ;;  %3847 = vmatprep.subr.bf16.mxu1 %v11002_v56  ;;  %v11054_v55 = vld [vmem:[#allocation11 + $0xc40] ss:$28 sps:$4 sm:$0xff]   ;;  %v11057_v56 = vld [vmem:[#allocation11 + $0xc48] ss:$28 sps:$4 sm:$0xff]   ;;  %v828_v59 = vadd.f32 %v13114_v31, %v574_v17 }
 0x59d   :  { %4011 = vmatprep.subr.bf16.mxu0 %v11005_v32  ;;  %v11062_v32 = vld [vmem:[#allocation11 + $0xc7c] ss:$28 sps:$4 sm:$0xff]   ;;  %v11072_v31 = vld [vmem:[#allocation11 + $0xce8] ss:$28 sps:$4 sm:$0xff]  }
 0x59e   :  { %v11115_v17 = vld [vmem:[#allocation11 + $0x248] ss:$28 sps:$4 sm:$0xff]  }
 0x59f   :  { %3848 = vmatpush1.bf16.msra.mxu1 %v11000_v60  ;;  %v11060_v60 = vld [vmem:[#allocation11 + $0xc78] ss:$28 sps:$4 sm:$0xff]  }
 0x5a0   :  { %4012 = vmatpush1.bf16.msra.mxu0 %v11003_v63  ;;  %3858 = vmatprep.subr.bf16.mxu1 %v11008_v2  ;;  %v11071_v63 = vld [vmem:[#allocation11 + $0xcbc] ss:$28 sps:$4 sm:$0xff]   ;;  %v848_v2 = vmul.f32 0.70710677, %v828_v59 }
 0x5a1   :  { %4022 = vmatprep.subr.bf16.mxu0 %v11011_v3  ;;  %v11069_v3 = vld [vmem:[#allocation11 + $0xcb8] ss:$28 sps:$4 sm:$0xff]  }
 0x5a2   :  { %3850 = vmatmul.mubr.bf16.vlgmr.msra.gmra.mrb[8].mxu1 %v13160_v6  ;;  %12135 = verf.f32 %v848_v2  ;;  %v11129_v2 = vld [vmem:[#allocation11 + $0x12c] ss:$28 sps:$4 sm:$0xff]  }
 0x5a3   :  { %4014 = vmatmul.mubr.bf16.vlgmr.msra.gmra.mrb[12].mxu0 %v13160_v6  ;;  %3859 = vmatpush1.bf16.msra.mxu1 %v11006_v5  ;;  %v11077_v5 = vld [vmem:[#allocation11 + $0xcf4] ss:$28 sps:$4 sm:$0xff]  }
 0x5a4   :  { %3890 = vmatprep.mubr.bf16.mxu1 %v13162_v14  ;;  %4023 = vmatpush1.bf16.msra.mxu0 %v11009_v7  ;;  %v11075_v7 = vld [vmem:[#allocation11 + $0xcf0] ss:$28 sps:$4 sm:$0xff]  }
 0x5a5   :  { %4054 = vmatprep.mubr.bf16.mxu0 %v13162_v14  ;;  %3860 = vmatprep.subr.bf16.mxu1 %v11014_v13  ;;  %v11080_v13 = vld [vmem:[#allocation11 + $0xd24] ss:$28 sps:$4 sm:$0xff]  }
 0x5a6   :  { %4024 = vmatprep.subr.bf16.mxu0 %v11017_v15  ;;  %v11083_v15 = vld [vmem:[#allocation11 + $0xd2c] ss:$28 sps:$4 sm:$0xff]  }
 0x5a7   :  { %3861 = vmatpush1.bf16.msra.mxu1 %v11012_v16  ;;  %v11078_v16 = vld [vmem:[#allocation11 + $0xd20] ss:$28 sps:$4 sm:$0xff]  }
 0x5a8   :  { %4025 = vmatpush1.bf16.msra.mxu0 %v11015_v18  ;;  %3862 = vmatprep.subr.bf16.mxu1 %v11020_v19  ;;  %v11081_v18 = vld [vmem:[#allocation11 + $0xd28] ss:$28 sps:$4 sm:$0xff]   ;;  %v11086_v19 = vld [vmem:[#allocation11 + $0xd5c] ss:$28 sps:$4 sm:$0xff]  }
 0x5a9   :  { %4026 = vmatprep.subr.bf16.mxu0 %v11023_v20  ;;  %v11089_v20 = vld [vmem:[#allocation11 + $0xd64] ss:$28 sps:$4 sm:$0xff]  }
 0x5ab   :  { %3863 = vmatpush1.bf16.msra.mxu1 %v11018_v21  ;;  %v11084_v21 = vld [vmem:[#allocation11 + $0xd58] ss:$28 sps:$4 sm:$0xff]  }
 0x5ac   :  { %4027 = vmatpush1.bf16.msra.mxu0 %v11021_v22  ;;  %3864 = vmatprep.subr.bf16.mxu1 %v11026_v23  ;;  %v11087_v22 = vld [vmem:[#allocation11 + $0xd60] ss:$28 sps:$4 sm:$0xff]   ;;  %v11092_v23 = vld [vmem:[#allocation11 + $0xd94] ss:$28 sps:$4 sm:$0xff]  }
 0x5ad   :  { %4028 = vmatprep.subr.bf16.mxu0 %v11029_v24  ;;  %v12136_v24 = vpop.eup %12135 }
 0x5af   :  { %3865 = vmatpush1.bf16.msra.mxu1 %v11024_v26  ;;  %v11095_v26 = vld [vmem:[#allocation11 + $0xd9c] ss:$28 sps:$4 sm:$0xff]  }
 0x5b0   :  { %4029 = vmatpush1.bf16.msra.mxu0 %v11027_v27  ;;  %3866 = vmatprep.subr.bf16.mxu1 %v11032_v34  ;;  %v11090_v27 = vld [vmem:[#allocation11 + $0xd90] ss:$28 sps:$4 sm:$0xff]   ;;  %v864_v34 = vadd.f32 1.0, %v12136_v24 }
 0x5b1   :  { %4030 = vmatprep.subr.bf16.mxu0 %v11035_v36  ;;  %v11093_v36 = vld [vmem:[#allocation11 + $0xd98] ss:$28 sps:$4 sm:$0xff]   ;;  %v11149_v24 = vld [vmem:[#allocation11 + $0x20c] ss:$28 sps:$4 sm:$0xff]  }
 0x5b3   :  { %3867 = vmatpush1.bf16.msra.mxu1 %v11030_v37  ;;  %v11098_v37 = vld [vmem:[#allocation11 + $0xdcc] ss:$28 sps:$4 sm:$0xff]  }
 0x5b4   :  { %4031 = vmatpush1.bf16.msra.mxu0 %v11033_v30  ;;  %3868 = vmatprep.subr.bf16.mxu1 %v11038_v38  ;;  %v11101_v30 = vld [vmem:[#allocation11 + $0xdd4] ss:$28 sps:$4 sm:$0xff]   ;;  %v840_v38 = vmul.f32 0.5, %v828_v59 }
 0x5b5   :  { %4032 = vmatprep.subr.bf16.mxu0 %v11041_v40  ;;  %v11096_v40 = vld [vmem:[#allocation11 + $0xdc8] ss:$28 sps:$4 sm:$0xff]   ;;  %v11117_v59 = vld [vmem:[#allocation11 + $0xb8] ss:$28 sps:$4 sm:$0xff]  }
 0x5b7   :  { %3869 = vmatpush1.bf16.msra.mxu1 %v11036_v41  ;;  %v872_v41 = vmul.f32 %v864_v34, %v840_v38  ;;  %v11151_v34 = vld [vmem:[#allocation11 + $0x3d0] ss:$28 sps:$4 sm:$0xff]   ;;  %v11156_v38 = vld [vmem:[#allocation11 + $0x408] ss:$28 sps:$4 sm:$0xff]  }
 0x5b8   :  { %4033 = vmatpush1.bf16.msra.mxu0 %v11039_v33  ;;  %3870 = vmatprep.subr.bf16.mxu1 %v11044_v42  ;;  %v11099_v33 = vld [vmem:[#allocation11 + $0xdd0] ss:$28 sps:$4 sm:$0xff]  }
 0x5b9   :  { %4034 = vmatprep.subr.bf16.mxu0 %v11047_v43  ;;  %v11104_v42 = vld [vmem:[#allocation11 + $0x14] ss:$28 sps:$4 sm:$0xff]  }
 0x5ba   :  { %v11105_v43 = vld [vmem:[#allocation11 + $0x1d8] ss:$28 sps:$4 sm:$0xff]  }
 0x5bb   :  { %3871 = vmatpush1.bf16.msra.mxu1 %v11042_v44  ;;  %v11102_v44 = vld [vmem:[#allocation11 + $0x10] ss:$28 sps:$4 sm:$0xff]  }
 0x5bc   :  { %4035 = vmatpush1.bf16.msra.mxu0 %v11045_v45  ;;  %3872 = vmatprep.subr.bf16.mxu1 %v11050_v46  ;;  %v13173_v45 = vpack.c.bf16 %v872_v41, %v872_v41  ;;  %v11106_v46 = vld [vmem:[#allocation11 + $0x18] ss:$28 sps:$4 sm:$0xff]   ;;  %v11160_v41 = vld [vmem:[#allocation11 + $0x600] ss:$28 sps:$4 sm:$0xff]  }
 0x5bd   :  { %4036 = vmatprep.subr.bf16.mxu0 %v11053_v47  ;;  %v11109_v47 = vld [vmem:[#allocation11 + $0x4c] ss:$28 sps:$4 sm:$0xff]  }
 0x5bf   :  { %3873 = vmatpush1.bf16.msra.mxu1 %v11048_v49  ;;  %v11110_v49 = vld [vmem:[#allocation11 + $0x210] ss:$28 sps:$4 sm:$0xff]  }
 0x5c0   :  { %4037 = vmatpush1.bf16.msra.mxu0 %v11051_v50  ;;  %3874 = vmatprep.subr.bf16.mxu1 %v11056_v52  ;;  %v11107_v50 = vld [vmem:[#allocation11 + $0x48] ss:$28 sps:$4 sm:$0xff]   ;;  %v11111_v52 = vld [vmem:[#allocation11 + $0x50] ss:$28 sps:$4 sm:$0xff]  }
 0x5c1   :  { %4038 = vmatprep.subr.bf16.mxu0 %v11059_v53  ;;  %v11114_v53 = vld [vmem:[#allocation11 + $0x84] ss:$28 sps:$4 sm:$0xff]  }
 0x5c3   :  { %3875 = vmatpush1.bf16.msra.mxu1 %v11054_v55  ;;  %v11112_v55 = vld [vmem:[#allocation11 + $0x80] ss:$28 sps:$4 sm:$0xff]  }
 0x5c4   :  { %4039 = vmatpush1.bf16.msra.mxu0 %v11057_v56  ;;  %3876 = vmatprep.subr.bf16.mxu1 %v11062_v32  ;;  %v11116_v56 = vld [vmem:[#allocation11 + $0x88] ss:$28 sps:$4 sm:$0xff]   ;;  %v11119_v32 = vld [vmem:[#allocation11 + $0xbc] ss:$28 sps:$4 sm:$0xff]  }
 0x5c5   :  { %4040 = vmatprep.subr.bf16.mxu0 %v11065_v58  ;;  %v11120_v58 = vld [vmem:[#allocation11 + $0x280] ss:$28 sps:$4 sm:$0xff]  }
 0x5c7   :  { %3877 = vmatpush1.bf16.msra.mxu1 %v11060_v60  ;;  %v11121_v60 = vld [vmem:[#allocation11 + $0xc0] ss:$28 sps:$4 sm:$0xff]  }
 0x5c8   :  { %4041 = vmatpush1.bf16.msra.mxu0 %v11063_v61  ;;  %3878 = vmatprep.subr.bf16.mxu1 %v11068_v62  ;;  %v11124_v61 = vld [vmem:[#allocation11 + $0xf4] ss:$28 sps:$4 sm:$0xff]  }
 0x5c9   :  { %4042 = vmatprep.subr.bf16.mxu0 %v11071_v63  ;;  %v11125_v62 = vld [vmem:[#allocation11 + $0x2b8] ss:$28 sps:$4 sm:$0xff]  }
 0x5ca   :  { %v11126_v63 = vld [vmem:[#allocation11 + $0xf8] ss:$28 sps:$4 sm:$0xff]  }
 0x5cb   :  { %3879 = vmatpush1.bf16.msra.mxu1 %v11066_v10  ;;  %v11130_v10 = vld [vmem:[#allocation11 + $0x2f0] ss:$28 sps:$4 sm:$0xff]  }
 0x5cc   :  { %4043 = vmatpush1.bf16.msra.mxu0 %v11069_v3  ;;  %3880 = vmatprep.subr.bf16.mxu1 %v11074_v4  ;;  %v11127_v3 = vld [vmem:[#allocation11 + $0x128] ss:$28 sps:$4 sm:$0xff]   ;;  %v11131_v4 = vld [vmem:[#allocation11 + $0x130] ss:$28 sps:$4 sm:$0xff]  }
 0x5cd   :  { %4044 = vmatprep.subr.bf16.mxu0 %v11077_v5  ;;  %v11134_v5 = vld [vmem:[#allocation11 + $0x164] ss:$28 sps:$4 sm:$0xff]  }
 0x5cf   :  { %3881 = vmatpush1.bf16.msra.mxu1 %v11072_v31  ;;  %v11135_v31 = vld [vmem:[#allocation11 + $0x328] ss:$28 sps:$4 sm:$0xff]  }
 0x5d0   :  { %4045 = vmatpush1.bf16.msra.mxu0 %v11075_v7  ;;  %3882 = vmatprep.subr.bf16.mxu1 %v11080_v13  ;;  %v11132_v7 = vld [vmem:[#allocation11 + $0x160] ss:$28 sps:$4 sm:$0xff]   ;;  %v11136_v13 = vld [vmem:[#allocation11 + $0x168] ss:$28 sps:$4 sm:$0xff]  }
 0x5d1   :  { %4046 = vmatprep.subr.bf16.mxu0 %v11083_v15  ;;  %v11139_v15 = vld [vmem:[#allocation11 + $0x19c] ss:$28 sps:$4 sm:$0xff]  }
 0x5d3   :  { %3883 = vmatpush1.bf16.msra.mxu1 %v11078_v16  ;;  %v11140_v16 = vld [vmem:[#allocation11 + $0x360] ss:$28 sps:$4 sm:$0xff]  }
 0x5d4   :  { %4047 = vmatpush1.bf16.msra.mxu0 %v11081_v18  ;;  %3884 = vmatprep.subr.bf16.mxu1 %v11086_v19  ;;  %v11137_v18 = vld [vmem:[#allocation11 + $0x198] ss:$28 sps:$4 sm:$0xff]   ;;  %v11141_v19 = vld [vmem:[#allocation11 + $0x1a0] ss:$28 sps:$4 sm:$0xff]  }
 0x5d5   :  { %4048 = vmatprep.subr.bf16.mxu0 %v11089_v20  ;;  %v11144_v20 = vld [vmem:[#allocation11 + $0x1d4] ss:$28 sps:$4 sm:$0xff]  }
 0x5d7   :  { %3885 = vmatpush1.bf16.msra.mxu1 %v11084_v21  ;;  %v11145_v21 = vld [vmem:[#allocation11 + $0x558] ss:$28 sps:$4 sm:$0xff]  }
 0x5d8   :  { %4049 = vmatpush1.bf16.msra.mxu0 %v11087_v22  ;;  %3886 = vmatprep.subr.bf16.mxu1 %v11092_v23  ;;  %v11142_v22 = vld [vmem:[#allocation11 + $0x1d0] ss:$28 sps:$4 sm:$0xff]   ;;  %v11146_v23 = vld [vmem:[#allocation11 + $0x398] ss:$28 sps:$4 sm:$0xff]  }
 0x5d9   :  { %4050 = vmatprep.subr.bf16.mxu0 %v11095_v26  ;;  %v11150_v26 = vld [vmem:[#allocation11 + $0x590] ss:$28 sps:$4 sm:$0xff]  }
 0x5db   :  { %3887 = vmatpush1.bf16.msra.mxu1 %v11090_v27  ;;  %v11147_v27 = vld [vmem:[#allocation11 + $0x208] ss:$28 sps:$4 sm:$0xff]  }
 0x5dc   :  { %4051 = vmatpush1.bf16.msra.mxu0 %v11093_v36  ;;  %3888 = vmatprep.subr.bf16.mxu1 %v11098_v37  ;;  %v11154_v36 = vld [vmem:[#allocation11 + $0x244] ss:$28 sps:$4 sm:$0xff]  }
 0x5dd   :  { %4052 = vmatprep.subr.bf16.mxu0 %v11101_v30  ;;  %v11155_v37 = vld [vmem:[#allocation11 + $0x5c8] ss:$28 sps:$4 sm:$0xff]   ;;  %v11152_v30 = vld [vmem:[#allocation11 + $0x240] ss:$28 sps:$4 sm:$0xff]  }
 0x5df   :  { %3889 = vmatpush1.bf16.msra.mxu1 %v11096_v40  ;;  %v11159_v40 = vld [vmem:[#allocation11 + $0x27c] ss:$28 sps:$4 sm:$0xff]  }
 0x5e0   :  { %4053 = vmatpush1.bf16.msra.mxu0 %v11099_v33  ;;  %4063 = vmatprep.subr.bf16.mxu1 %v11104_v42  ;;  %v11157_v33 = vld [vmem:[#allocation11 + $0x278] ss:$28 sps:$4 sm:$0xff]   ;;  %v11161_v42 = vld [vmem:[#allocation11 + $0x440] ss:$28 sps:$4 sm:$0xff]  }
 0x5e1   :  { %10256 = vmatprep.subr.bf16.mxu0 %v11105_v43  ;;  %v11164_v43 = vld [vmem:[#allocation11 + $0x2b4] ss:$28 sps:$4 sm:$0xff]  }
 0x5e2   :  { %3891 = vmatmul.mubr.bf16.vlgmr.msra.gmra.mrb[8].mxu1 %v13173_v45 }
 0x5e3   :  { %4055 = vmatmul.mubr.bf16.vlgmr.msra.gmra.mrb[12].mxu0 %v13173_v45  ;;  %4064 = vmatpush1.bf16.msra.mxu1 %v11102_v44  ;;  %v11165_v44 = vld [vmem:[#allocation11 + $0x638] ss:$28 sps:$4 sm:$0xff]  }
 0x5e4   :  { %4095 = vmatprep.mubr.bf16.mxu1 %v13120_v51  ;;  %10257 = vmatpush3.bf16.msra.mxu0 %v11106_v46  ;;  %v11162_v46 = vld [vmem:[#allocation11 + $0x2b0] ss:$28 sps:$4 sm:$0xff]  }
 0x5e5   :  { %4259 = vmatprep.mubr.bf16.mxu0 %v13120_v51  ;;  %4065 = vmatprep.subr.bf16.mxu1 %v11109_v47  ;;  %v11122_v51 = vld [vmem:[#allocation11 + $0xf0] ss:$28 sps:$4 sm:$0xff]   ;;  %v11166_v47 = vld [vmem:[#allocation11 + $0x478] ss:$28 sps:$4 sm:$0xff]  }
 0x5e6   :  { %10258 = vmatprep.subr.bf16.mxu0 %v11110_v49  ;;  %v11169_v49 = vld [vmem:[#allocation11 + $0x2ec] ss:$28 sps:$4 sm:$0xff]  }
 0x5e7   :  { %4066 = vmatpush1.bf16.msra.mxu1 %v11107_v50  ;;  %v11170_v50 = vld [vmem:[#allocation11 + $0x670] ss:$28 sps:$4 sm:$0xff]  }
 0x5e8   :  { %10259 = vmatpush3.bf16.msra.mxu0 %v11111_v52  ;;  %4067 = vmatprep.subr.bf16.mxu1 %v11114_v53  ;;  %v11167_v52 = vld [vmem:[#allocation11 + $0x2e8] ss:$28 sps:$4 sm:$0xff]   ;;  %v11171_v53 = vld [vmem:[#allocation11 + $0x4b0] ss:$28 sps:$4 sm:$0xff]  }
 0x5e9   :  { %10260 = vmatprep.subr.bf16.mxu0 %v11115_v17  ;;  %v11174_v17 = vld [vmem:[#allocation11 + $0x324] ss:$28 sps:$4 sm:$0xff]  }
 0x5eb   :  { %4068 = vmatpush1.bf16.msra.mxu1 %v11112_v55  ;;  %v11175_v55 = vld [vmem:[#allocation11 + $0x6a8] ss:$28 sps:$4 sm:$0xff]  }
 0x5ec   :  { %10261 = vmatpush3.bf16.msra.mxu0 %v11116_v56  ;;  %4069 = vmatprep.subr.bf16.mxu1 %v11119_v32  ;;  %v11172_v56 = vld [vmem:[#allocation11 + $0x320] ss:$28 sps:$4 sm:$0xff]   ;;  %v11176_v32 = vld [vmem:[#allocation11 + $0x4e8] ss:$28 sps:$4 sm:$0xff]  }
 0x5ed   :  { %10262 = vmatprep.subr.bf16.mxu0 %v11120_v58  ;;  %v11179_v58 = vld [vmem:[#allocation11 + $0x35c] ss:$28 sps:$4 sm:$0xff]  }
 0x5ef   :  { %4070 = vmatpush1.bf16.msra.mxu1 %v11117_v59  ;;  %v11180_v59 = vld [vmem:[#allocation11 + $0x6e0] ss:$28 sps:$4 sm:$0xff]  }
 0x5f0   :  { %10263 = vmatpush3.bf16.msra.mxu0 %v11121_v60  ;;  %4071 = vmatprep.subr.bf16.mxu1 %v11124_v61  ;;  %v11177_v60 = vld [vmem:[#allocation11 + $0x358] ss:$28 sps:$4 sm:$0xff]   ;;  %v11181_v61 = vld [vmem:[#allocation11 + $0x520] ss:$28 sps:$4 sm:$0xff]  }
 0x5f1   :  { %10264 = vmatprep.subr.bf16.mxu0 %v11125_v62  ;;  %v11184_v62 = vld [vmem:[#allocation11 + $0x394] ss:$28 sps:$4 sm:$0xff]  }
 0x5f3   :  { %4072 = vmatpush1.bf16.msra.mxu1 %v11122_v51  ;;  %v11185_v51 = vld [vmem:[#allocation11 + $0x8d8] ss:$28 sps:$4 sm:$0xff]  }
 0x5f4   :  { %10265 = vmatpush3.bf16.msra.mxu0 %v11126_v63  ;;  %4073 = vmatprep.subr.bf16.mxu1 %v11129_v2  ;;  %v11182_v63 = vld [vmem:[#allocation11 + $0x390] ss:$28 sps:$4 sm:$0xff]   ;;  %v11186_v2 = vld [vmem:[#allocation11 + $0x718] ss:$28 sps:$4 sm:$0xff]  }
 0x5f5   :  { %10266 = vmatprep.subr.bf16.mxu0 %v11130_v10  ;;  %v11189_v10 = vld [vmem:[#allocation11 + $0x3cc] ss:$28 sps:$4 sm:$0xff]  }
 0x5f7   :  { %4074 = vmatpush1.bf16.msra.mxu1 %v11127_v3  ;;  %v11190_v3 = vld [vmem:[#allocation11 + $0x910] ss:$28 sps:$4 sm:$0xff]  }
 0x5f8   :  { %10267 = vmatpush3.bf16.msra.mxu0 %v11131_v4  ;;  %4075 = vmatprep.subr.bf16.mxu1 %v11134_v5  ;;  %v11187_v4 = vld [vmem:[#allocation11 + $0x3c8] ss:$28 sps:$4 sm:$0xff]   ;;  %v11191_v5 = vld [vmem:[#allocation11 + $0x750] ss:$28 sps:$4 sm:$0xff]  }
 0x5f9   :  { %10268 = vmatprep.subr.bf16.mxu0 %v11135_v31  ;;  %v11194_v31 = vld [vmem:[#allocation11 + $0x404] ss:$28 sps:$4 sm:$0xff]  }
 0x5fb   :  { %4076 = vmatpush1.bf16.msra.mxu1 %v11132_v7  ;;  %v11195_v7 = vld [vmem:[#allocation11 + $0x948] ss:$28 sps:$4 sm:$0xff]  }
 0x5fc   :  { %10269 = vmatpush3.bf16.msra.mxu0 %v11136_v13  ;;  %4077 = vmatprep.subr.bf16.mxu1 %v11139_v15  ;;  %v11192_v13 = vld [vmem:[#allocation11 + $0x400] ss:$28 sps:$4 sm:$0xff]  }
 0x5fd   :  { %10270 = vmatprep.subr.bf16.mxu0 %v11140_v16  ;;  %v11199_v15 = vld [vmem:[#allocation11 + $0x43c] ss:$28 sps:$4 sm:$0xff]  }
 0x5fe   :  { %v11200_v16 = vld [vmem:[#allocation11 + $0x980] ss:$28 sps:$4 sm:$0xff]  }
 0x5ff   :  { %4078 = vmatpush1.bf16.msra.mxu1 %v11137_v18  ;;  %v11197_v18 = vld [vmem:[#allocation11 + $0x438] ss:$28 sps:$4 sm:$0xff]  }
 0x600   :  { %10271 = vmatpush3.bf16.msra.mxu0 %v11141_v19  ;;  %4079 = vmatprep.subr.bf16.mxu1 %v11144_v20  ;;  %v11204_v19 = vld [vmem:[#allocation11 + $0x474] ss:$28 sps:$4 sm:$0xff]  }
 0x601   :  { %10278 = vmatprep.subr.bf16.mxu0 %v11145_v21  ;;  %v11205_v20 = vld [vmem:[#allocation11 + $0x9b8] ss:$28 sps:$4 sm:$0xff]   ;;  %v11202_v21 = vld [vmem:[#allocation11 + $0x470] ss:$28 sps:$4 sm:$0xff]  }
 0x603   :  { %4260 = vmatmul.mubr.bf16.vlgmr.msra.gmra.mrb[16].mxu0 %v13122_v54  ;;  %4080 = vmatpush1.bf16.msra.mxu1 %v11142_v22  ;;  %v11206_v22 = vld [vmem:[#allocation11 + $0x7f8] ss:$28 sps:$4 sm:$0xff]  }
 0x604   :  { %10279 = vmatpush3.bf16.msra.mxu0 %v11146_v23  ;;  %4299 = vmatprep.mubr.bf16.mxu0 %v13126_v57  ;;  %v11209_v23 = vld [vmem:[#allocation11 + $0x4ac] ss:$28 sps:$4 sm:$0xff]  }
 0x605   :  { %4081 = vmatprep.subr.bf16.mxu1 %v11149_v24  ;;  %10280 = vmatprep.subr.bf16.mxu0 %v11150_v26  ;;  %v11210_v24 = vld [vmem:[#allocation11 + $0x9f0] ss:$28 sps:$4 sm:$0xff]   ;;  %v11207_v26 = vld [vmem:[#allocation11 + $0x4a8] ss:$28 sps:$4 sm:$0xff]  }
 0x607   :  { %4082 = vmatpush1.bf16.msra.mxu1 %v11147_v27  ;;  %v11211_v27 = vld [vmem:[#allocation11 + $0x830] ss:$28 sps:$4 sm:$0xff]  }
 0x608   :  { %10281 = vmatpush3.bf16.msra.mxu0 %v11151_v34  ;;  %4083 = vmatprep.subr.bf16.mxu1 %v11154_v36  ;;  %v11214_v34 = vld [vmem:[#allocation11 + $0x4e4] ss:$28 sps:$4 sm:$0xff]  }
 0x609   :  { %10282 = vmatprep.subr.bf16.mxu0 %v11155_v37  ;;  %v11215_v36 = vld [vmem:[#allocation11 + $0xa28] ss:$28 sps:$4 sm:$0xff]   ;;  %v11212_v37 = vld [vmem:[#allocation11 + $0x4e0] ss:$28 sps:$4 sm:$0xff]  }
 0x60b   :  { %4084 = vmatpush1.bf16.msra.mxu1 %v11152_v30  ;;  %v11216_v30 = vld [vmem:[#allocation11 + $0x868] ss:$28 sps:$4 sm:$0xff]  }
 0x60c   :  { %10283 = vmatpush3.bf16.msra.mxu0 %v11156_v38  ;;  %4085 = vmatprep.subr.bf16.mxu1 %v11159_v40  ;;  %v11219_v38 = vld [vmem:[#allocation11 + $0x51c] ss:$28 sps:$4 sm:$0xff]  }
 0x60d   :  { %10284 = vmatprep.subr.bf16.mxu0 %v11160_v41  ;;  %v11220_v40 = vld [vmem:[#allocation11 + $0xa60] ss:$28 sps:$4 sm:$0xff]   ;;  %v11217_v41 = vld [vmem:[#allocation11 + $0x518] ss:$28 sps:$4 sm:$0xff]  }
 0x60f   :  { %4086 = vmatpush1.bf16.msra.mxu1 %v11157_v33  ;;  %v11221_v33 = vld [vmem:[#allocation11 + $0x8a0] ss:$28 sps:$4 sm:$0xff]  }
 0x610   :  { %10285 = vmatpush3.bf16.msra.mxu0 %v11161_v42  ;;  %4087 = vmatprep.subr.bf16.mxu1 %v11164_v43  ;;  %v11224_v42 = vld [vmem:[#allocation11 + $0x554] ss:$28 sps:$4 sm:$0xff]  }
 0x611   :  { %10286 = vmatprep.subr.bf16.mxu0 %v11165_v44  ;;  %v11225_v43 = vld [vmem:[#allocation11 + $0xc58] ss:$28 sps:$4 sm:$0xff]   ;;  %v11222_v44 = vld [vmem:[#allocation11 + $0x550] ss:$28 sps:$4 sm:$0xff]  }
 0x613   :  { %4088 = vmatpush1.bf16.msra.mxu1 %v11162_v46  ;;  %v11226_v46 = vld [vmem:[#allocation11 + $0xa98] ss:$28 sps:$4 sm:$0xff]  }
 0x614   :  { %10287 = vmatpush3.bf16.msra.mxu0 %v11166_v47  ;;  %4089 = vmatprep.subr.bf16.mxu1 %v11169_v49  ;;  %v11229_v47 = vld [vmem:[#allocation11 + $0x58c] ss:$28 sps:$4 sm:$0xff]  }
 0x615   :  { %10288 = vmatprep.subr.bf16.mxu0 %v11170_v50  ;;  %v11230_v49 = vld [vmem:[#allocation11 + $0xc90] ss:$28 sps:$4 sm:$0xff]   ;;  %v11227_v50 = vld [vmem:[#allocation11 + $0x588] ss:$28 sps:$4 sm:$0xff]  }
 0x617   :  { %4090 = vmatpush1.bf16.msra.mxu1 %v11167_v52  ;;  %v11231_v52 = vld [vmem:[#allocation11 + $0xad0] ss:$28 sps:$4 sm:$0xff]  }
 0x618   :  { %10289 = vmatpush3.bf16.msra.mxu0 %v11171_v53  ;;  %4091 = vmatprep.subr.bf16.mxu1 %v11174_v17  ;;  %v11234_v53 = vld [vmem:[#allocation11 + $0x5c4] ss:$28 sps:$4 sm:$0xff]  }
 0x619   :  { %10290 = vmatprep.subr.bf16.mxu0 %v11175_v55  ;;  %v11235_v17 = vld [vmem:[#allocation11 + $0xcc8] ss:$28 sps:$4 sm:$0xff]   ;;  %v11232_v55 = vld [vmem:[#allocation11 + $0x5c0] ss:$28 sps:$4 sm:$0xff]  }
 0x61b   :  { %4092 = vmatpush1.bf16.msra.mxu1 %v11172_v56  ;;  %v11236_v56 = vld [vmem:[#allocation11 + $0xb08] ss:$28 sps:$4 sm:$0xff]  }
 0x61c   :  { %10291 = vmatpush3.bf16.msra.mxu0 %v11176_v32  ;;  %4093 = vmatprep.subr.bf16.mxu1 %v11179_v58  ;;  %v11239_v32 = vld [vmem:[#allocation11 + $0x5fc] ss:$28 sps:$4 sm:$0xff]  }
 0x61d   :  { %10292 = vmatprep.subr.bf16.mxu0 %v11180_v59  ;;  %v11240_v58 = vld [vmem:[#allocation11 + $0xd00] ss:$28 sps:$4 sm:$0xff]   ;;  %v11237_v59 = vld [vmem:[#allocation11 + $0x5f8] ss:$28 sps:$4 sm:$0xff]  }
 0x61f   :  { %4094 = vmatpush1.bf16.msra.mxu1 %v11177_v60  ;;  %v11241_v60 = vld [vmem:[#allocation11 + $0xb40] ss:$28 sps:$4 sm:$0xff]  }
 0x620   :  { %10293 = vmatpush3.bf16.msra.mxu0 %v11181_v61  ;;  %4104 = vmatprep.subr.bf16.mxu1 %v11184_v62  ;;  %v11244_v61 = vld [vmem:[#allocation11 + $0x634] ss:$28 sps:$4 sm:$0xff]  }
 0x621   :  { %10300 = vmatprep.subr.bf16.mxu0 %v11185_v51  ;;  %v11245_v62 = vld [vmem:[#allocation11 + $0xd38] ss:$28 sps:$4 sm:$0xff]   ;;  %v11242_v51 = vld [vmem:[#allocation11 + $0x630] ss:$28 sps:$4 sm:$0xff]  }
 0x622   :  { %4096 = vmatmul.mubr.bf16.vlgmr.msra.gmra.mrb[12].mxu1 %v13122_v54  ;;  %v11196_v54 = vld [vmem:[#allocation11 + $0x788] ss:$28 sps:$4 sm:$0xff]  }
 0x623   :  { %4300 = vmatmul.mubr.bf16.vlgmr.msra.gmra.mrb[20].mxu0 %v13143_v29  ;;  %4105 = vmatpush1.bf16.msra.mxu1 %v11182_v63  ;;  %v11246_v63 = vld [vmem:[#allocation11 + $0xb78] ss:$28 sps:$4 sm:$0xff]  }
 0x624   :  { %4136 = vmatprep.mubr.bf16.mxu1 %v13126_v57  ;;  %10301 = vmatpush3.bf16.msra.mxu0 %v11186_v2  ;;  %v11201_v57 = vld [vmem:[#allocation11 + $0x7c0] ss:$28 sps:$4 sm:$0xff]   ;;  %v11249_v2 = vld [vmem:[#allocation11 + $0x66c] ss:$28 sps:$4 sm:$0xff]  }
 0x625   :  { %4339 = vmatprep.mubr.bf16.mxu0 %v13145_v35  ;;  %4106 = vmatprep.subr.bf16.mxu1 %v11189_v10  ;;  %v11250_v10 = vld [vmem:[#allocation11 + $0xd70] ss:$28 sps:$4 sm:$0xff]  }
 0x626   :  { %10302 = vmatprep.subr.bf16.mxu0 %v11190_v3  ;;  %v11247_v3 = vld [vmem:[#allocation11 + $0x668] ss:$28 sps:$4 sm:$0xff]  }
 0x627   :  { %4107 = vmatpush1.bf16.msra.mxu1 %v11187_v4  ;;  %v11251_v4 = vld [vmem:[#allocation11 + $0xbb0] ss:$28 sps:$4 sm:$0xff]  }
 0x628   :  { %10303 = vmatpush3.bf16.msra.mxu0 %v11191_v5  ;;  %4108 = vmatprep.subr.bf16.mxu1 %v11194_v31  ;;  %v11254_v5 = vld [vmem:[#allocation11 + $0x6a4] ss:$28 sps:$4 sm:$0xff]  }
 0x629   :  { %10304 = vmatprep.subr.bf16.mxu0 %v11195_v7  ;;  %v11255_v31 = vld [vmem:[#allocation11 + $0xda8] ss:$28 sps:$4 sm:$0xff]   ;;  %v11252_v7 = vld [vmem:[#allocation11 + $0x6a0] ss:$28 sps:$4 sm:$0xff]  }
 0x62b   :  { %4109 = vmatpush1.bf16.msra.mxu1 %v11192_v13  ;;  %v11256_v13 = vld [vmem:[#allocation11 + $0xbe8] ss:$28 sps:$4 sm:$0xff]  }
 0x62c   :  { %10305 = vmatpush3.bf16.msra.mxu0 %v11196_v54  ;;  %4110 = vmatprep.subr.bf16.mxu1 %v11199_v15  ;;  %v11259_v54 = vld [vmem:[#allocation11 + $0x6dc] ss:$28 sps:$4 sm:$0xff]  }
 0x62d   :  { %10306 = vmatprep.subr.bf16.mxu0 %v11200_v16  ;;  %v11260_v15 = vld [vmem:[#allocation11 + $0xde0] ss:$28 sps:$4 sm:$0xff]   ;;  %v11257_v16 = vld [vmem:[#allocation11 + $0x6d8] ss:$28 sps:$4 sm:$0xff]  }
 0x62f   :  { %4111 = vmatpush1.bf16.msra.mxu1 %v11197_v18  ;;  %v11261_v18 = vld [vmem:[#allocation11 + $0xc20] ss:$28 sps:$4 sm:$0xff]  }
 0x630   :  { %10307 = vmatpush3.bf16.msra.mxu0 %v11201_v57  ;;  %4112 = vmatprep.subr.bf16.mxu1 %v11204_v19  ;;  %v11264_v57 = vld [vmem:[#allocation11 + $0x714] ss:$28 sps:$4 sm:$0xff]   ;;  %v11297_v19 = vld [vmem:[#allocation14 + $0x4] ss:$20 sps:$4 sm:$0xff]  }
 0x631   :  { %10308 = vmatprep.subr.bf16.mxu0 %v11205_v20  ;;  %v11262_v20 = vld [vmem:[#allocation11 + $0x710] ss:$28 sps:$4 sm:$0xff]  }
 0x633   :  { %4113 = vmatpush1.bf16.msra.mxu1 %v11202_v21  ;;  %v11267_v21 = vld [vmem:[#allocation11 + $0x74c] ss:$28 sps:$4 sm:$0xff]  }
 0x634   :  { %10309 = vmatpush3.bf16.msra.mxu0 %v11206_v22  ;;  %4114 = vmatprep.subr.bf16.mxu1 %v11209_v23  ;;  %v11295_v22 = vld [vmem:[#allocation14] ss:$20 sps:$4 sm:$0xff]  }
 0x635   :  { %10310 = vmatprep.subr.bf16.mxu0 %v11210_v24  ;;  %v11303_v23 = vld [vmem:[#allocation14 + $0x2c] ss:$20 sps:$4 sm:$0xff]  }
 0x636   :  { %v11265_v24 = vld [vmem:[#allocation11 + $0x748] ss:$28 sps:$4 sm:$0xff]  }
 0x637   :  { %4115 = vmatpush1.bf16.msra.mxu1 %v11207_v26  ;;  %v11270_v26 = vld [vmem:[#allocation11 + $0x784] ss:$28 sps:$4 sm:$0xff]  }
 0x638   :  { %10311 = vmatpush3.bf16.msra.mxu0 %v11211_v27  ;;  %4116 = vmatprep.subr.bf16.mxu1 %v11214_v34  ;;  %v11301_v27 = vld [vmem:[#allocation14 + $0x28] ss:$20 sps:$4 sm:$0xff]  }
 0x639   :  { %10312 = vmatprep.subr.bf16.mxu0 %v11215_v36  ;;  %v11309_v34 = vld [vmem:[#allocation14 + $0x54] ss:$20 sps:$4 sm:$0xff]  }
 0x63a   :  { %v11268_v36 = vld [vmem:[#allocation11 + $0x780] ss:$28 sps:$4 sm:$0xff]  }
 0x63b   :  { %4117 = vmatpush1.bf16.msra.mxu1 %v11212_v37  ;;  %v11273_v37 = vld [vmem:[#allocation11 + $0x7bc] ss:$28 sps:$4 sm:$0xff]  }
 0x63c   :  { %10313 = vmatpush3.bf16.msra.mxu0 %v11216_v30  ;;  %4118 = vmatprep.subr.bf16.mxu1 %v11219_v38  ;;  %v11307_v30 = vld [vmem:[#allocation14 + $0x50] ss:$20 sps:$4 sm:$0xff]  }
 0x63d   :  { %10314 = vmatprep.subr.bf16.mxu0 %v11220_v40  ;;  %v11271_v38 = vld [vmem:[#allocation11 + $0x7b8] ss:$28 sps:$4 sm:$0xff]  }
 0x63e   :  { %v11276_v40 = vld [vmem:[#allocation11 + $0x7f4] ss:$28 sps:$4 sm:$0xff]  }
 0x63f   :  { %4119 = vmatpush1.bf16.msra.mxu1 %v11217_v41  ;;  %v11321_v41 = vld [vmem:[#allocation14 + $0xa4] ss:$20 sps:$4 sm:$0xff]  }
 0x640   :  { %10315 = vmatpush3.bf16.msra.mxu0 %v11221_v33  ;;  %4120 = vmatprep.subr.bf16.mxu1 %v11224_v42  ;;  %v11274_v33 = vld [vmem:[#allocation11 + $0x7f0] ss:$28 sps:$4 sm:$0xff]  }
 0x641   :  { %10322 = vmatprep.subr.bf16.mxu0 %v11225_v43  ;;  %v11279_v42 = vld [vmem:[#allocation11 + $0x82c] ss:$28 sps:$4 sm:$0xff]  }
 0x642   :  { %v11319_v43 = vld [vmem:[#allocation14 + $0xa0] ss:$20 sps:$4 sm:$0xff]  }
 0x643   :  { %4340 = vmatmul.mubr.bf16.vlgmr.msra.gmra.mrb[24].mxu0 %v13160_v6  ;;  %4121 = vmatpush1.bf16.msra.mxu1 %v11222_v44  ;;  %v11327_v44 = vld [vmem:[#allocation14 + $0xcc] ss:$20 sps:$4 sm:$0xff]  }
 0x644   :  { %10323 = vmatpush3.bf16.msra.mxu0 %v11226_v46  ;;  %4379 = vmatprep.mubr.bf16.mxu0 %v13162_v14  ;;  %v11277_v46 = vld [vmem:[#allocation11 + $0x828] ss:$28 sps:$4 sm:$0xff]  }
 0x645   :  { %4122 = vmatprep.subr.bf16.mxu1 %v11229_v47  ;;  %10324 = vmatprep.subr.bf16.mxu0 %v11230_v49  ;;  %v11282_v47 = vld [vmem:[#allocation11 + $0x864] ss:$28 sps:$4 sm:$0xff]  }
 0x646   :  { %v11325_v49 = vld [vmem:[#allocation14 + $0xc8] ss:$20 sps:$4 sm:$0xff]  }
 0x647   :  { %4123 = vmatpush1.bf16.msra.mxu1 %v11227_v50  ;;  %v11333_v50 = vld [vmem:[#allocation14 + $0xf4] ss:$20 sps:$4 sm:$0xff]  }
 0x648   :  { %10325 = vmatpush3.bf16.msra.mxu0 %v11231_v52  ;;  %4124 = vmatprep.subr.bf16.mxu1 %v11234_v53  ;;  %v11280_v52 = vld [vmem:[#allocation11 + $0x860] ss:$28 sps:$4 sm:$0xff]  }
 0x649   :  { %10326 = vmatprep.subr.bf16.mxu0 %v11235_v17  ;;  %v11285_v53 = vld [vmem:[#allocation11 + $0x89c] ss:$28 sps:$4 sm:$0xff]  }
 0x64a   :  { %v11331_v17 = vld [vmem:[#allocation14 + $0xf0] ss:$20 sps:$4 sm:$0xff]  }
 0x64b   :  { %4125 = vmatpush1.bf16.msra.mxu1 %v11232_v55  ;;  %v11339_v55 = vld [vmem:[#allocation14 + $0x11c] ss:$20 sps:$4 sm:$0xff]  }
 0x64c   :  { %10327 = vmatpush3.bf16.msra.mxu0 %v11236_v56  ;;  %4126 = vmatprep.subr.bf16.mxu1 %v11239_v32  ;;  %v11283_v56 = vld [vmem:[#allocation11 + $0x898] ss:$28 sps:$4 sm:$0xff]  }
 0x64d   :  { %10328 = vmatprep.subr.bf16.mxu0 %v11240_v58  ;;  %v11288_v32 = vld [vmem:[#allocation11 + $0x8d4] ss:$28 sps:$4 sm:$0xff]  }
 0x64e   :  { %v11337_v58 = vld [vmem:[#allocation14 + $0x118] ss:$20 sps:$4 sm:$0xff]  }
 0x64f   :  { %4127 = vmatpush1.bf16.msra.mxu1 %v11237_v59  ;;  %v11345_v59 = vld [vmem:[#allocation14 + $0x144] ss:$20 sps:$4 sm:$0xff]  }
 0x650   :  { %10329 = vmatpush3.bf16.msra.mxu0 %v11241_v60  ;;  %4128 = vmatprep.subr.bf16.mxu1 %v11244_v61  ;;  %v11286_v60 = vld [vmem:[#allocation11 + $0x8d0] ss:$28 sps:$4 sm:$0xff]  }
 0x651   :  { %10330 = vmatprep.subr.bf16.mxu0 %v11245_v62  ;;  %v11291_v61 = vld [vmem:[#allocation11 + $0x90c] ss:$28 sps:$4 sm:$0xff]  }
 0x652   :  { %v11343_v62 = vld [vmem:[#allocation14 + $0x140] ss:$20 sps:$4 sm:$0xff]  }
 0x653   :  { %4129 = vmatpush1.bf16.msra.mxu1 %v11242_v51  ;;  %v11351_v51 = vld [vmem:[#allocation14 + $0x16c] ss:$20 sps:$4 sm:$0xff]  }
 0x654   :  { %10331 = vmatpush3.bf16.msra.mxu0 %v11246_v63  ;;  %4130 = vmatprep.subr.bf16.mxu1 %v11249_v2  ;;  %v11289_v63 = vld [vmem:[#allocation11 + $0x908] ss:$28 sps:$4 sm:$0xff]  }
 0x655   :  { %10332 = vmatprep.subr.bf16.mxu0 %v11250_v10  ;;  %v11294_v2 = vld [vmem:[#allocation11 + $0x944] ss:$28 sps:$4 sm:$0xff]  }
 0x656   :  { %v11349_v10 = vld [vmem:[#allocation14 + $0x168] ss:$20 sps:$4 sm:$0xff]  }
 0x657   :  { %4131 = vmatpush1.bf16.msra.mxu1 %v11247_v3  ;;  %v11357_v3 = vld [vmem:[#allocation14 + $0x194] ss:$20 sps:$4 sm:$0xff]  }
 0x658   :  { %10333 = vmatpush3.bf16.msra.mxu0 %v11251_v4  ;;  %4132 = vmatprep.subr.bf16.mxu1 %v11254_v5  ;;  %v11292_v4 = vld [vmem:[#allocation11 + $0x940] ss:$28 sps:$4 sm:$0xff]  }
 0x659   :  { %10334 = vmatprep.subr.bf16.mxu0 %v11255_v31  ;;  %v11300_v5 = vld [vmem:[#allocation11 + $0x97c] ss:$28 sps:$4 sm:$0xff]  }
 0x65a   :  { %v11355_v31 = vld [vmem:[#allocation14 + $0x190] ss:$20 sps:$4 sm:$0xff]  }
 0x65b   :  { %4133 = vmatpush1.bf16.msra.mxu1 %v11252_v7  ;;  %v11363_v7 = vld [vmem:[#allocation14 + $0x1bc] ss:$20 sps:$4 sm:$0xff]  }
 0x65c   :  { %10335 = vmatpush3.bf16.msra.mxu0 %v11256_v13  ;;  %4134 = vmatprep.subr.bf16.mxu1 %v11259_v54  ;;  %v11298_v13 = vld [vmem:[#allocation11 + $0x978] ss:$28 sps:$4 sm:$0xff]  }
 0x65d   :  { %10336 = vmatprep.subr.bf16.mxu0 %v11260_v15  ;;  %v11306_v54 = vld [vmem:[#allocation11 + $0x9b4] ss:$28 sps:$4 sm:$0xff]  }
 0x65e   :  { %v11361_v15 = vld [vmem:[#allocation14 + $0x1b8] ss:$20 sps:$4 sm:$0xff]  }
 0x65f   :  { %4135 = vmatpush1.bf16.msra.mxu1 %v11257_v16  ;;  %v11369_v16 = vld [vmem:[#allocation14 + $0x1e4] ss:$20 sps:$4 sm:$0xff]  }
 0x660   :  { %10337 = vmatpush3.bf16.msra.mxu0 %v11261_v18  ;;  %4145 = vmatprep.subr.bf16.mxu1 %v11264_v57  ;;  %v11304_v18 = vld [vmem:[#allocation11 + $0x9b0] ss:$28 sps:$4 sm:$0xff]  }
 0x661   :  { %6248 = vmatprep.subr.bf16.mxu0 %v11297_v19  ;;  %v11312_v57 = vld [vmem:[#allocation11 + $0x9ec] ss:$28 sps:$4 sm:$0xff]  }
 0x662   :  { %4137 = vmatmul.mubr.bf16.vlgmr.msra.gmra.mrb[12].mxu1 %v13143_v29  ;;  %v11315_v29 = vld [vmem:[#allocation14 + $0x7c] ss:$20 sps:$4 sm:$0xff]   ;;  %v11367_v19 = vld [vmem:[#allocation14 + $0x1e0] ss:$20 sps:$4 sm:$0xff]  }
 0x663   :  { %4380 = vmatmul.mubr.bf16.vlgmr.msra.gmra.mrb[28].mxu0 %v13173_v45  ;;  %4146 = vmatpush1.bf16.msra.mxu1 %v11262_v20  ;;  %v11375_v20 = vld [vmem:[#allocation14 + $0x20c] ss:$20 sps:$4 sm:$0xff]  }
 0x664   :  { %4177 = vmatprep.mubr.bf16.mxu1 %v13145_v35  ;;  %4147 = vmatprep.subr.bf16.mxu1 %v11267_v21  ;;  %v11313_v35 = vld [vmem:[#allocation14 + $0x78] ss:$20 sps:$4 sm:$0xff]   ;;  %v11310_v21 = vld [vmem:[#allocation11 + $0x9e8] ss:$28 sps:$4 sm:$0xff]  }
 0x665   :  { %6249 = vmatpush1.bf16.msra.mxu0 %v11295_v22  ;;  %v11318_v22 = vld [vmem:[#allocation11 + $0xa24] ss:$28 sps:$4 sm:$0xff]  }
 0x666   :  { %6250 = vmatprep.subr.bf16.mxu0 %v11303_v23  ;;  %v11373_v23 = vld [vmem:[#allocation14 + $0x208] ss:$20 sps:$4 sm:$0xff]  }
 0x667   :  { %4148 = vmatpush1.bf16.msra.mxu1 %v11265_v24  ;;  %v11381_v24 = vld [vmem:[#allocation14 + $0x234] ss:$20 sps:$4 sm:$0xff]  }
 0x668   :  { %4149 = vmatprep.subr.bf16.mxu1 %v11270_v26  ;;  %v11316_v26 = vld [vmem:[#allocation11 + $0xa20] ss:$28 sps:$4 sm:$0xff]  }
 0x669   :  { %6251 = vmatpush1.bf16.msra.mxu0 %v11301_v27  ;;  %v11324_v27 = vld [vmem:[#allocation11 + $0xa5c] ss:$28 sps:$4 sm:$0xff]  }
 0x66a   :  { %6252 = vmatprep.subr.bf16.mxu0 %v11309_v34  ;;  %v11379_v34 = vld [vmem:[#allocation14 + $0x230] ss:$20 sps:$4 sm:$0xff]  }
 0x66b   :  { %4150 = vmatpush1.bf16.msra.mxu1 %v11268_v36  ;;  %v11387_v36 = vld [vmem:[#allocation14 + $0x25c] ss:$20 sps:$4 sm:$0xff]  }
 0x66c   :  { %4151 = vmatprep.subr.bf16.mxu1 %v11273_v37  ;;  %v11322_v37 = vld [vmem:[#allocation11 + $0xa58] ss:$28 sps:$4 sm:$0xff]  }
 0x66d   :  { %6253 = vmatpush1.bf16.msra.mxu0 %v11307_v30  ;;  %v11330_v30 = vld [vmem:[#allocation11 + $0xa94] ss:$28 sps:$4 sm:$0xff]  }
 0x66e   :  { %6254 = vmatprep.subr.bf16.mxu0 %v11315_v29  ;;  %v11385_v29 = vld [vmem:[#allocation14 + $0x258] ss:$20 sps:$4 sm:$0xff]  }
 0x66f   :  { %4152 = vmatpush1.bf16.msra.mxu1 %v11271_v38  ;;  %v11393_v38 = vld [vmem:[#allocation14 + $0x284] ss:$20 sps:$4 sm:$0xff]  }
 0x670   :  { %4153 = vmatprep.subr.bf16.mxu1 %v11276_v40  ;;  %v11328_v40 = vld [vmem:[#allocation11 + $0xa90] ss:$28 sps:$4 sm:$0xff]  }
 0x671   :  { %6255 = vmatpush1.bf16.msra.mxu0 %v11313_v35  ;;  %v11336_v35 = vld [vmem:[#allocation11 + $0xacc] ss:$28 sps:$4 sm:$0xff]  }
 0x672   :  { %6256 = vmatprep.subr.bf16.mxu0 %v11321_v41  ;;  %v11334_v41 = vld [vmem:[#allocation11 + $0xac8] ss:$28 sps:$4 sm:$0xff]  }
 0x673   :  { %4154 = vmatpush1.bf16.msra.mxu1 %v11274_v33  ;;  %v11342_v33 = vld [vmem:[#allocation11 + $0xb04] ss:$28 sps:$4 sm:$0xff]  }
 0x674   :  { %4155 = vmatprep.subr.bf16.mxu1 %v11279_v42  ;;  %v11340_v42 = vld [vmem:[#allocation11 + $0xb00] ss:$28 sps:$4 sm:$0xff]  }
 0x675   :  { %6257 = vmatpush1.bf16.msra.mxu0 %v11319_v43  ;;  %v11348_v43 = vld [vmem:[#allocation11 + $0xb3c] ss:$28 sps:$4 sm:$0xff]  }
 0x676   :  { %6258 = vmatprep.subr.bf16.mxu0 %v11327_v44  ;;  %v11346_v44 = vld [vmem:[#allocation11 + $0xb38] ss:$28 sps:$4 sm:$0xff]  }
 0x677   :  { %4156 = vmatpush1.bf16.msra.mxu1 %v11277_v46  ;;  %v11354_v46 = vld [vmem:[#allocation11 + $0xb74] ss:$28 sps:$4 sm:$0xff]  }
 0x678   :  { %4157 = vmatprep.subr.bf16.mxu1 %v11282_v47  ;;  %v11352_v47 = vld [vmem:[#allocation11 + $0xb70] ss:$28 sps:$4 sm:$0xff]  }
 0x679   :  { %6259 = vmatpush1.bf16.msra.mxu0 %v11325_v49  ;;  %v13192_v49 = vld [vmem:[#allocation13] sm:$0xff] }
 0x67a   :  { %6260 = vmatprep.subr.bf16.mxu0 %v11333_v50  ;;  %v1403_v50 = vrot.slane %v13192_v49, %v13099_v11 }
 0x67b   :  { %4158 = vmatpush1.bf16.msra.mxu1 %v11280_v52  ;;  %v11358_v52 = vld [vmem:[#allocation11 + $0xba8] ss:$28 sps:$4 sm:$0xff]  }
 0x67c   :  { %4159 = vmatprep.subr.bf16.mxu1 %v11285_v53  ;;  %v1411_v53 = vrot.slane %v13192_v49, %v13102_v12 }
 0x67d   :  { %6261 = vmatpush1.bf16.msra.mxu0 %v11331_v17  ;;  %v11366_v17 = vld [vmem:[#allocation11 + $0xbe4] ss:$28 sps:$4 sm:$0xff]  }
 0x67e   :  { %6262 = vmatprep.subr.bf16.mxu0 %v11339_v55 }
 0x67f   :  { %4160 = vmatpush1.bf16.msra.mxu1 %v11283_v56 }
 0x680   :  { %4161 = vmatprep.subr.bf16.mxu1 %v11288_v32 }
 0x681   :  { %6263 = vmatpush1.bf16.msra.mxu0 %v11337_v58 }
 0x682   :  { %6264 = vmatprep.subr.bf16.mxu0 %v11345_v59 }
 0x683   :  { %4162 = vmatpush1.bf16.msra.mxu1 %v11286_v60 }
 0x684   :  { %4163 = vmatprep.subr.bf16.mxu1 %v11291_v61 }
 0x685   :  { %6265 = vmatpush1.bf16.msra.mxu0 %v11343_v62  ;;  %v11364_v62 = vld [vmem:[#allocation11 + $0xbe0] ss:$28 sps:$4 sm:$0xff]  }
 0x686   :  { %6266 = vmatprep.subr.bf16.mxu0 %v11351_v51 }
 0x687   :  { %4164 = vmatpush1.bf16.msra.mxu1 %v11289_v63 }
 0x688   :  { %4165 = vmatprep.subr.bf16.mxu1 %v11294_v2 }
 0x689   :  { %6267 = vmatpush1.bf16.msra.mxu0 %v11349_v10 }
 0x68a   :  { %6268 = vmatprep.subr.bf16.mxu0 %v11357_v3  ;;  %v11372_v3 = vld [vmem:[#allocation11 + $0xc1c] ss:$28 sps:$4 sm:$0xff]  }
 0x68b   :  { %4166 = vmatpush1.bf16.msra.mxu1 %v11292_v4 }
 0x68c   :  { %4167 = vmatprep.subr.bf16.mxu1 %v11300_v5 }
 0x68d   :  { %6269 = vmatpush1.bf16.msra.mxu0 %v11355_v31 }
 0x68e   :  { %6270 = vmatprep.subr.bf16.mxu0 %v11363_v7  ;;  %v11370_v7 = vld [vmem:[#allocation11 + $0xc18] ss:$28 sps:$4 sm:$0xff]  }
 0x68f   :  { %4168 = vmatpush1.bf16.msra.mxu1 %v11298_v13  ;;  %v11378_v13 = vld [vmem:[#allocation11 + $0xc54] ss:$28 sps:$4 sm:$0xff]  }
 0x690   :  { %4169 = vmatprep.subr.bf16.mxu1 %v11306_v54  ;;  %v11376_v54 = vld [vmem:[#allocation11 + $0xc50] ss:$28 sps:$4 sm:$0xff]  }
 0x691   :  { %6271 = vmatpush1.bf16.msra.mxu0 %v11361_v15  ;;  %v11384_v15 = vld [vmem:[#allocation11 + $0xc8c] ss:$28 sps:$4 sm:$0xff]  }
 0x692   :  { %6272 = vmatprep.subr.bf16.mxu0 %v11369_v16  ;;  %v11382_v16 = vld [vmem:[#allocation11 + $0xc88] ss:$28 sps:$4 sm:$0xff]  }
 0x693   :  { %4170 = vmatpush1.bf16.msra.mxu1 %v11304_v18 }
 0x694   :  { %4171 = vmatprep.subr.bf16.mxu1 %v11312_v57  ;;  %v11390_v57 = vld [vmem:[#allocation11 + $0xcc4] ss:$28 sps:$4 sm:$0xff]  }
 0x695   :  { %6273 = vmatpush1.bf16.msra.mxu0 %v11367_v19 }
 0x696   :  { %6274 = vmatprep.subr.bf16.mxu0 %v11375_v20 }
 0x697   :  { %4172 = vmatpush1.bf16.msra.mxu1 %v11310_v21 }
 0x698   :  { %4173 = vmatprep.subr.bf16.mxu1 %v11318_v22 }
 0x699   :  { %6275 = vmatpush1.bf16.msra.mxu0 %v11373_v23 }
 0x69a   :  { %6276 = vmatprep.subr.bf16.mxu0 %v11381_v24 }
 0x69b   :  { %4174 = vmatpush1.bf16.msra.mxu1 %v11316_v26  ;;  %v11388_v26 = vld [vmem:[#allocation11 + $0xcc0] ss:$28 sps:$4 sm:$0xff]  }
 0x69c   :  { %4175 = vmatprep.subr.bf16.mxu1 %v11324_v27 }
 0x69d   :  { %6277 = vmatpush1.bf16.msra.mxu0 %v11379_v34 }
 0x69e   :  { %6278 = vmatprep.subr.bf16.mxu0 %v11387_v36 }
 0x69f   :  { %4176 = vmatpush1.bf16.msra.mxu1 %v11322_v37  ;;  %v11396_v37 = vld [vmem:[#allocation11 + $0xcfc] ss:$28 sps:$4 sm:$0xff]  }
 0x6a0   :  { %4186 = vmatprep.subr.bf16.mxu1 %v11330_v30 }
 0x6a1   :  { %6279 = vmatpush1.bf16.msra.mxu0 %v11385_v29 }
 0x6a2   :  { %4178 = vmatmul.mubr.bf16.vlgmr.msra.gmra.mrb[12].mxu1 %v13160_v6  ;;  %6289 = vmatprep.subr.bf16.mxu0 %v11393_v38  ;;  %v11360_v6 = vld [vmem:[#allocation11 + $0xbac] ss:$28 sps:$4 sm:$0xff]  }
 0x6a3   :  { %4187 = vmatpush1.bf16.msra.mxu1 %v11328_v40  ;;  %4218 = vmatprep.mubr.bf16.mxu1 %v13162_v14  ;;  %v1399_v14 = vrot.slane %v13192_v49, %v13094_v9  ;;  %v11391_v40 = vld [vmem:[#allocation14 + $0x280] ss:$20 sps:$4 sm:$0xff]  }
 0x6a4   :  { %4188 = vmatprep.subr.bf16.mxu1 %v11336_v35 }
 0x6a7   :  { %4189 = vmatpush1.bf16.msra.mxu1 %v11334_v41  ;;  %v11394_v41 = vld [vmem:[#allocation11 + $0xcf8] ss:$28 sps:$4 sm:$0xff]  }
 0x6a8   :  { %4190 = vmatprep.subr.bf16.mxu1 %v11342_v33  ;;  %v11399_v33 = vld [vmem:[#allocation14 + $0x2ac] ss:$20 sps:$4 sm:$0xff]  }
 0x6ab   :  { %4191 = vmatpush1.bf16.msra.mxu1 %v11340_v42 }
 0x6ac   :  { %4192 = vmatprep.subr.bf16.mxu1 %v11348_v43  ;;  %v11402_v43 = vld [vmem:[#allocation11 + $0xd34] ss:$28 sps:$4 sm:$0xff]  }
 0x6af   :  { %4193 = vmatpush1.bf16.msra.mxu1 %v11346_v44  ;;  %v11397_v44 = vld [vmem:[#allocation14 + $0x2a8] ss:$20 sps:$4 sm:$0xff]  }
 0x6b0   :  { %4194 = vmatprep.subr.bf16.mxu1 %v11354_v46  ;;  %v11400_v46 = vld [vmem:[#allocation11 + $0xd30] ss:$28 sps:$4 sm:$0xff]  }
 0x6b3   :  { %4195 = vmatpush1.bf16.msra.mxu1 %v11352_v47  ;;  %v11405_v47 = vld [vmem:[#allocation14 + $0x2d4] ss:$20 sps:$4 sm:$0xff]  }
 0x6b4   :  { %4196 = vmatprep.subr.bf16.mxu1 %v11360_v6  ;;  %v11408_v6 = vld [vmem:[#allocation11 + $0xd6c] ss:$28 sps:$4 sm:$0xff]  }
 0x6b5   :  { %v3892_v55 = vpop.f32.mrb[8].mxu1 }
 0x6b6   :  { %v10550_v56 = vadd.f32 %v3892_v55, %v1399_v14  ;;  %v13200_v32 = vpop.f32.mrb[12].mxu0  ;;  %v3894_v58 = vpop.f32.mrb[9].mxu1  ;;  %v11403_v14 = vld [vmem:[#allocation14 + $0x2d0] ss:$20 sps:$4 sm:$0xff]  }
 0x6b7   :  { %v10551_v59 = vadd.f32 %v3894_v58, %v1403_v50  ;;  %v4058_v60 = vpop.f32.mrb[13].mxu0  ;;  %v3896_v61 = vpop.f32.mrb[10].mxu1  ;;  %4197 = vmatpush1.bf16.msra.mxu1 %v11358_v52  ;;  %v11406_v50 = vld [vmem:[#allocation11 + $0xd68] ss:$28 sps:$4 sm:$0xff]  }
 0x6b8   :  { %v4394_v51 = vmul.f32 0.70710677, %v10550_v56  ;;  %v10553_v63 = vadd.f32 %v4058_v60, %v1411_v53  ;;  %v4060_v2 = vpop.f32.mrb[14].mxu0  ;;  %v3897_v10 = vpop.f32.mrb[11].mxu1  ;;  %4198 = vmatprep.subr.bf16.mxu1 %v11366_v17  ;;  %v4387_v21 = vmul.f32 0.5, %v10550_v56 }
 0x6b9   :  { %v4395_v4 = vmul.f32 0.70710677, %v10551_v59  ;;  %v4061_v31 = vpop.f32.mrb[15].mxu0  ;;  %v4388_v23 = vmul.f32 0.5, %v10551_v59  ;;  %v11411_v52 = vld [vmem:[#allocation14 + $0x2fc] ss:$20 sps:$4 sm:$0xff]  }
 0x6ba   :  { %12137 = verf.f32 %v4394_v51  ;;  %v4397_v5 = vmul.f32 0.70710677, %v10553_v63  ;;  %v4390_v34 = vmul.f32 0.5, %v10553_v63  ;;  %v11414_v53 = vld [vmem:[#allocation11 + $0xda4] ss:$28 sps:$4 sm:$0xff]  }
 0x6bb   :  { %4199 = vmatpush1.bf16.msra.mxu1 %v11364_v62  ;;  %12139 = verf.f32 %v4395_v4  ;;  %v11409_v56 = vld [vmem:[#allocation14 + $0x2f8] ss:$20 sps:$4 sm:$0xff]   ;;  %v11420_v51 = vld [vmem:[#allocation11 + $0xddc] ss:$28 sps:$4 sm:$0xff]   ;;  %v11421_v4 = vld [vmem:[#allocation14 + $0x348] ss:$20 sps:$4 sm:$0xff]  }
 0x6bc   :  { %4200 = vmatprep.subr.bf16.mxu1 %v11372_v3  ;;  %12141 = verf.f32 %v4397_v5  ;;  %v11412_v60 = vld [vmem:[#allocation11 + $0xda0] ss:$28 sps:$4 sm:$0xff]   ;;  %v11418_v2 = vld [vmem:[#allocation11 + $0xdd8] ss:$28 sps:$4 sm:$0xff]   ;;  %v11424_v5 = vld [vmem:[#allocation14 + $0x8] ss:$20 sps:$4 sm:$0xff]  }
 0x6bd   :  { %v11417_v61 = vld [vmem:[#allocation14 + $0x324] ss:$20 sps:$4 sm:$0xff]   ;;  %v11415_v63 = vld [vmem:[#allocation14 + $0x320] ss:$20 sps:$4 sm:$0xff]  }
 0x6be   :  { %v11423_v10 = vld [vmem:[#allocation14 + $0x34c] ss:$20 sps:$4 sm:$0xff]   ;;  %v11429_v31 = vld [vmem:[#allocation14 + $0x374] ss:$20 sps:$4 sm:$0xff]  }
 0x6bf   :  { %4201 = vmatpush1.bf16.msra.mxu1 %v11370_v7  ;;  %v11426_v3 = vld [vmem:[#allocation14 + $0xc] ss:$20 sps:$4 sm:$0xff]   ;;  %v11432_v7 = vld [vmem:[#allocation14 + $0x34] ss:$20 sps:$4 sm:$0xff]  }
 0x6c0   :  { %4202 = vmatprep.subr.bf16.mxu1 %v11378_v13  ;;  %v11427_v13 = vld [vmem:[#allocation14 + $0x370] ss:$20 sps:$4 sm:$0xff]  }
 0x6c3   :  { %4203 = vmatpush1.bf16.msra.mxu1 %v11376_v54  ;;  %v11430_v54 = vld [vmem:[#allocation14 + $0x30] ss:$20 sps:$4 sm:$0xff]  }
 0x6c4   :  { %v12138_v18 = vpop.eup %12137  ;;  %4204 = vmatprep.subr.bf16.mxu1 %v11384_v15  ;;  %v11435_v15 = vld [vmem:[#allocation14 + $0x39c] ss:$20 sps:$4 sm:$0xff]  }
 0x6c5   :  { %v4408_v19 = vadd.f32 1.0, %v12138_v18  ;;  %v12140_v20 = vpop.eup %12139  ;;  %v11433_v18 = vld [vmem:[#allocation14 + $0x398] ss:$20 sps:$4 sm:$0xff]  }
 0x6c6   :  { %v12142_v22 = vpop.eup %12141  ;;  %v4409_v24 = vadd.f32 1.0, %v12140_v20  ;;  %v11444_v20 = vld [vmem:[#allocation14 + $0x84] ss:$20 sps:$4 sm:$0xff]  }
 0x6c7   :  { %4205 = vmatpush1.bf16.msra.mxu1 %v11382_v16  ;;  %v4415_v27 = vmul.f32 %v4408_v19, %v4387_v21  ;;  %v4411_v36 = vadd.f32 1.0, %v12142_v22  ;;  %v11438_v16 = vld [vmem:[#allocation14 + $0x5c] ss:$20 sps:$4 sm:$0xff]   ;;  %v11441_v19 = vld [vmem:[#allocation14 + $0x3c4] ss:$20 sps:$4 sm:$0xff]  }
 0x6c8   :  { %4206 = vmatprep.subr.bf16.mxu1 %v11390_v57  ;;  %v4416_v30 = vmul.f32 %v4409_v24, %v4388_v23  ;;  %v11436_v57 = vld [vmem:[#allocation14 + $0x58] ss:$20 sps:$4 sm:$0xff]   ;;  %v11439_v21 = vld [vmem:[#allocation14 + $0x3c0] ss:$20 sps:$4 sm:$0xff]  }
 0x6c9   :  { %v4418_v29 = vmul.f32 %v4411_v36, %v4390_v34  ;;  %v13204_v35 = vpack.c.bf16 %v4415_v27, %v4415_v27  ;;  %v11442_v22 = vld [vmem:[#allocation14 + $0x80] ss:$20 sps:$4 sm:$0xff]   ;;  %v11445_v27 = vld [vmem:[#allocation14 + $0x3e8] ss:$20 sps:$4 sm:$0xff]  }
 0x6ca   :  { %v13202_v38 = vpack.c.bf16 %v4416_v30, %v4416_v30  ;;  %v11447_v23 = vld [vmem:[#allocation14 + $0x3ec] ss:$20 sps:$4 sm:$0xff]   ;;  %v11448_v34 = vld [vmem:[#allocation14 + $0xa8] ss:$20 sps:$4 sm:$0xff]  }
 0x6cb   :  { %4207 = vmatpush1.bf16.msra.mxu1 %v11388_v26  ;;  %v13207_v42 = vpack.c.bf16 %v4418_v29, %v4418_v29  ;;  %v11450_v24 = vld [vmem:[#allocation14 + $0xac] ss:$20 sps:$4 sm:$0xff]   ;;  %v11453_v36 = vld [vmem:[#allocation14 + $0x414] ss:$20 sps:$4 sm:$0xff]   ;;  %v11451_v29 = vld [vmem:[#allocation14 + $0x410] ss:$20 sps:$4 sm:$0xff]  }
 0x6cc   :  { %4208 = vmatprep.subr.bf16.mxu1 %v11396_v37  ;;  %6280 = vmatprep.mubr.bf16.mxu0 %v13202_v38  ;;  %v11456_v37 = vld [vmem:[#allocation14 + $0xd4] ss:$20 sps:$4 sm:$0xff]  }
 0x6cd   :  { %6281 = vmatmul.mubr.bf16.vlgmr.msra.gmra.mrb[32].mxu0 %v13204_v35 }
 0x6ce   :  { %6290 = vmatpush1.bf16.msra.mxu0 %v11391_v40  ;;  %6321 = vmatprep.mubr.bf16.mxu0 %v13207_v42  ;;  %v1423_v40 = vrot.slane %v13192_v49, %v573_v48 }
 0x6cf   :  { %4209 = vmatpush1.bf16.msra.mxu1 %v11394_v41  ;;  %6291 = vmatprep.subr.bf16.mxu0 %v11399_v33  ;;  %v11454_v41 = vld [vmem:[#allocation14 + $0xd0] ss:$20 sps:$4 sm:$0xff]  }
 0x6d0   :  { %4210 = vmatprep.subr.bf16.mxu1 %v11402_v43  ;;  %v11459_v33 = vld [vmem:[#allocation14 + $0x43c] ss:$20 sps:$4 sm:$0xff]  }
 0x6d2   :  { %6292 = vmatpush1.bf16.msra.mxu0 %v11397_v44 }
 0x6d3   :  { %4211 = vmatpush1.bf16.msra.mxu1 %v11400_v46  ;;  %6293 = vmatprep.subr.bf16.mxu0 %v11405_v47  ;;  %v11457_v46 = vld [vmem:[#allocation14 + $0x438] ss:$20 sps:$4 sm:$0xff]  }
 0x6d4   :  { %4212 = vmatprep.subr.bf16.mxu1 %v11408_v6 }
 0x6d6   :  { %v10272_v17 = vpop.f32.mrb[16].mxu0  ;;  %6294 = vmatpush1.bf16.msra.mxu0 %v11403_v14 }
 0x6d7   :  { %v10273_v55 = vpop.f32.mrb[17].mxu0  ;;  %4213 = vmatpush1.bf16.msra.mxu1 %v11406_v50  ;;  %6295 = vmatprep.subr.bf16.mxu0 %v11411_v52  ;;  %v11460_v50 = vld [vmem:[#allocation14 + $0xf8] ss:$20 sps:$4 sm:$0xff]  }
 0x6d8   :  { %v13211_v58 = vadd.f32 %v10273_v55, %v10272_v17  ;;  %v10275_v59 = vpop.f32.mrb[18].mxu0  ;;  %4214 = vmatprep.subr.bf16.mxu1 %v11414_v53  ;;  %v11465_v52 = vld [vmem:[#allocation14 + $0x464] ss:$20 sps:$4 sm:$0xff]   ;;  %v11463_v55 = vld [vmem:[#allocation14 + $0x460] ss:$20 sps:$4 sm:$0xff]  }
 0x6d9   :  { %v10276_v62 = vpop.f32.mrb[19].mxu0  ;;  %v11468_v53 = vld [vmem:[#allocation14 + $0x124] ss:$20 sps:$4 sm:$0xff]   ;;  %v11471_v59 = vld [vmem:[#allocation14 + $0x48c] ss:$20 sps:$4 sm:$0xff]  }
 0x6da   :  { %6296 = vmatpush1.bf16.msra.mxu0 %v11409_v56  ;;  %v4262_v47 = vadd.f32 %v13211_v58, %v1423_v40  ;;  %v11466_v56 = vld [vmem:[#allocation14 + $0x120] ss:$20 sps:$4 sm:$0xff]   ;;  %v11469_v58 = vld [vmem:[#allocation14 + $0x488] ss:$20 sps:$4 sm:$0xff]  }
 0x6db   :  { %4215 = vmatpush1.bf16.msra.mxu1 %v11412_v60  ;;  %6297 = vmatprep.subr.bf16.mxu0 %v11417_v61  ;;  %v11474_v60 = vld [vmem:[#allocation14 + $0x14c] ss:$20 sps:$4 sm:$0xff]   ;;  %v11472_v61 = vld [vmem:[#allocation14 + $0x148] ss:$20 sps:$4 sm:$0xff]  }
 0x6dc   :  { %4216 = vmatprep.subr.bf16.mxu1 %v11420_v51  ;;  %v11477_v62 = vld [vmem:[#allocation14 + $0x4b4] ss:$20 sps:$4 sm:$0xff]  }
 0x6de   :  { %6298 = vmatpush1.bf16.msra.mxu0 %v11415_v63  ;;  %v11480_v63 = vld [vmem:[#allocation14 + $0x174] ss:$20 sps:$4 sm:$0xff]  }
 0x6df   :  { %4217 = vmatpush1.bf16.msra.mxu1 %v11418_v2  ;;  %6299 = vmatprep.subr.bf16.mxu0 %v11423_v10  ;;  %v11475_v2 = vld [vmem:[#allocation14 + $0x4b0] ss:$20 sps:$4 sm:$0xff]  }
 0x6e0   :  { %6412 = vmatprep.subr.bf16.mxu1 %v11426_v3  ;;  %v11478_v3 = vld [vmem:[#allocation14 + $0x170] ss:$20 sps:$4 sm:$0xff]  }
 0x6e2   :  { %6300 = vmatpush1.bf16.msra.mxu0 %v11421_v4  ;;  %4219 = vmatmul.mubr.bf16.vlgmr.msra.gmra.mrb[12].mxu1 %v13173_v45  ;;  %v1407_v45 = vrot.slane %v13192_v49, %v13133_v25  ;;  %v11483_v4 = vld [vmem:[#allocation14 + $0x4dc] ss:$20 sps:$4 sm:$0xff]  }
 0x6e3   :  { %6413 = vmatpush1.bf16.msra.mxu1 %v11424_v5  ;;  %6444 = vmatprep.mubr.bf16.mxu1 %v13202_v38  ;;  %v11486_v5 = vld [vmem:[#allocation14 + $0x19c] ss:$20 sps:$4 sm:$0xff]  }
 0x6e4   :  { %6301 = vmatprep.subr.bf16.mxu0 %v11429_v31  ;;  %6414 = vmatprep.subr.bf16.mxu1 %v11432_v7  ;;  %v10552_v26 = vadd.f32 %v13200_v32, %v1407_v45  ;;  %v11462_v32 = vld [vmem:[#allocation14 + $0xfc] ss:$20 sps:$4 sm:$0xff]   ;;  %v11481_v7 = vld [vmem:[#allocation14 + $0x4d8] ss:$20 sps:$4 sm:$0xff]  }
 0x6e5   :  { %v11492_v45 = vld [vmem:[#allocation14 + $0x1ec] ss:$20 sps:$4 sm:$0xff]  }
 0x6e6   :  { %6302 = vmatpush1.bf16.msra.mxu0 %v11427_v13  ;;  %v4396_v30 = vmul.f32 0.70710677, %v10552_v26  ;;  %v4389_v31 = vmul.f32 0.5, %v10552_v26  ;;  %v11562_v26 = vld [vmem:[#allocation14 + $0x550] ss:$20 sps:$4 sm:$0xff]  }
 0x6e7   :  { %6415 = vmatpush1.bf16.msra.mxu1 %v11430_v54  ;;  %6303 = vmatprep.subr.bf16.mxu0 %v11435_v15  ;;  %v11484_v54 = vld [vmem:[#allocation14 + $0x198] ss:$20 sps:$4 sm:$0xff]  }
 0x6e8   :  { %6416 = vmatprep.subr.bf16.mxu1 %v11438_v16  ;;  %12143 = verf.f32 %v4396_v30  ;;  %v11552_v15 = vld [vmem:[#allocation14 + $0x504] ss:$20 sps:$4 sm:$0xff]  }
 0x6e9   :  { %v11489_v16 = vld [vmem:[#allocation14 + $0x1c4] ss:$20 sps:$4 sm:$0xff]  }
 0x6ea   :  { %6304 = vmatpush1.bf16.msra.mxu0 %v11433_v18  ;;  %v11550_v18 = vld [vmem:[#allocation14 + $0x500] ss:$20 sps:$4 sm:$0xff]  }
 0x6eb   :  { %6417 = vmatpush1.bf16.msra.mxu1 %v11436_v57  ;;  %6305 = vmatprep.subr.bf16.mxu0 %v11441_v19  ;;  %v11487_v19 = vld [vmem:[#allocation14 + $0x1c0] ss:$20 sps:$4 sm:$0xff]  }
 0x6ec   :  { %6418 = vmatprep.subr.bf16.mxu1 %v11444_v20  ;;  %v11558_v20 = vld [vmem:[#allocation14 + $0x52c] ss:$20 sps:$4 sm:$0xff]  }
 0x6ee   :  { %6306 = vmatpush1.bf16.msra.mxu0 %v11439_v21  ;;  %v11556_v21 = vld [vmem:[#allocation14 + $0x528] ss:$20 sps:$4 sm:$0xff]  }
 0x6ef   :  { %6419 = vmatpush1.bf16.msra.mxu1 %v11442_v22  ;;  %6307 = vmatprep.subr.bf16.mxu0 %v11447_v23  ;;  %v11490_v22 = vld [vmem:[#allocation14 + $0x1e8] ss:$20 sps:$4 sm:$0xff]  }
 0x6f0   :  { %6420 = vmatprep.subr.bf16.mxu1 %v11450_v24  ;;  %v11564_v23 = vld [vmem:[#allocation14 + $0x554] ss:$20 sps:$4 sm:$0xff]  }
 0x6f1   :  { %v11495_v24 = vld [vmem:[#allocation14 + $0x214] ss:$20 sps:$4 sm:$0xff]  }
 0x6f2   :  { %6308 = vmatpush1.bf16.msra.mxu0 %v11445_v27  ;;  %v12144_v51 = vpop.eup %12143  ;;  %v11493_v27 = vld [vmem:[#allocation14 + $0x210] ss:$20 sps:$4 sm:$0xff]  }
 0x6f3   :  { %6421 = vmatpush1.bf16.msra.mxu1 %v11448_v34  ;;  %6309 = vmatprep.subr.bf16.mxu0 %v11453_v36  ;;  %v4410_v10 = vadd.f32 1.0, %v12144_v51  ;;  %v11570_v34 = vld [vmem:[#allocation14 + $0x57c] ss:$20 sps:$4 sm:$0xff]   ;;  %v11513_v51 = vld [vmem:[#allocation14 + $0x304] ss:$20 sps:$4 sm:$0xff]  }
 0x6f4   :  { %6422 = vmatprep.subr.bf16.mxu1 %v11456_v37  ;;  %v11498_v36 = vld [vmem:[#allocation14 + $0x23c] ss:$20 sps:$4 sm:$0xff]  }
 0x6f5   :  { %v4417_v13 = vmul.f32 %v4410_v10, %v4389_v31  ;;  %v11606_v10 = vld [vmem:[#allocation14 + $0x66c] ss:$20 sps:$4 sm:$0xff]   ;;  %v11612_v31 = vld [vmem:[#allocation14 + $0x694] ss:$20 sps:$4 sm:$0xff]  }
 0x6f6   :  { %v10294_v43 = vpop.f32.mrb[20].mxu0  ;;  %6310 = vmatpush1.bf16.msra.mxu0 %v11451_v29  ;;  %v11568_v29 = vld [vmem:[#allocation14 + $0x578] ss:$20 sps:$4 sm:$0xff]  }
 0x6f7   :  { %v10295_v44 = vpop.f32.mrb[21].mxu0  ;;  %6423 = vmatpush1.bf16.msra.mxu1 %v11454_v41  ;;  %6311 = vmatprep.subr.bf16.mxu0 %v11459_v33  ;;  %v13224_v57 = vpack.c.bf16 %v4417_v13, %v4417_v13  ;;  %v11496_v33 = vld [vmem:[#allocation14 + $0x238] ss:$20 sps:$4 sm:$0xff]   ;;  %v11610_v13 = vld [vmem:[#allocation14 + $0x690] ss:$20 sps:$4 sm:$0xff]  }
 0x6f8   :  { %v10296_v6 = vadd.f32 %v10295_v44, %v10294_v43  ;;  %v10297_v14 = vpop.f32.mrb[22].mxu0  ;;  %6424 = vmatprep.subr.bf16.mxu1 %v11462_v32  ;;  %v11576_v32 = vld [vmem:[#allocation14 + $0x5a4] ss:$20 sps:$4 sm:$0xff]  }
 0x6f9   :  { %v10298_v48 = vpop.f32.mrb[23].mxu0  ;;  %v11501_v44 = vld [vmem:[#allocation14 + $0x264] ss:$20 sps:$4 sm:$0xff]   ;;  %v11582_v14 = vld [vmem:[#allocation14 + $0x5cc] ss:$20 sps:$4 sm:$0xff]  }
 0x6fa   :  { %v13222_v17 = vadd.f32 %v10296_v6, %v4262_v47  ;;  %6312 = vmatpush1.bf16.msra.mxu0 %v11457_v46  ;;  %v11574_v47 = vld [vmem:[#allocation14 + $0x5a0] ss:$20 sps:$4 sm:$0xff]   ;;  %v11502_v48 = vld [vmem:[#allocation14 + $0x288] ss:$20 sps:$4 sm:$0xff]  }
 0x6fb   :  { %6425 = vmatpush1.bf16.msra.mxu1 %v11460_v50  ;;  %6313 = vmatprep.subr.bf16.mxu0 %v11465_v52  ;;  %v11499_v6 = vld [vmem:[#allocation14 + $0x260] ss:$20 sps:$4 sm:$0xff]   ;;  %v11580_v52 = vld [vmem:[#allocation14 + $0x5c8] ss:$20 sps:$4 sm:$0xff]  }
 0x6fc   :  { %6426 = vmatprep.subr.bf16.mxu1 %v11468_v53  ;;  %v11504_v50 = vld [vmem:[#allocation14 + $0x28c] ss:$20 sps:$4 sm:$0xff]   ;;  %v11507_v53 = vld [vmem:[#allocation14 + $0x2b4] ss:$20 sps:$4 sm:$0xff]  }
 0x6fe   :  { %6314 = vmatpush1.bf16.msra.mxu0 %v11463_v55  ;;  %v11588_v55 = vld [vmem:[#allocation14 + $0x5f4] ss:$20 sps:$4 sm:$0xff]  }
 0x6ff   :  { %6427 = vmatpush1.bf16.msra.mxu1 %v11466_v56  ;;  %6315 = vmatprep.subr.bf16.mxu0 %v11471_v59  ;;  %v11505_v56 = vld [vmem:[#allocation14 + $0x2b0] ss:$20 sps:$4 sm:$0xff]  }
 0x700   :  { %6428 = vmatprep.subr.bf16.mxu1 %v11474_v60  ;;  %v11594_v59 = vld [vmem:[#allocation14 + $0x61c] ss:$20 sps:$4 sm:$0xff]  }
 0x701   :  { %v11510_v60 = vld [vmem:[#allocation14 + $0x2dc] ss:$20 sps:$4 sm:$0xff]  }
 0x702   :  { %6316 = vmatpush1.bf16.msra.mxu0 %v11469_v58  ;;  %v11592_v58 = vld [vmem:[#allocation14 + $0x618] ss:$20 sps:$4 sm:$0xff]  }
 0x703   :  { %6429 = vmatpush1.bf16.msra.mxu1 %v11472_v61  ;;  %6317 = vmatprep.subr.bf16.mxu0 %v11477_v62  ;;  %v11508_v61 = vld [vmem:[#allocation14 + $0x2d8] ss:$20 sps:$4 sm:$0xff]  }
 0x704   :  { %6430 = vmatprep.subr.bf16.mxu1 %v11480_v63  ;;  %v11600_v62 = vld [vmem:[#allocation14 + $0x644] ss:$20 sps:$4 sm:$0xff]   ;;  %v11598_v63 = vld [vmem:[#allocation14 + $0x640] ss:$20 sps:$4 sm:$0xff]  }
 0x706   :  { %6318 = vmatpush1.bf16.msra.mxu0 %v11475_v2  ;;  %v11511_v2 = vld [vmem:[#allocation14 + $0x300] ss:$20 sps:$4 sm:$0xff]  }
 0x707   :  { %6431 = vmatpush1.bf16.msra.mxu1 %v11478_v3  ;;  %6319 = vmatprep.subr.bf16.mxu0 %v11483_v4  ;;  %v11516_v3 = vld [vmem:[#allocation14 + $0x32c] ss:$20 sps:$4 sm:$0xff]   ;;  %v11604_v4 = vld [vmem:[#allocation14 + $0x668] ss:$20 sps:$4 sm:$0xff]  }
 0x708   :  { %6432 = vmatprep.subr.bf16.mxu1 %v11486_v5  ;;  %v11514_v5 = vld [vmem:[#allocation14 + $0x328] ss:$20 sps:$4 sm:$0xff]  }
 0x70a   :  { %6320 = vmatpush1.bf16.msra.mxu0 %v11481_v7  ;;  %v11519_v7 = vld [vmem:[#allocation14 + $0x354] ss:$20 sps:$4 sm:$0xff]  }
 0x70b   :  { %6433 = vmatpush1.bf16.msra.mxu1 %v11484_v54  ;;  %6330 = vmatprep.subr.bf16.mxu0 %v11552_v15  ;;  %v11517_v54 = vld [vmem:[#allocation14 + $0x350] ss:$20 sps:$4 sm:$0xff]  }
 0x70c   :  { %6434 = vmatprep.subr.bf16.mxu1 %v11489_v16  ;;  %v11522_v15 = vld [vmem:[#allocation14 + $0x37c] ss:$20 sps:$4 sm:$0xff]  }
 0x70d   :  { %6322 = vmatmul.mubr.bf16.vlgmr.msra.gmra.mrb[32].mxu0 %v13224_v57 }
 0x70e   :  { %6331 = vmatpush1.bf16.msra.mxu0 %v11550_v18 }
 0x70f   :  { %6435 = vmatpush1.bf16.msra.mxu1 %v11487_v19  ;;  %6332 = vmatprep.subr.bf16.mxu0 %v11558_v20 }
 0x710   :  { %6436 = vmatprep.subr.bf16.mxu1 %v11492_v45  ;;  %v11520_v45 = vld [vmem:[#allocation14 + $0x378] ss:$20 sps:$4 sm:$0xff]  }
 0x712   :  { %6333 = vmatpush1.bf16.msra.mxu0 %v11556_v21  ;;  %v11618_v21 = vld [vmem:[#allocation14 + $0x6bc] ss:$20 sps:$4 sm:$0xff]  }
 0x713   :  { %6437 = vmatpush1.bf16.msra.mxu1 %v11490_v22  ;;  %6334 = vmatprep.subr.bf16.mxu0 %v11564_v23  ;;  %v11525_v23 = vld [vmem:[#allocation14 + $0x3a4] ss:$20 sps:$4 sm:$0xff]  }
 0x714   :  { %6438 = vmatprep.subr.bf16.mxu1 %v11495_v24  ;;  %v11616_v24 = vld [vmem:[#allocation14 + $0x6b8] ss:$20 sps:$4 sm:$0xff]  }
 0x716   :  { %v10316_v37 = vpop.f32.mrb[24].mxu0  ;;  %6335 = vmatpush1.bf16.msra.mxu0 %v11562_v26 }
 0x717   :  { %v10317_v30 = vpop.f32.mrb[25].mxu0  ;;  %6439 = vmatpush1.bf16.msra.mxu1 %v11493_v27  ;;  %6336 = vmatprep.subr.bf16.mxu0 %v11570_v34  ;;  %v11523_v27 = vld [vmem:[#allocation14 + $0x3a0] ss:$20 sps:$4 sm:$0xff]   ;;  %v11624_v34 = vld [vmem:[#allocation14 + $0x6e4] ss:$20 sps:$4 sm:$0xff]  }
 0x718   :  { %v10318_v40 = vadd.f32 %v10317_v30, %v10316_v37  ;;  %v10319_v41 = vpop.f32.mrb[26].mxu0  ;;  %6440 = vmatprep.subr.bf16.mxu1 %v11498_v36  ;;  %v11528_v36 = vld [vmem:[#allocation14 + $0x3cc] ss:$20 sps:$4 sm:$0xff]   ;;  %v11526_v30 = vld [vmem:[#allocation14 + $0x3c8] ss:$20 sps:$4 sm:$0xff]  }
 0x719   :  { %v10320_v43 = vpop.f32.mrb[27].mxu0  ;;  %v11622_v37 = vld [vmem:[#allocation14 + $0x6e0] ss:$20 sps:$4 sm:$0xff]   ;;  %v11628_v41 = vld [vmem:[#allocation14 + $0x708] ss:$20 sps:$4 sm:$0xff]  }
 0x71a   :  { %v13228_v46 = vadd.f32 %v10318_v40, %v13222_v17  ;;  %6337 = vmatpush1.bf16.msra.mxu0 %v11568_v29  ;;  %v11586_v17 = vld [vmem:[#allocation14 + $0x5f0] ss:$20 sps:$4 sm:$0xff]   ;;  %v11630_v29 = vld [vmem:[#allocation14 + $0x70c] ss:$20 sps:$4 sm:$0xff]   ;;  %v11531_v40 = vld [vmem:[#allocation14 + $0x3f4] ss:$20 sps:$4 sm:$0xff]  }
 0x71b   :  { %6441 = vmatpush1.bf16.msra.mxu1 %v11496_v33  ;;  %6338 = vmatprep.subr.bf16.mxu0 %v11576_v32  ;;  %v11529_v33 = vld [vmem:[#allocation14 + $0x3f0] ss:$20 sps:$4 sm:$0xff]   ;;  %v11636_v32 = vld [vmem:[#allocation14 + $0x734] ss:$20 sps:$4 sm:$0xff]  }
 0x71c   :  { %6442 = vmatprep.subr.bf16.mxu1 %v11501_v44  ;;  %v11534_v43 = vld [vmem:[#allocation14 + $0x41c] ss:$20 sps:$4 sm:$0xff]  }
 0x71d   :  { %v11634_v44 = vld [vmem:[#allocation14 + $0x730] ss:$20 sps:$4 sm:$0xff]  }
 0x71e   :  { %6339 = vmatpush1.bf16.msra.mxu0 %v11574_v47  ;;  %v11642_v47 = vld [vmem:[#allocation14 + $0x75c] ss:$20 sps:$4 sm:$0xff]  }
 0x71f   :  { %6443 = vmatpush1.bf16.msra.mxu1 %v11499_v6  ;;  %6340 = vmatprep.subr.bf16.mxu0 %v11582_v14  ;;  %v11537_v6 = vld [vmem:[#allocation14 + $0x444] ss:$20 sps:$4 sm:$0xff]  }
 0x720   :  { %6453 = vmatprep.subr.bf16.mxu1 %v11504_v50  ;;  %v11640_v14 = vld [vmem:[#allocation14 + $0x758] ss:$20 sps:$4 sm:$0xff]   ;;  %v11535_v50 = vld [vmem:[#allocation14 + $0x440] ss:$20 sps:$4 sm:$0xff]  }
 0x722   :  { %6445 = vmatmul.mubr.bf16.vlgmr.msra.gmra.mrb[16].mxu1 %v13204_v35  ;;  %6341 = vmatpush1.bf16.msra.mxu0 %v11580_v52  ;;  %v11648_v52 = vld [vmem:[#allocation14 + $0x784] ss:$20 sps:$4 sm:$0xff]  }
 0x723   :  { %6454 = vmatpush1.bf16.msra.mxu1 %v11502_v48  ;;  %6485 = vmatprep.mubr.bf16.mxu1 %v13207_v42  ;;  %v11540_v48 = vld [vmem:[#allocation14 + $0x46c] ss:$20 sps:$4 sm:$0xff]  }
 0x724   :  { %6455 = vmatprep.subr.bf16.mxu1 %v11507_v53  ;;  %6342 = vmatprep.subr.bf16.mxu0 %v11588_v55  ;;  %v11538_v53 = vld [vmem:[#allocation14 + $0x468] ss:$20 sps:$4 sm:$0xff]  }
 0x725   :  { %v11543_v55 = vld [vmem:[#allocation14 + $0x494] ss:$20 sps:$4 sm:$0xff]  }
 0x726   :  { %6343 = vmatpush1.bf16.msra.mxu0 %v11586_v17  ;;  %v11541_v17 = vld [vmem:[#allocation14 + $0x490] ss:$20 sps:$4 sm:$0xff]  }
 0x727   :  { %6456 = vmatpush1.bf16.msra.mxu1 %v11505_v56  ;;  %6344 = vmatprep.subr.bf16.mxu0 %v11594_v59  ;;  %v11546_v56 = vld [vmem:[#allocation14 + $0x4bc] ss:$20 sps:$4 sm:$0xff]   ;;  %v11544_v59 = vld [vmem:[#allocation14 + $0x4b8] ss:$20 sps:$4 sm:$0xff]  }
 0x728   :  { %6457 = vmatprep.subr.bf16.mxu1 %v11510_v60  ;;  %v11549_v60 = vld [vmem:[#allocation14 + $0x4e4] ss:$20 sps:$4 sm:$0xff]  }
 0x72a   :  { %6345 = vmatpush1.bf16.msra.mxu0 %v11592_v58  ;;  %v11547_v58 = vld [vmem:[#allocation14 + $0x4e0] ss:$20 sps:$4 sm:$0xff]  }
 0x72b   :  { %6458 = vmatpush1.bf16.msra.mxu1 %v11508_v61  ;;  %6346 = vmatprep.subr.bf16.mxu0 %v11600_v62  ;;  %v11555_v61 = vld [vmem:[#allocation14 + $0x50c] ss:$20 sps:$4 sm:$0xff]   ;;  %v11553_v62 = vld [vmem:[#allocation14 + $0x508] ss:$20 sps:$4 sm:$0xff]  }
 0x72c   :  { %6459 = vmatprep.subr.bf16.mxu1 %v11513_v51  ;;  %v11561_v51 = vld [vmem:[#allocation14 + $0x534] ss:$20 sps:$4 sm:$0xff]  }
 0x72e   :  { %6347 = vmatpush1.bf16.msra.mxu0 %v11598_v63  ;;  %v11559_v63 = vld [vmem:[#allocation14 + $0x530] ss:$20 sps:$4 sm:$0xff]  }
 0x72f   :  { %6460 = vmatpush1.bf16.msra.mxu1 %v11511_v2  ;;  %6348 = vmatprep.subr.bf16.mxu0 %v11606_v10  ;;  %v11567_v2 = vld [vmem:[#allocation14 + $0x55c] ss:$20 sps:$4 sm:$0xff]   ;;  %v11565_v10 = vld [vmem:[#allocation14 + $0x558] ss:$20 sps:$4 sm:$0xff]  }
 0x730   :  { %6461 = vmatprep.subr.bf16.mxu1 %v11516_v3  ;;  %v11573_v3 = vld [vmem:[#allocation14 + $0x584] ss:$20 sps:$4 sm:$0xff]  }
 0x732   :  { %6349 = vmatpush1.bf16.msra.mxu0 %v11604_v4  ;;  %v11571_v4 = vld [vmem:[#allocation14 + $0x580] ss:$20 sps:$4 sm:$0xff]  }
 0x733   :  { %6462 = vmatpush1.bf16.msra.mxu1 %v11514_v5  ;;  %6350 = vmatprep.subr.bf16.mxu0 %v11612_v31  ;;  %v11579_v5 = vld [vmem:[#allocation14 + $0x5ac] ss:$20 sps:$4 sm:$0xff]   ;;  %v11577_v31 = vld [vmem:[#allocation14 + $0x5a8] ss:$20 sps:$4 sm:$0xff]  }
 0x734   :  { %6463 = vmatprep.subr.bf16.mxu1 %v11519_v7  ;;  %v11585_v7 = vld [vmem:[#allocation14 + $0x5d4] ss:$20 sps:$4 sm:$0xff]  }
 0x736   :  { %v10338_v16 = vpop.f32.mrb[28].mxu0  ;;  %6351 = vmatpush1.bf16.msra.mxu0 %v11610_v13  ;;  %v11583_v13 = vld [vmem:[#allocation14 + $0x5d0] ss:$20 sps:$4 sm:$0xff]  }
 0x737   :  { %v10339_v18 = vpop.f32.mrb[29].mxu0  ;;  %6464 = vmatpush1.bf16.msra.mxu1 %v11517_v54  ;;  %6352 = vmatprep.subr.bf16.mxu0 %v11618_v21  ;;  %v11591_v54 = vld [vmem:[#allocation14 + $0x5fc] ss:$20 sps:$4 sm:$0xff]  }
 0x738   :  { %v10340_v19 = vadd.f32 %v10339_v18, %v10338_v16  ;;  %v10341_v20 = vpop.f32.mrb[30].mxu0  ;;  %6465 = vmatprep.subr.bf16.mxu1 %v11522_v15  ;;  %v11589_v15 = vld [vmem:[#allocation14 + $0x5f8] ss:$20 sps:$4 sm:$0xff]   ;;  %v11595_v18 = vld [vmem:[#allocation14 + $0x620] ss:$20 sps:$4 sm:$0xff]  }
 0x739   :  { %v10342_v22 = vpop.f32.mrb[31].mxu0  ;;  %v11597_v16 = vld [vmem:[#allocation14 + $0x624] ss:$20 sps:$4 sm:$0xff]   ;;  %v11601_v20 = vld [vmem:[#allocation14 + $0x648] ss:$20 sps:$4 sm:$0xff]  }
 0x73a   :  { %v13233_v26 = vadd.f32 %v10340_v19, %v13228_v46  ;;  %6353 = vmatpush1.bf16.msra.mxu0 %v11616_v24  ;;  %v11532_v46 = vld [vmem:[#allocation14 + $0x418] ss:$20 sps:$4 sm:$0xff]   ;;  %v11607_v21 = vld [vmem:[#allocation14 + $0x670] ss:$20 sps:$4 sm:$0xff]  }
 0x73b   :  { %6466 = vmatpush1.bf16.msra.mxu1 %v11520_v45  ;;  %6354 = vmatprep.subr.bf16.mxu0 %v11624_v34  ;;  %v11603_v19 = vld [vmem:[#allocation14 + $0x64c] ss:$20 sps:$4 sm:$0xff]   ;;  %v11609_v45 = vld [vmem:[#allocation14 + $0x674] ss:$20 sps:$4 sm:$0xff]   ;;  %v11615_v22 = vld [vmem:[#allocation14 + $0x69c] ss:$20 sps:$4 sm:$0xff]  }
 0x73c   :  { %6467 = vmatprep.subr.bf16.mxu1 %v11525_v23  ;;  %v11613_v23 = vld [vmem:[#allocation14 + $0x698] ss:$20 sps:$4 sm:$0xff]  }
 0x73d   :  { %v11621_v24 = vld [vmem:[#allocation14 + $0x6c4] ss:$20 sps:$4 sm:$0xff]   ;;  %v11627_v34 = vld [vmem:[#allocation14 + $0x6ec] ss:$20 sps:$4 sm:$0xff]  }
 0x73e   :  { %6355 = vmatpush1.bf16.msra.mxu0 %v11622_v37  ;;  %v11633_v37 = vld [vmem:[#allocation14 + $0x714] ss:$20 sps:$4 sm:$0xff]  }
 0x73f   :  { %6468 = vmatpush1.bf16.msra.mxu1 %v11523_v27  ;;  %6356 = vmatprep.subr.bf16.mxu0 %v11630_v29  ;;  %v11619_v27 = vld [vmem:[#allocation14 + $0x6c0] ss:$20 sps:$4 sm:$0xff]   ;;  %v11639_v29 = vld [vmem:[#allocation14 + $0x73c] ss:$20 sps:$4 sm:$0xff]  }
 0x740   :  { %6469 = vmatprep.subr.bf16.mxu1 %v11528_v36  ;;  %v11625_v36 = vld [vmem:[#allocation14 + $0x6e8] ss:$20 sps:$4 sm:$0xff]  }
 0x742   :  { %6357 = vmatpush1.bf16.msra.mxu0 %v11628_v41  ;;  %v11645_v41 = vld [vmem:[#allocation14 + $0x764] ss:$20 sps:$4 sm:$0xff]  }
 0x743   :  { %6470 = vmatpush1.bf16.msra.mxu1 %v11526_v30  ;;  %6358 = vmatprep.subr.bf16.mxu0 %v11636_v32  ;;  %v11631_v30 = vld [vmem:[#allocation14 + $0x710] ss:$20 sps:$4 sm:$0xff]   ;;  %v11651_v32 = vld [vmem:[#allocation14 + $0x78c] ss:$20 sps:$4 sm:$0xff]  }
 0x744   :  { %6471 = vmatprep.subr.bf16.mxu1 %v11531_v40  ;;  %v11637_v40 = vld [vmem:[#allocation14 + $0x738] ss:$20 sps:$4 sm:$0xff]  }
 0x746   :  { %6359 = vmatpush1.bf16.msra.mxu0 %v11634_v44  ;;  %v1419_v44 = vrot.slane %v13192_v49, %v569_v28  ;;  %v11646_v28 = vld [vmem:[#allocation14 + $0x780] ss:$20 sps:$4 sm:$0xff]  }
 0x747   :  { %6472 = vmatpush1.bf16.msra.mxu1 %v11529_v33  ;;  %6360 = vmatprep.subr.bf16.mxu0 %v11642_v47  ;;  %v11643_v33 = vld [vmem:[#allocation14 + $0x760] ss:$20 sps:$4 sm:$0xff]  }
 0x748   :  { %6473 = vmatprep.subr.bf16.mxu1 %v11534_v43  ;;  %v1415_v43 = vrot.slane %v13192_v49, %v13152_v0  ;;  %v11649_v49 = vld [vmem:[#allocation14 + $0x788] ss:$20 sps:$4 sm:$0xff]  }
 0x74a   :  { %6361 = vmatpush1.bf16.msra.mxu0 %v11640_v14 }
 0x74b   :  { %6474 = vmatpush1.bf16.msra.mxu1 %v11532_v46  ;;  %6371 = vmatprep.subr.bf16.mxu0 %v11648_v52 }
 0x74c   :  { %6475 = vmatprep.subr.bf16.mxu1 %v11537_v6 }
 0x74f   :  { %6476 = vmatpush1.bf16.msra.mxu1 %v11535_v50 }
 0x750   :  { %6477 = vmatprep.subr.bf16.mxu1 %v11540_v48 }
 0x753   :  { %6478 = vmatpush1.bf16.msra.mxu1 %v11538_v53 }
 0x754   :  { %6479 = vmatprep.subr.bf16.mxu1 %v11543_v55 }
 0x757   :  { %6480 = vmatpush1.bf16.msra.mxu1 %v11541_v17 }
 0x758   :  { %6481 = vmatprep.subr.bf16.mxu1 %v11546_v56 }
 0x75b   :  { %6482 = vmatpush1.bf16.msra.mxu1 %v11544_v59 }
 0x75c   :  { %6483 = vmatprep.subr.bf16.mxu1 %v11549_v60 }
 0x75f   :  { %6484 = vmatpush1.bf16.msra.mxu1 %v11547_v58 }
 0x760   :  { %6494 = vmatprep.subr.bf16.mxu1 %v11555_v61 }
 0x762   :  { %6486 = vmatmul.mubr.bf16.vlgmr.msra.gmra.mrb[16].mxu1 %v13224_v57 }
 0x763   :  { %6495 = vmatpush1.bf16.msra.mxu1 %v11553_v62 }
 0x764   :  { %6496 = vmatprep.subr.bf16.mxu1 %v11561_v51 }
 0x767   :  { %6497 = vmatpush1.bf16.msra.mxu1 %v11559_v63  ;;  %v11654_v63 = vld [vmem:[#allocation14 + $0x7ac] ss:$20 sps:$4 sm:$0xff]  }
 0x768   :  { %6498 = vmatprep.subr.bf16.mxu1 %v11567_v2  ;;  %v11657_v2 = vld [vmem:[#allocation14 + $0x7b4] ss:$20 sps:$4 sm:$0xff]  }
 0x76b   :  { %6499 = vmatpush1.bf16.msra.mxu1 %v11565_v10  ;;  %v11652_v10 = vld [vmem:[#allocation14 + $0x7a8] ss:$20 sps:$4 sm:$0xff]  }
 0x76c   :  { %6500 = vmatprep.subr.bf16.mxu1 %v11573_v3  ;;  %v11655_v3 = vld [vmem:[#allocation14 + $0x7b0] ss:$20 sps:$4 sm:$0xff]  }
 0x76f   :  { %6501 = vmatpush1.bf16.msra.mxu1 %v11571_v4  ;;  %v11660_v4 = vld [vmem:[#allocation14 + $0x7d4] ss:$20 sps:$4 sm:$0xff]  }
 0x770   :  { %6502 = vmatprep.subr.bf16.mxu1 %v11579_v5  ;;  %v11663_v5 = vld [vmem:[#allocation14 + $0x7dc] ss:$20 sps:$4 sm:$0xff]  }
 0x773   :  { %6503 = vmatpush1.bf16.msra.mxu1 %v11577_v31  ;;  %v4400_v31 = vmul.f32 0.70710677, %v13233_v26 }
 0x774   :  { %6504 = vmatprep.subr.bf16.mxu1 %v11585_v7  ;;  %v11658_v7 = vld [vmem:[#allocation14 + $0x7d0] ss:$20 sps:$4 sm:$0xff]  }
 0x777   :  { %6505 = vmatpush1.bf16.msra.mxu1 %v11583_v13  ;;  %v11661_v13 = vld [vmem:[#allocation14 + $0x7d8] ss:$20 sps:$4 sm:$0xff]  }
 0x778   :  { %6506 = vmatprep.subr.bf16.mxu1 %v11591_v54  ;;  %v11666_v54 = vld [vmem:[#allocation14 + $0x7fc] ss:$20 sps:$4 sm:$0xff]  }
 0x77b   :  { %6507 = vmatpush1.bf16.msra.mxu1 %v11589_v15  ;;  %v11669_v15 = vld [vmem:[#allocation14 + $0x804] ss:$20 sps:$4 sm:$0xff]  }
 0x77c   :  { %6508 = vmatprep.subr.bf16.mxu1 %v11597_v16  ;;  %v11664_v16 = vld [vmem:[#allocation14 + $0x7f8] ss:$20 sps:$4 sm:$0xff]  }
 0x77f   :  { %6509 = vmatpush1.bf16.msra.mxu1 %v11595_v18  ;;  %v11667_v18 = vld [vmem:[#allocation14 + $0x800] ss:$20 sps:$4 sm:$0xff]  }
 0x780   :  { %6510 = vmatprep.subr.bf16.mxu1 %v11603_v19  ;;  %v11672_v19 = vld [vmem:[#allocation14 + $0x824] ss:$20 sps:$4 sm:$0xff]  }
 0x783   :  { %6511 = vmatpush1.bf16.msra.mxu1 %v11601_v20  ;;  %v11675_v20 = vld [vmem:[#allocation14 + $0x82c] ss:$20 sps:$4 sm:$0xff]  }
 0x784   :  { %6512 = vmatprep.subr.bf16.mxu1 %v11609_v45  ;;  %v11670_v45 = vld [vmem:[#allocation14 + $0x820] ss:$20 sps:$4 sm:$0xff]  }
 0x787   :  { %6513 = vmatpush1.bf16.msra.mxu1 %v11607_v21  ;;  %v11673_v21 = vld [vmem:[#allocation14 + $0x828] ss:$20 sps:$4 sm:$0xff]  }
 0x788   :  { %6514 = vmatprep.subr.bf16.mxu1 %v11615_v22  ;;  %v11678_v22 = vld [vmem:[#allocation14 + $0x84c] ss:$20 sps:$4 sm:$0xff]  }
 0x78b   :  { %6515 = vmatpush1.bf16.msra.mxu1 %v11613_v23  ;;  %v11681_v23 = vld [vmem:[#allocation14 + $0x854] ss:$20 sps:$4 sm:$0xff]  }
 0x78c   :  { %6516 = vmatprep.subr.bf16.mxu1 %v11621_v24  ;;  %v11676_v24 = vld [vmem:[#allocation14 + $0x848] ss:$20 sps:$4 sm:$0xff]  }
 0x78f   :  { %6517 = vmatpush1.bf16.msra.mxu1 %v11619_v27  ;;  %v11679_v27 = vld [vmem:[#allocation14 + $0x850] ss:$20 sps:$4 sm:$0xff]  }
 0x790   :  { %6518 = vmatprep.subr.bf16.mxu1 %v11627_v34  ;;  %v11684_v34 = vld [vmem:[#allocation14 + $0x874] ss:$20 sps:$4 sm:$0xff]  }
 0x793   :  { %6519 = vmatpush1.bf16.msra.mxu1 %v11625_v36  ;;  %v11687_v36 = vld [vmem:[#allocation14 + $0x87c] ss:$20 sps:$4 sm:$0xff]  }
 0x794   :  { %6520 = vmatprep.subr.bf16.mxu1 %v11633_v37 }
 0x797   :  { %6521 = vmatpush1.bf16.msra.mxu1 %v11631_v30  ;;  %v11682_v30 = vld [vmem:[#allocation14 + $0x870] ss:$20 sps:$4 sm:$0xff]  }
 0x798   :  { %6522 = vmatprep.subr.bf16.mxu1 %v11639_v29  ;;  %v11685_v29 = vld [vmem:[#allocation14 + $0x878] ss:$20 sps:$4 sm:$0xff]  }
 0x79b   :  { %6523 = vmatpush1.bf16.msra.mxu1 %v11637_v40 }
 0x79c   :  { %6524 = vmatprep.subr.bf16.mxu1 %v11645_v41  ;;  %v11690_v41 = vld [vmem:[#allocation14 + $0x89c] ss:$20 sps:$4 sm:$0xff]  }
 0x79f   :  { %6525 = vmatpush1.bf16.msra.mxu1 %v11643_v33  ;;  %v11693_v33 = vld [vmem:[#allocation14 + $0x8a4] ss:$20 sps:$4 sm:$0xff]  }
 0x7a0   :  { %6535 = vmatprep.subr.bf16.mxu1 %v11651_v32  ;;  %v4393_v32 = vmul.f32 0.5, %v13233_v26  ;;  %v11750_v26 = vld [vmem:[#allocation17] ss:$16 sps:$4 sm:$0xff]  }
 0x7b5   :  { %v4220_v46 = vpop.f32.mrb[12].mxu1 }
 0x7b6   :  { %v10554_v47 = vadd.f32 %v4220_v46, %v1415_v43  ;;  %v4222_v6 = vpop.f32.mrb[13].mxu1  ;;  %v11688_v43 = vld [vmem:[#allocation14 + $0x898] ss:$20 sps:$4 sm:$0xff]  }
 0x7b7   :  { %v10555_v14 = vadd.f32 %v4222_v6, %v1419_v44  ;;  %v4224_v50 = vpop.f32.mrb[14].mxu1  ;;  %v11691_v44 = vld [vmem:[#allocation14 + $0x8a0] ss:$20 sps:$4 sm:$0xff]   ;;  %v11695_v6 = vld [vmem:[#allocation14 + $0x10] ss:$20 sps:$4 sm:$0xff]  }
 0x7b8   :  { %v4398_v52 = vmul.f32 0.70710677, %v10554_v47  ;;  %v4225_v48 = vpop.f32.mrb[15].mxu1  ;;  %v4391_v56 = vmul.f32 0.5, %v10554_v47  ;;  %v11694_v47 = vld [vmem:[#allocation14 + $0x150] ss:$20 sps:$4 sm:$0xff]  }
 0x7b9   :  { %v4399_v53 = vmul.f32 0.70710677, %v10555_v14  ;;  %v4392_v60 = vmul.f32 0.5, %v10555_v14  ;;  %v11696_v50 = vld [vmem:[#allocation14 + $0x178] ss:$20 sps:$4 sm:$0xff]  }
 0x7ba   :  { %12145 = verf.f32 %v4398_v52  ;;  %v11752_v52 = vld [vmem:[#allocation17 + $0x4] ss:$16 sps:$4 sm:$0xff]  }
 0x7bb   :  { %12147 = verf.f32 %v4399_v53  ;;  %v11697_v48 = vld [vmem:[#allocation14 + $0x38] ss:$20 sps:$4 sm:$0xff]  }
 0x7bc   :  { %12149 = verf.f32 %v4400_v31  ;;  %v11758_v53 = vld [vmem:[#allocation17 + $0x24] ss:$16 sps:$4 sm:$0xff]   ;;  %v11780_v31 = vld [vmem:[#allocation17 + $0xa0] ss:$16 sps:$4 sm:$0xff]  }
 0x7c4   :  { %v12146_v55 = vpop.eup %12145 }
 0x7c5   :  { %v12148_v17 = vpop.eup %12147  ;;  %v4412_v59 = vadd.f32 1.0, %v12146_v55  ;;  %v11698_v55 = vld [vmem:[#allocation14 + $0x1a0] ss:$20 sps:$4 sm:$0xff]  }
 0x7c6   :  { %v4413_v58 = vadd.f32 1.0, %v12148_v17  ;;  %v12150_v37 = vpop.eup %12149  ;;  %v11756_v17 = vld [vmem:[#allocation17 + $0x20] ss:$16 sps:$4 sm:$0xff]  }
 0x7c7   :  { %v4419_v61 = vmul.f32 %v4412_v59, %v4391_v56  ;;  %v4414_v40 = vadd.f32 1.0, %v12150_v37  ;;  %v11699_v56 = vld [vmem:[#allocation14 + $0x60] ss:$20 sps:$4 sm:$0xff]   ;;  %v11764_v59 = vld [vmem:[#allocation17 + $0x44] ss:$16 sps:$4 sm:$0xff]  }
 0x7c8   :  { %v4420_v8 = vmul.f32 %v4413_v58, %v4392_v60  ;;  %v11700_v60 = vld [vmem:[#allocation14 + $0x1c8] ss:$20 sps:$4 sm:$0xff]   ;;  %v11715_v37 = vld [vmem:[#allocation14 + $0x2e0] ss:$20 sps:$4 sm:$0xff]  }
 0x7c9   :  { %v13243_v51 = vpack.c.bf16 %v4419_v61, %v4419_v61  ;;  %v4421_v46 = vmul.f32 %v4414_v40, %v4393_v32  ;;  %v11762_v58 = vld [vmem:[#allocation17 + $0x40] ss:$16 sps:$4 sm:$0xff]  }
 0x7ca   :  { %v13241_v62 = vpack.c.bf16 %v4420_v8, %v4420_v8  ;;  %v11701_v61 = vld [vmem:[#allocation14 + $0x88] ss:$20 sps:$4 sm:$0xff]   ;;  %v11721_v32 = vld [vmem:[#allocation14 + $0x358] ss:$20 sps:$4 sm:$0xff]  }
 0x7cb   :  { %v13253_v14 = vpack.c.bf16 %v4421_v46, %v4421_v46  ;;  %v11770_v8 = vld [vmem:[#allocation17 + $0x64] ss:$16 sps:$4 sm:$0xff]   ;;  %v11810_v40 = vld [vmem:[#allocation17 + $0x140] ss:$16 sps:$4 sm:$0xff]  }
 0x7cc   :  { %6362 = vmatprep.mubr.bf16.mxu0 %v13241_v62  ;;  %6526 = vmatprep.mubr.bf16.mxu1 %v13241_v62  ;;  %v11724_v46 = vld [vmem:[#allocation14 + $0x4e8] ss:$20 sps:$4 sm:$0xff]  }
 0x7cd   :  { %6363 = vmatmul.mubr.bf16.vlgmr.msra.gmra.mrb[32].mxu0 %v13243_v51  ;;  %6527 = vmatmul.mubr.bf16.vlgmr.msra.gmra.mrb[16].mxu1 %v13243_v51 }
 0x7ce   :  { %6372 = vmatpush1.bf16.msra.mxu0 %v11646_v28  ;;  %6536 = vmatpush1.bf16.msra.mxu1 %v11649_v49  ;;  %v11768_v28 = vld [vmem:[#allocation17 + $0x60] ss:$16 sps:$4 sm:$0xff]  }
 0x7cf   :  { %6373 = vmatprep.subr.bf16.mxu0 %v11654_v63  ;;  %6537 = vmatprep.subr.bf16.mxu1 %v11657_v2  ;;  %v11703_v49 = vld [vmem:[#allocation14 + $0xb0] ss:$20 sps:$4 sm:$0xff]   ;;  %v11776_v63 = vld [vmem:[#allocation17 + $0x84] ss:$16 sps:$4 sm:$0xff]  }
 0x7d0   :  { %6403 = vmatprep.mubr.bf16.mxu0 %v12810_v39  ;;  %6567 = vmatprep.mubr.bf16.mxu1 %v12810_v39  ;;  %v11704_v2 = vld [vmem:[#allocation14 + $0x218] ss:$20 sps:$4 sm:$0xff]  }
 0x7d2   :  { %6374 = vmatpush1.bf16.msra.mxu0 %v11652_v10  ;;  %6538 = vmatpush1.bf16.msra.mxu1 %v11655_v3  ;;  %v11774_v10 = vld [vmem:[#allocation17 + $0x80] ss:$16 sps:$4 sm:$0xff]  }
 0x7d3   :  { %6375 = vmatprep.subr.bf16.mxu0 %v11660_v4  ;;  %6539 = vmatprep.subr.bf16.mxu1 %v11663_v5  ;;  %v11705_v3 = vld [vmem:[#allocation14 + $0xd8] ss:$20 sps:$4 sm:$0xff]   ;;  %v11706_v5 = vld [vmem:[#allocation14 + $0x240] ss:$20 sps:$4 sm:$0xff]  }
 0x7d4   :  { %v11782_v4 = vld [vmem:[#allocation17 + $0xa4] ss:$16 sps:$4 sm:$0xff]  }
 0x7d6   :  { %6376 = vmatpush1.bf16.msra.mxu0 %v11658_v7  ;;  %6540 = vmatpush1.bf16.msra.mxu1 %v11661_v13  ;;  %v11707_v7 = vld [vmem:[#allocation14 + $0x100] ss:$20 sps:$4 sm:$0xff]   ;;  %v11788_v13 = vld [vmem:[#allocation17 + $0xc4] ss:$16 sps:$4 sm:$0xff]  }
 0x7d7   :  { %6377 = vmatprep.subr.bf16.mxu0 %v11666_v54  ;;  %6541 = vmatprep.subr.bf16.mxu1 %v11669_v15  ;;  %v11708_v54 = vld [vmem:[#allocation14 + $0x268] ss:$20 sps:$4 sm:$0xff]  }
 0x7d8   :  { %v11786_v15 = vld [vmem:[#allocation17 + $0xc0] ss:$16 sps:$4 sm:$0xff]  }
 0x7da   :  { %6378 = vmatpush1.bf16.msra.mxu0 %v11664_v16  ;;  %6542 = vmatpush1.bf16.msra.mxu1 %v11667_v18  ;;  %v11709_v16 = vld [vmem:[#allocation14 + $0x128] ss:$20 sps:$4 sm:$0xff]  }
 0x7db   :  { %6379 = vmatprep.subr.bf16.mxu0 %v11672_v19  ;;  %6543 = vmatprep.subr.bf16.mxu1 %v11675_v20  ;;  %v11794_v18 = vld [vmem:[#allocation17 + $0xe4] ss:$16 sps:$4 sm:$0xff]   ;;  %v11710_v19 = vld [vmem:[#allocation14 + $0x3d0] ss:$20 sps:$4 sm:$0xff]  }
 0x7dc   :  { %v11792_v20 = vld [vmem:[#allocation17 + $0xe0] ss:$16 sps:$4 sm:$0xff]  }
 0x7de   :  { %6380 = vmatpush1.bf16.msra.mxu0 %v11670_v45  ;;  %6544 = vmatpush1.bf16.msra.mxu1 %v11673_v21  ;;  %v11711_v45 = vld [vmem:[#allocation14 + $0x290] ss:$20 sps:$4 sm:$0xff]   ;;  %v11800_v21 = vld [vmem:[#allocation17 + $0x104] ss:$16 sps:$4 sm:$0xff]  }
 0x7df   :  { %6381 = vmatprep.subr.bf16.mxu0 %v11678_v22  ;;  %6545 = vmatprep.subr.bf16.mxu1 %v11681_v23  ;;  %v11712_v22 = vld [vmem:[#allocation14 + $0x3f8] ss:$20 sps:$4 sm:$0xff]  }
 0x7e0   :  { %v11798_v23 = vld [vmem:[#allocation17 + $0x100] ss:$16 sps:$4 sm:$0xff]  }
 0x7e2   :  { %6382 = vmatpush1.bf16.msra.mxu0 %v11676_v24  ;;  %6546 = vmatpush1.bf16.msra.mxu1 %v11679_v27  ;;  %v11713_v24 = vld [vmem:[#allocation14 + $0x2b8] ss:$20 sps:$4 sm:$0xff]  }
 0x7e3   :  { %6383 = vmatprep.subr.bf16.mxu0 %v11684_v34  ;;  %6547 = vmatprep.subr.bf16.mxu1 %v11687_v36  ;;  %v11806_v27 = vld [vmem:[#allocation17 + $0x124] ss:$16 sps:$4 sm:$0xff]   ;;  %v11714_v34 = vld [vmem:[#allocation14 + $0x420] ss:$20 sps:$4 sm:$0xff]  }
 0x7e4   :  { %v11804_v36 = vld [vmem:[#allocation17 + $0x120] ss:$16 sps:$4 sm:$0xff]  }
 0x7e6   :  { %6384 = vmatpush1.bf16.msra.mxu0 %v11682_v30  ;;  %6548 = vmatpush1.bf16.msra.mxu1 %v11685_v29  ;;  %v11812_v30 = vld [vmem:[#allocation17 + $0x144] ss:$16 sps:$4 sm:$0xff]  }
 0x7e7   :  { %6385 = vmatprep.subr.bf16.mxu0 %v11690_v41  ;;  %6549 = vmatprep.subr.bf16.mxu1 %v11693_v33  ;;  %v11716_v29 = vld [vmem:[#allocation14 + $0x448] ss:$20 sps:$4 sm:$0xff]   ;;  %v11718_v41 = vld [vmem:[#allocation14 + $0x470] ss:$20 sps:$4 sm:$0xff]   ;;  %v11720_v33 = vld [vmem:[#allocation14 + $0x498] ss:$20 sps:$4 sm:$0xff]  }
 0x7ea   :  { %6386 = vmatpush1.bf16.msra.mxu0 %v11688_v43  ;;  %6550 = vmatpush1.bf16.msra.mxu1 %v11691_v44  ;;  %v11722_v43 = vld [vmem:[#allocation14 + $0x4c0] ss:$20 sps:$4 sm:$0xff]  }
 0x7eb   :  { %10344 = vmatprep.subr.bf16.mxu0 %v11694_v47  ;;  %7748 = vmatprep.subr.bf16.mxu1 %v11752_v52  ;;  %v11723_v44 = vld [vmem:[#allocation14 + $0x380] ss:$20 sps:$4 sm:$0xff]   ;;  %v11725_v47 = vld [vmem:[#allocation14 + $0x3a8] ss:$20 sps:$4 sm:$0xff]   ;;  %v11729_v52 = vld [vmem:[#allocation14 + $0x538] ss:$20 sps:$4 sm:$0xff]  }
 0x7ed   :  { %6404 = vmatmul.mubr.bf16.vlgmr.msra.gmra.mrb[32].mxu0 %v13253_v14  ;;  %6568 = vmatmul.mubr.bf16.vlgmr.msra.gmra.mrb[16].mxu1 %v13253_v14 }
 0x7ee   :  { %10345 = vmatpush3.bf16.msra.mxu0 %v11695_v6  ;;  %6608 = vmatprep.mubr.bf16.mxu0 %v13202_v38  ;;  %v11702_v38 = vld [vmem:[#allocation14 + $0x1f0] ss:$20 sps:$4 sm:$0xff]  }
 0x7ef   :  { %10346 = vmatprep.subr.bf16.mxu0 %v11696_v50  ;;  %7749 = vmatpush1.bf16.msra.mxu1 %v11750_v26  ;;  %v11726_v6 = vld [vmem:[#allocation14 + $0x650] ss:$20 sps:$4 sm:$0xff]   ;;  %v11728_v26 = vld [vmem:[#allocation14 + $0x678] ss:$20 sps:$4 sm:$0xff]  }
 0x7f0   :  { %7750 = vmatprep.subr.bf16.mxu1 %v11758_v53  ;;  %v11727_v50 = vld [vmem:[#allocation14 + $0x510] ss:$20 sps:$4 sm:$0xff]   ;;  %v11731_v53 = vld [vmem:[#allocation14 + $0x560] ss:$20 sps:$4 sm:$0xff]  }
 0x7f2   :  { %10347 = vmatpush3.bf16.msra.mxu0 %v11697_v48  ;;  %v11730_v48 = vld [vmem:[#allocation14 + $0x6a0] ss:$20 sps:$4 sm:$0xff]  }
 0x7f3   :  { %10348 = vmatprep.subr.bf16.mxu0 %v11698_v55  ;;  %7751 = vmatpush1.bf16.msra.mxu1 %v11756_v17  ;;  %v11732_v55 = vld [vmem:[#allocation14 + $0x6c8] ss:$20 sps:$4 sm:$0xff]  }
 0x7f4   :  { %7752 = vmatprep.subr.bf16.mxu1 %v11764_v59  ;;  %v11733_v17 = vld [vmem:[#allocation14 + $0x588] ss:$20 sps:$4 sm:$0xff]   ;;  %v11735_v59 = vld [vmem:[#allocation14 + $0x5b0] ss:$20 sps:$4 sm:$0xff]  }
 0x7f6   :  { %10349 = vmatpush3.bf16.msra.mxu0 %v11699_v56  ;;  %v11734_v56 = vld [vmem:[#allocation14 + $0x6f0] ss:$20 sps:$4 sm:$0xff]  }
 0x7f7   :  { %10350 = vmatprep.subr.bf16.mxu0 %v11700_v60  ;;  %7753 = vmatpush1.bf16.msra.mxu1 %v11762_v58  ;;  %v11736_v60 = vld [vmem:[#allocation14 + $0x718] ss:$20 sps:$4 sm:$0xff]   ;;  %v11738_v58 = vld [vmem:[#allocation14 + $0x740] ss:$20 sps:$4 sm:$0xff]  }
 0x7f8   :  { %7754 = vmatprep.subr.bf16.mxu1 %v11770_v8  ;;  %v11818_v8 = vld [vmem:[#allocation17 + $0x164] ss:$16 sps:$4 sm:$0xff]  }
 0x7fa   :  { %10351 = vmatpush3.bf16.msra.mxu0 %v11701_v61  ;;  %v11740_v61 = vld [vmem:[#allocation14 + $0x768] ss:$20 sps:$4 sm:$0xff]  }
 0x7fb   :  { %10352 = vmatprep.subr.bf16.mxu0 %v11702_v38  ;;  %7755 = vmatpush1.bf16.msra.mxu1 %v11768_v28  ;;  %v11816_v38 = vld [vmem:[#allocation17 + $0x160] ss:$16 sps:$4 sm:$0xff]  }
 0x7fc   :  { %7756 = vmatprep.subr.bf16.mxu1 %v11776_v63  ;;  %v11741_v28 = vld [vmem:[#allocation14 + $0x628] ss:$20 sps:$4 sm:$0xff]  }
 0x7fd   :  { %v11822_v63 = vld [vmem:[#allocation17 + $0x180] ss:$16 sps:$4 sm:$0xff]  }
 0x7fe   :  { %10353 = vmatpush3.bf16.msra.mxu0 %v11703_v49  ;;  %v11824_v49 = vld [vmem:[#allocation17 + $0x184] ss:$16 sps:$4 sm:$0xff]  }
 0x7ff   :  { %10354 = vmatprep.subr.bf16.mxu0 %v11704_v2  ;;  %7757 = vmatpush1.bf16.msra.mxu1 %v11774_v10  ;;  %v11742_v2 = vld [vmem:[#allocation14 + $0x790] ss:$20 sps:$4 sm:$0xff]   ;;  %v11830_v10 = vld [vmem:[#allocation17 + $0x1a4] ss:$16 sps:$4 sm:$0xff]  }
 0x800   :  { %7758 = vmatprep.subr.bf16.mxu1 %v11782_v4  ;;  %v11743_v4 = vld [vmem:[#allocation14 + $0x7b8] ss:$20 sps:$4 sm:$0xff]  }
 0x802   :  { %10355 = vmatpush3.bf16.msra.mxu0 %v11705_v3  ;;  %v11828_v3 = vld [vmem:[#allocation17 + $0x1a0] ss:$16 sps:$4 sm:$0xff]  }
 0x803   :  { %10356 = vmatprep.subr.bf16.mxu0 %v11706_v5  ;;  %7759 = vmatpush1.bf16.msra.mxu1 %v11780_v31  ;;  %v11836_v5 = vld [vmem:[#allocation17 + $0x1c4] ss:$16 sps:$4 sm:$0xff]   ;;  %v11834_v31 = vld [vmem:[#allocation17 + $0x1c0] ss:$16 sps:$4 sm:$0xff]  }
 0x804   :  { %7760 = vmatprep.subr.bf16.mxu1 %v11788_v13  ;;  %v11842_v13 = vld [vmem:[#allocation17 + $0x1e4] ss:$16 sps:$4 sm:$0xff]  }
 0x806   :  { %10357 = vmatpush3.bf16.msra.mxu0 %v11707_v7  ;;  %v11744_v7 = vld [vmem:[#allocation14 + $0x7e0] ss:$20 sps:$4 sm:$0xff]  }
 0x807   :  { %10358 = vmatprep.subr.bf16.mxu0 %v11708_v54  ;;  %7761 = vmatpush1.bf16.msra.mxu1 %v11786_v15  ;;  %v11840_v54 = vld [vmem:[#allocation17 + $0x1e0] ss:$16 sps:$4 sm:$0xff]   ;;  %v11848_v15 = vld [vmem:[#allocation17 + $0x204] ss:$16 sps:$4 sm:$0xff]  }
 0x808   :  { %7762 = vmatprep.subr.bf16.mxu1 %v11794_v18  ;;  %v11747_v18 = vld [vmem:[#allocation14 + $0x858] ss:$20 sps:$4 sm:$0xff]  }
 0x80a   :  { %10359 = vmatpush3.bf16.msra.mxu0 %v11709_v16  ;;  %v11746_v16 = vld [vmem:[#allocation14 + $0x830] ss:$20 sps:$4 sm:$0xff]  }
 0x80b   :  { %10366 = vmatprep.subr.bf16.mxu0 %v11710_v19  ;;  %7763 = vmatpush1.bf16.msra.mxu1 %v11792_v20  ;;  %v11748_v19 = vld [vmem:[#allocation14 + $0x880] ss:$20 sps:$4 sm:$0xff]   ;;  %v11749_v20 = vld [vmem:[#allocation14 + $0x8a8] ss:$20 sps:$4 sm:$0xff]  }
 0x80c   :  { %7764 = vmatprep.subr.bf16.mxu1 %v11800_v21  ;;  %v11753_v21 = vld [vmem:[#allocation17 + $0x8] ss:$16 sps:$4 sm:$0xff]  }
 0x80d   :  { %6609 = vmatmul.mubr.bf16.vlgmr.msra.gmra.mrb[36].mxu0 %v13204_v35  ;;  %v11717_v35 = vld [vmem:[#allocation14 + $0x308] ss:$20 sps:$4 sm:$0xff]  }
 0x80e   :  { %10367 = vmatpush3.bf16.msra.mxu0 %v11711_v45  ;;  %6648 = vmatprep.mubr.bf16.mxu0 %v13207_v42  ;;  %v11719_v42 = vld [vmem:[#allocation14 + $0x330] ss:$20 sps:$4 sm:$0xff]  }
 0x80f   :  { %10368 = vmatprep.subr.bf16.mxu0 %v11712_v22  ;;  %7765 = vmatpush1.bf16.msra.mxu1 %v11798_v23  ;;  %v11755_v45 = vld [vmem:[#allocation17 + $0xc] ss:$16 sps:$4 sm:$0xff]   ;;  %v11759_v23 = vld [vmem:[#allocation17 + $0x28] ss:$16 sps:$4 sm:$0xff]  }
 0x810   :  { %7766 = vmatprep.subr.bf16.mxu1 %v11806_v27  ;;  %v11761_v22 = vld [vmem:[#allocation17 + $0x2c] ss:$16 sps:$4 sm:$0xff]   ;;  %v11765_v27 = vld [vmem:[#allocation17 + $0x48] ss:$16 sps:$4 sm:$0xff]  }
 0x812   :  { %10369 = vmatpush3.bf16.msra.mxu0 %v11713_v24  ;;  %v11767_v24 = vld [vmem:[#allocation17 + $0x4c] ss:$16 sps:$4 sm:$0xff]  }
 0x813   :  { %10370 = vmatprep.subr.bf16.mxu0 %v11714_v34  ;;  %7767 = vmatpush1.bf16.msra.mxu1 %v11804_v36  ;;  %v11773_v34 = vld [vmem:[#allocation17 + $0x6c] ss:$16 sps:$4 sm:$0xff]   ;;  %v11771_v36 = vld [vmem:[#allocation17 + $0x68] ss:$16 sps:$4 sm:$0xff]  }
 0x814   :  { %7768 = vmatprep.subr.bf16.mxu1 %v11812_v30  ;;  %v11777_v30 = vld [vmem:[#allocation17 + $0x88] ss:$16 sps:$4 sm:$0xff]  }
 0x816   :  { %10371 = vmatpush3.bf16.msra.mxu0 %v11715_v37  ;;  %v11779_v37 = vld [vmem:[#allocation17 + $0x8c] ss:$16 sps:$4 sm:$0xff]  }
 0x817   :  { %10372 = vmatprep.subr.bf16.mxu0 %v11716_v29  ;;  %7769 = vmatpush1.bf16.msra.mxu1 %v11810_v40  ;;  %v11785_v29 = vld [vmem:[#allocation17 + $0xac] ss:$16 sps:$4 sm:$0xff]   ;;  %v11783_v40 = vld [vmem:[#allocation17 + $0xa8] ss:$16 sps:$4 sm:$0xff]  }
 0x818   :  { %7770 = vmatprep.subr.bf16.mxu1 %v11818_v8 }
 0x81a   :  { %10373 = vmatpush3.bf16.msra.mxu0 %v11717_v35  ;;  %v11789_v35 = vld [vmem:[#allocation17 + $0xc8] ss:$16 sps:$4 sm:$0xff]  }
 0x81b   :  { %10374 = vmatprep.subr.bf16.mxu0 %v11718_v41  ;;  %7771 = vmatpush1.bf16.msra.mxu1 %v11816_v38  ;;  %v11797_v41 = vld [vmem:[#allocation17 + $0xec] ss:$16 sps:$4 sm:$0xff]  }
 0x81c   :  { %7772 = vmatprep.subr.bf16.mxu1 %v11824_v49 }
 0x81e   :  { %10375 = vmatpush3.bf16.msra.mxu0 %v11719_v42  ;;  %v11795_v42 = vld [vmem:[#allocation17 + $0xe8] ss:$16 sps:$4 sm:$0xff]  }
 0x81f   :  { %10376 = vmatprep.subr.bf16.mxu0 %v11720_v33  ;;  %7773 = vmatpush1.bf16.msra.mxu1 %v11822_v63  ;;  %v11803_v33 = vld [vmem:[#allocation17 + $0x10c] ss:$16 sps:$4 sm:$0xff]  }
 0x820   :  { %7774 = vmatprep.subr.bf16.mxu1 %v11830_v10 }
 0x822   :  { %10377 = vmatpush3.bf16.msra.mxu0 %v11721_v32  ;;  %v11801_v32 = vld [vmem:[#allocation17 + $0x108] ss:$16 sps:$4 sm:$0xff]  }
 0x823   :  { %10378 = vmatprep.subr.bf16.mxu0 %v11722_v43  ;;  %7775 = vmatpush1.bf16.msra.mxu1 %v11828_v3  ;;  %v11809_v43 = vld [vmem:[#allocation17 + $0x12c] ss:$16 sps:$4 sm:$0xff]  }
 0x824   :  { %7776 = vmatprep.subr.bf16.mxu1 %v11836_v5 }
 0x826   :  { %10379 = vmatpush3.bf16.msra.mxu0 %v11723_v44  ;;  %v11807_v44 = vld [vmem:[#allocation17 + $0x128] ss:$16 sps:$4 sm:$0xff]  }
 0x827   :  { %10380 = vmatprep.subr.bf16.mxu0 %v11724_v46  ;;  %7777 = vmatpush1.bf16.msra.mxu1 %v11834_v31  ;;  %v11815_v46 = vld [vmem:[#allocation17 + $0x14c] ss:$16 sps:$4 sm:$0xff]  }
 0x828   :  { %7778 = vmatprep.subr.bf16.mxu1 %v11842_v13 }
 0x82a   :  { %10381 = vmatpush3.bf16.msra.mxu0 %v11725_v47  ;;  %v11813_v47 = vld [vmem:[#allocation17 + $0x148] ss:$16 sps:$4 sm:$0xff]  }
 0x82b   :  { %10388 = vmatprep.subr.bf16.mxu0 %v11726_v6  ;;  %7779 = vmatpush1.bf16.msra.mxu1 %v11840_v54  ;;  %v11821_v6 = vld [vmem:[#allocation17 + $0x16c] ss:$16 sps:$4 sm:$0xff]  }
 0x82c   :  { %7789 = vmatprep.subr.bf16.mxu1 %v11848_v15 }
 0x82d   :  { %6649 = vmatmul.mubr.bf16.vlgmr.msra.gmra.mrb[40].mxu0 %v13224_v57  ;;  %v11737_v57 = vld [vmem:[#allocation14 + $0x5d8] ss:$20 sps:$4 sm:$0xff]  }
 0x82e   :  { %10389 = vmatpush3.bf16.msra.mxu0 %v11727_v50  ;;  %6688 = vmatprep.mubr.bf16.mxu0 %v13241_v62  ;;  %v11739_v62 = vld [vmem:[#allocation14 + $0x600] ss:$20 sps:$4 sm:$0xff]  }
 0x82f   :  { %10390 = vmatprep.subr.bf16.mxu0 %v11728_v26  ;;  %v11819_v50 = vld [vmem:[#allocation17 + $0x168] ss:$16 sps:$4 sm:$0xff]   ;;  %v11827_v26 = vld [vmem:[#allocation17 + $0x18c] ss:$16 sps:$4 sm:$0xff]  }
 0x832   :  { %10391 = vmatpush3.bf16.msra.mxu0 %v11729_v52  ;;  %v11825_v52 = vld [vmem:[#allocation17 + $0x188] ss:$16 sps:$4 sm:$0xff]  }
 0x833   :  { %10392 = vmatprep.subr.bf16.mxu0 %v11730_v48  ;;  %v11833_v48 = vld [vmem:[#allocation17 + $0x1ac] ss:$16 sps:$4 sm:$0xff]  }
 0x836   :  { %10393 = vmatpush3.bf16.msra.mxu0 %v11731_v53  ;;  %v11831_v53 = vld [vmem:[#allocation17 + $0x1a8] ss:$16 sps:$4 sm:$0xff]  }
 0x837   :  { %10394 = vmatprep.subr.bf16.mxu0 %v11732_v55  ;;  %v11839_v55 = vld [vmem:[#allocation17 + $0x1cc] ss:$16 sps:$4 sm:$0xff]  }
 0x83a   :  { %10395 = vmatpush3.bf16.msra.mxu0 %v11733_v17  ;;  %v11837_v17 = vld [vmem:[#allocation17 + $0x1c8] ss:$16 sps:$4 sm:$0xff]  }
 0x83b   :  { %10396 = vmatprep.subr.bf16.mxu0 %v11734_v56  ;;  %v11845_v56 = vld [vmem:[#allocation17 + $0x1ec] ss:$16 sps:$4 sm:$0xff]  }
 0x83e   :  { %10397 = vmatpush3.bf16.msra.mxu0 %v11735_v59  ;;  %v11843_v59 = vld [vmem:[#allocation17 + $0x1e8] ss:$16 sps:$4 sm:$0xff]  }
 0x83f   :  { %10398 = vmatprep.subr.bf16.mxu0 %v11736_v60  ;;  %v11851_v60 = vld [vmem:[#allocation17 + $0x20c] ss:$16 sps:$4 sm:$0xff]  }
 0x842   :  { %10399 = vmatpush3.bf16.msra.mxu0 %v11737_v57  ;;  %v13274_v57 = vld [vmem:[#allocation16] sm:$0x1f] }
 0x843   :  { %10400 = vmatprep.subr.bf16.mxu0 %v11738_v58  ;;  %v4770_v58 = vrot.slane %v13274_v57, %v13094_v9 }
 0x846   :  { %10401 = vmatpush3.bf16.msra.mxu0 %v11739_v62  ;;  %v4774_v62 = vrot.slane %v13274_v57, %v13099_v11 }
 0x847   :  { %10402 = vmatprep.subr.bf16.mxu0 %v11740_v61  ;;  %v4782_v61 = vrot.slane %v13274_v57, %v13102_v12 }
 0x84a   :  { %10403 = vmatpush3.bf16.msra.mxu0 %v11741_v28 }
 0x84b   :  { %10472 = vmatprep.subr.bf16.mxu0 %v12808_v1 }
 0x84d   :  { %6689 = vmatmul.mubr.bf16.vlgmr.msra.gmra.mrb[44].mxu0 %v13243_v51  ;;  %v11745_v51 = vld [vmem:[#allocation14 + $0x808] ss:$20 sps:$4 sm:$0xff]  }
 0x84e   :  { %10473 = vmatpush3.bf16.msra.mxu0 %v11742_v2  ;;  %10488 = vmatprep.mubr.msk.bf16.mxu0 %vm12809_vm0, %v12808_v1 }
 0x84f   :  { %10474 = vmatprep.subr.bf16.mxu0 %v12808_v1 }
 0x852   :  { %10475 = vmatpush3.bf16.msra.mxu0 %v11743_v4 }
 0x853   :  { %10476 = vmatprep.subr.bf16.mxu0 %v12808_v1 }
 0x856   :  { %10477 = vmatpush3.bf16.msra.mxu0 %v11744_v7 }
 0x857   :  { %10478 = vmatprep.subr.bf16.mxu0 %v12808_v1 }
 0x85a   :  { %10479 = vmatpush3.bf16.msra.mxu0 %v11745_v51 }
 0x85b   :  { %10480 = vmatprep.subr.bf16.mxu0 %v12808_v1 }
 0x85e   :  { %10481 = vmatpush3.bf16.msra.mxu0 %v11746_v16 }
 0x85f   :  { %10482 = vmatprep.subr.bf16.mxu0 %v12808_v1 }
 0x862   :  { %10483 = vmatpush3.bf16.msra.mxu0 %v11747_v18 }
 0x863   :  { %10484 = vmatprep.subr.bf16.mxu0 %v12808_v1 }
 0x866   :  { %10485 = vmatpush3.bf16.msra.mxu0 %v11748_v19 }
 0x867   :  { %10486 = vmatprep.subr.bf16.mxu0 %v12808_v1 }
 0x86a   :  { %10487 = vmatpush3.bf16.msra.mxu0 %v11749_v20 }
 0x86b   :  { %7871 = vmatprep.subr.bf16.mxu0 %v11755_v45 }
 0x86d   :  { %10489 = vmatmul.mubr.bf16.vlgmr.msra.gmra.mrb[48].mxu0 %v13253_v14  ;;  %v11791_v14 = vld [vmem:[#allocation17 + $0xcc] ss:$16 sps:$4 sm:$0xff]  }
 0x86e   :  { %7872 = vmatpush1.bf16.msra.mxu0 %v11753_v21 }
 0x86f   :  { %7873 = vmatprep.subr.bf16.mxu0 %v11761_v22 }
 0x872   :  { %7874 = vmatpush1.bf16.msra.mxu0 %v11759_v23 }
 0x873   :  { %7875 = vmatprep.subr.bf16.mxu0 %v11767_v24 }
 0x876   :  { %7876 = vmatpush1.bf16.msra.mxu0 %v11765_v27 }
 0x877   :  { %7877 = vmatprep.subr.bf16.mxu0 %v11773_v34 }
 0x87a   :  { %7878 = vmatpush1.bf16.msra.mxu0 %v11771_v36  ;;  %v11846_v36 = vld [vmem:[#allocation17 + $0x200] ss:$16 sps:$4 sm:$0xff]  }
 0x87b   :  { %7879 = vmatprep.subr.bf16.mxu0 %v11779_v37  ;;  %v11849_v37 = vld [vmem:[#allocation17 + $0x208] ss:$16 sps:$4 sm:$0xff]  }
 0x87e   :  { %7880 = vmatpush1.bf16.msra.mxu0 %v11777_v30 }
 0x87f   :  { %7881 = vmatprep.subr.bf16.mxu0 %v11785_v29  ;;  %v11854_v29 = vld [vmem:[#allocation17 + $0x224] ss:$16 sps:$4 sm:$0xff]  }
 0x882   :  { %7882 = vmatpush1.bf16.msra.mxu0 %v11783_v40  ;;  %v11857_v40 = vld [vmem:[#allocation17 + $0x22c] ss:$16 sps:$4 sm:$0xff]  }
 0x883   :  { %7883 = vmatprep.subr.bf16.mxu0 %v11791_v14 }
 0x886   :  { %7884 = vmatpush1.bf16.msra.mxu0 %v11789_v35  ;;  %v11852_v35 = vld [vmem:[#allocation17 + $0x220] ss:$16 sps:$4 sm:$0xff]  }
 0x887   :  { %7885 = vmatprep.subr.bf16.mxu0 %v11797_v41  ;;  %v11855_v41 = vld [vmem:[#allocation17 + $0x228] ss:$16 sps:$4 sm:$0xff]  }
 0x88a   :  { %7886 = vmatpush1.bf16.msra.mxu0 %v11795_v42  ;;  %v11860_v42 = vld [vmem:[#allocation17 + $0x244] ss:$16 sps:$4 sm:$0xff]  }
 0x88b   :  { %7887 = vmatprep.subr.bf16.mxu0 %v11803_v33  ;;  %v11863_v33 = vld [vmem:[#allocation17 + $0x24c] ss:$16 sps:$4 sm:$0xff]  }
 0x88e   :  { %7888 = vmatpush1.bf16.msra.mxu0 %v11801_v32  ;;  %v11858_v32 = vld [vmem:[#allocation17 + $0x240] ss:$16 sps:$4 sm:$0xff]  }
 0x88f   :  { %7889 = vmatprep.subr.bf16.mxu0 %v11809_v43  ;;  %v11861_v43 = vld [vmem:[#allocation17 + $0x248] ss:$16 sps:$4 sm:$0xff]  }
 0x892   :  { %7890 = vmatpush1.bf16.msra.mxu0 %v11807_v44  ;;  %v11866_v44 = vld [vmem:[#allocation17 + $0x264] ss:$16 sps:$4 sm:$0xff]  }
 0x893   :  { %7891 = vmatprep.subr.bf16.mxu0 %v11815_v46  ;;  %v11869_v46 = vld [vmem:[#allocation17 + $0x26c] ss:$16 sps:$4 sm:$0xff]  }
 0x896   :  { %7892 = vmatpush1.bf16.msra.mxu0 %v11813_v47 }
 0x897   :  { %7893 = vmatprep.subr.bf16.mxu0 %v11821_v6 }
 0x89a   :  { %7894 = vmatpush1.bf16.msra.mxu0 %v11819_v50 }
 0x89b   :  { %7895 = vmatprep.subr.bf16.mxu0 %v11827_v26 }
 0x89e   :  { %7896 = vmatpush1.bf16.msra.mxu0 %v11825_v52  ;;  %v11864_v52 = vld [vmem:[#allocation17 + $0x260] ss:$16 sps:$4 sm:$0xff]  }
 0x89f   :  { %7897 = vmatprep.subr.bf16.mxu0 %v11833_v48  ;;  %v11867_v48 = vld [vmem:[#allocation17 + $0x268] ss:$16 sps:$4 sm:$0xff]  }
 0x8a2   :  { %7898 = vmatpush1.bf16.msra.mxu0 %v11831_v53 }
 0x8a3   :  { %7899 = vmatprep.subr.bf16.mxu0 %v11839_v55  ;;  %v11872_v55 = vld [vmem:[#allocation17 + $0x284] ss:$16 sps:$4 sm:$0xff]  }
 0x8a6   :  { %7900 = vmatpush1.bf16.msra.mxu0 %v11837_v17  ;;  %v11875_v17 = vld [vmem:[#allocation17 + $0x28c] ss:$16 sps:$4 sm:$0xff]  }
 0x8a7   :  { %7901 = vmatprep.subr.bf16.mxu0 %v11845_v56  ;;  %v11870_v56 = vld [vmem:[#allocation17 + $0x280] ss:$16 sps:$4 sm:$0xff]  }
 0x8aa   :  { %7902 = vmatpush1.bf16.msra.mxu0 %v11843_v59  ;;  %v11873_v59 = vld [vmem:[#allocation17 + $0x288] ss:$16 sps:$4 sm:$0xff]  }
 0x8ab   :  { %7912 = vmatprep.subr.bf16.mxu0 %v11851_v60  ;;  %v11878_v60 = vld [vmem:[#allocation17 + $0x2a4] ss:$16 sps:$4 sm:$0xff]  }
 0x8c0   :  { %v6405_v8 = vpop.f32.mrb[32].mxu0  ;;  %v13282_v38 = vpop.f32.mrb[16].mxu1 }
 0x8c1   :  { %v10556_v28 = vadd.f32 %v6405_v8, %v4770_v58  ;;  %v6407_v49 = vpop.f32.mrb[33].mxu0  ;;  %v6571_v63 = vpop.f32.mrb[17].mxu1  ;;  %v11881_v58 = vld [vmem:[#allocation17 + $0x2ac] ss:$16 sps:$4 sm:$0xff]   ;;  %v11884_v8 = vld [vmem:[#allocation17 + $0x2c4] ss:$16 sps:$4 sm:$0xff]  }
 0x8c2   :  { %v10557_v2 = vadd.f32 %v6407_v49, %v4774_v62  ;;  %v10559_v10 = vadd.f32 %v6571_v63, %v4782_v61  ;;  %v6409_v3 = vpop.f32.mrb[34].mxu0  ;;  %v6573_v4 = vpop.f32.mrb[18].mxu1  ;;  %v11876_v62 = vld [vmem:[#allocation17 + $0x2a0] ss:$16 sps:$4 sm:$0xff]   ;;  %v11879_v61 = vld [vmem:[#allocation17 + $0x2a8] ss:$16 sps:$4 sm:$0xff]  }
 0x8c3   :  { %v6741_v5 = vmul.f32 0.70710677, %v10556_v28  ;;  %v6410_v13 = vpop.f32.mrb[35].mxu0  ;;  %v6574_v54 = vpop.f32.mrb[19].mxu1  ;;  %v6736_v18 = vmul.f32 0.5, %v10556_v28 }
 0x8c4   :  { %v6742_v31 = vmul.f32 0.70710677, %v10557_v2  ;;  %v6744_v7 = vmul.f32 0.70710677, %v10559_v10  ;;  %v6737_v20 = vmul.f32 0.5, %v10557_v2  ;;  %v6739_v22 = vmul.f32 0.5, %v10559_v10 }
 0x8c5   :  { %12151 = verf.f32 %v6741_v5  ;;  %v11887_v28 = vld [vmem:[#allocation17 + $0x2cc] ss:$16 sps:$4 sm:$0xff]   ;;  %v11882_v49 = vld [vmem:[#allocation17 + $0x2c0] ss:$16 sps:$4 sm:$0xff]   ;;  %v11885_v63 = vld [vmem:[#allocation17 + $0x2c8] ss:$16 sps:$4 sm:$0xff]  }
 0x8c6   :  { %12153 = verf.f32 %v6742_v31  ;;  %v11890_v2 = vld [vmem:[#allocation17 + $0x2e4] ss:$16 sps:$4 sm:$0xff]   ;;  %v11893_v10 = vld [vmem:[#allocation17 + $0x2ec] ss:$16 sps:$4 sm:$0xff]   ;;  %v11888_v3 = vld [vmem:[#allocation17 + $0x2e0] ss:$16 sps:$4 sm:$0xff]  }
 0x8c7   :  { %12155 = verf.f32 %v6744_v7  ;;  %v11891_v4 = vld [vmem:[#allocation17 + $0x2e8] ss:$16 sps:$4 sm:$0xff]   ;;  %v11896_v5 = vld [vmem:[#allocation17 + $0x304] ss:$16 sps:$4 sm:$0xff]   ;;  %v11899_v31 = vld [vmem:[#allocation17 + $0x30c] ss:$16 sps:$4 sm:$0xff]   ;;  %v4778_v7 = vrot.slane %v13274_v57, %v13133_v25 }
 0x8c8   :  { %v11894_v13 = vld [vmem:[#allocation17 + $0x300] ss:$16 sps:$4 sm:$0xff]   ;;  %v11897_v54 = vld [vmem:[#allocation17 + $0x308] ss:$16 sps:$4 sm:$0xff]  }
 0x8cf   :  { %v12152_v51 = vpop.eup %12151 }
 0x8d0   :  { %v6751_v15 = vadd.f32 1.0, %v12152_v51  ;;  %v12154_v16 = vpop.eup %12153  ;;  %v11902_v51 = vld [vmem:[#allocation17 + $0x324] ss:$16 sps:$4 sm:$0xff]  }
 0x8d1   :  { %v12156_v19 = vpop.eup %12155  ;;  %v6752_v45 = vadd.f32 1.0, %v12154_v16  ;;  %v10558_v16 = vadd.f32 %v13282_v38, %v4778_v7  ;;  %v11917_v38 = vld [vmem:[#allocation17 + $0x36c] ss:$16 sps:$4 sm:$0xff]   ;;  %v11962_v7 = vld [vmem:[#allocation17 + $0x464] ss:$16 sps:$4 sm:$0xff]  }
 0x8d2   :  { %v6756_v21 = vmul.f32 %v6751_v15, %v6736_v18  ;;  %v6754_v23 = vadd.f32 1.0, %v12156_v19  ;;  %v11905_v15 = vld [vmem:[#allocation17 + $0x32c] ss:$16 sps:$4 sm:$0xff]   ;;  %v11900_v18 = vld [vmem:[#allocation17 + $0x320] ss:$16 sps:$4 sm:$0xff]  }
 0x8d3   :  { %v6757_v24 = vmul.f32 %v6752_v45, %v6737_v20  ;;  %v11903_v19 = vld [vmem:[#allocation17 + $0x328] ss:$16 sps:$4 sm:$0xff]   ;;  %v11908_v20 = vld [vmem:[#allocation17 + $0x344] ss:$16 sps:$4 sm:$0xff]   ;;  %v11911_v45 = vld [vmem:[#allocation17 + $0x34c] ss:$16 sps:$4 sm:$0xff]  }
 0x8d4   :  { %v6759_v27 = vmul.f32 %v6754_v23, %v6739_v22  ;;  %v6761_v30 = vpack.c.bf16 %v6756_v21, %v6756_v21  ;;  %v6743_v21 = vmul.f32 0.70710677, %v10558_v16  ;;  %v4786_v22 = vrot.slane %v13274_v57, %v13152_v0  ;;  %v11906_v23 = vld [vmem:[#allocation17 + $0x340] ss:$16 sps:$4 sm:$0xff]   ;;  %v11920_v57 = vld [vmem:[#allocation17 + $0x384] ss:$16 sps:$4 sm:$0xff]  }
 0x8d5   :  { %v6762_v34 = vpack.c.bf16 %v6757_v24, %v6757_v24  ;;  %v11909_v24 = vld [vmem:[#allocation17 + $0x348] ss:$16 sps:$4 sm:$0xff]  }
 0x8d6   :  { %v6764_v14 = vpack.c.bf16 %v6759_v27, %v6759_v27  ;;  %v11914_v27 = vld [vmem:[#allocation17 + $0x364] ss:$16 sps:$4 sm:$0xff]   ;;  %12157 = verf.f32 %v6743_v21 }
 0x8d7   :  { %7780 = vmatprep.mubr.bf16.mxu1 %v6762_v34  ;;  %7903 = vmatprep.mubr.bf16.mxu0 %v6762_v34 }
 0x8d8   :  { %7781 = vmatmul.mubr.bf16.vlgmr.msra.gmra.mrb[20].mxu1 %v6761_v30  ;;  %7904 = vmatmul.mubr.bf16.vlgmr.msra.gmra.mrb[52].mxu0 %v6761_v30 }
 0x8d9   :  { %7790 = vmatpush1.bf16.msra.mxu1 %v11846_v36  ;;  %7913 = vmatpush1.bf16.msra.mxu0 %v11849_v37 }
 0x8da   :  { %7821 = vmatprep.mubr.bf16.mxu1 %v6764_v14  ;;  %7944 = vmatprep.mubr.bf16.mxu0 %v6764_v14  ;;  %v11915_v14 = vld [vmem:[#allocation17 + $0x368] ss:$16 sps:$4 sm:$0xff]  }
 0x8db   :  { %7791 = vmatprep.subr.bf16.mxu1 %v11854_v29  ;;  %7914 = vmatprep.subr.bf16.mxu0 %v11857_v40  ;;  %v11912_v40 = vld [vmem:[#allocation17 + $0x360] ss:$16 sps:$4 sm:$0xff]  }
 0x8dd   :  { %7792 = vmatpush1.bf16.msra.mxu1 %v11852_v35  ;;  %7915 = vmatpush1.bf16.msra.mxu0 %v11855_v41  ;;  %v11923_v35 = vld [vmem:[#allocation17 + $0x38c] ss:$16 sps:$4 sm:$0xff]  }
 0x8de   :  { %7793 = vmatprep.subr.bf16.mxu1 %v11860_v42  ;;  %7916 = vmatprep.subr.bf16.mxu0 %v11863_v33  ;;  %v11918_v42 = vld [vmem:[#allocation17 + $0x380] ss:$16 sps:$4 sm:$0xff]   ;;  %v11921_v33 = vld [vmem:[#allocation17 + $0x388] ss:$16 sps:$4 sm:$0xff]  }
 0x8e0   :  { %v10360_v47 = vpop.f32.mrb[36].mxu0 }
 0x8e1   :  { %v10361_v6 = vpop.f32.mrb[37].mxu0  ;;  %7794 = vmatpush1.bf16.msra.mxu1 %v11858_v32  ;;  %7917 = vmatpush1.bf16.msra.mxu0 %v11861_v43  ;;  %v11926_v32 = vld [vmem:[#allocation17 + $0x3a4] ss:$16 sps:$4 sm:$0xff]   ;;  %v11929_v43 = vld [vmem:[#allocation17 + $0x3ac] ss:$16 sps:$4 sm:$0xff]  }
 0x8e2   :  { %v13284_v50 = vadd.f32 %v10361_v6, %v10360_v47  ;;  %v10363_v26 = vpop.f32.mrb[38].mxu0  ;;  %7795 = vmatprep.subr.bf16.mxu1 %v11866_v44  ;;  %7918 = vmatprep.subr.bf16.mxu0 %v11869_v46  ;;  %v11924_v44 = vld [vmem:[#allocation17 + $0x3a0] ss:$16 sps:$4 sm:$0xff]   ;;  %v11927_v46 = vld [vmem:[#allocation17 + $0x3a8] ss:$16 sps:$4 sm:$0xff]  }
 0x8e3   :  { %v10364_v53 = vpop.f32.mrb[39].mxu0  ;;  %v11932_v47 = vld [vmem:[#allocation17 + $0x3c4] ss:$16 sps:$4 sm:$0xff]   ;;  %v11935_v6 = vld [vmem:[#allocation17 + $0x3cc] ss:$16 sps:$4 sm:$0xff]  }
 0x8e4   :  { %v6611_v37 = vadd.f32 %v13284_v50, %v4786_v22  ;;  %v12158_v50 = vpop.eup %12157  ;;  %v11930_v26 = vld [vmem:[#allocation17 + $0x3c0] ss:$16 sps:$4 sm:$0xff]   ;;  %v11938_v53 = vld [vmem:[#allocation17 + $0x3e4] ss:$16 sps:$4 sm:$0xff]  }
 0x8e5   :  { %7796 = vmatpush1.bf16.msra.mxu1 %v11864_v52  ;;  %7919 = vmatpush1.bf16.msra.mxu0 %v11867_v48  ;;  %v11933_v52 = vld [vmem:[#allocation17 + $0x3c8] ss:$16 sps:$4 sm:$0xff]   ;;  %v6753_v48 = vadd.f32 1.0, %v12158_v50  ;;  %v11966_v22 = vld [vmem:[#allocation17 + $0x480] ss:$16 sps:$4 sm:$0xff]  }
 0x8e6   :  { %7797 = vmatprep.subr.bf16.mxu1 %v11872_v55  ;;  %7920 = vmatprep.subr.bf16.mxu0 %v11875_v17  ;;  %v11941_v55 = vld [vmem:[#allocation17 + $0x3ec] ss:$16 sps:$4 sm:$0xff]   ;;  %v6738_v17 = vmul.f32 0.5, %v10558_v16 }
 0x8e9   :  { %7798 = vmatpush1.bf16.msra.mxu1 %v11870_v56  ;;  %7921 = vmatpush1.bf16.msra.mxu0 %v11873_v59  ;;  %v11936_v56 = vld [vmem:[#allocation17 + $0x3e0] ss:$16 sps:$4 sm:$0xff]   ;;  %v11939_v59 = vld [vmem:[#allocation17 + $0x3e8] ss:$16 sps:$4 sm:$0xff]  }
 0x8ea   :  { %7799 = vmatprep.subr.bf16.mxu1 %v11878_v60  ;;  %7922 = vmatprep.subr.bf16.mxu0 %v11881_v58  ;;  %v6758_v60 = vmul.f32 %v6753_v48, %v6738_v17  ;;  %v11944_v58 = vld [vmem:[#allocation17 + $0x404] ss:$16 sps:$4 sm:$0xff]   ;;  %v11995_v48 = vld [vmem:[#allocation20 + $0x14] ss:$8 sps:$4 sm:$0xff]  }
 0x8eb   :  { %v11996_v17 = vld [vmem:[#allocation20 + $0x20] ss:$8 sps:$4 sm:$0xff]  }
 0x8ed   :  { %7800 = vmatpush1.bf16.msra.mxu1 %v11876_v62  ;;  %7923 = vmatpush1.bf16.msra.mxu0 %v11879_v61  ;;  %v11947_v62 = vld [vmem:[#allocation17 + $0x40c] ss:$16 sps:$4 sm:$0xff]   ;;  %v11942_v61 = vld [vmem:[#allocation17 + $0x400] ss:$16 sps:$4 sm:$0xff]  }
 0x8ee   :  { %7801 = vmatprep.subr.bf16.mxu1 %v11884_v8  ;;  %7924 = vmatprep.subr.bf16.mxu0 %v11887_v28  ;;  %v11945_v8 = vld [vmem:[#allocation17 + $0x408] ss:$16 sps:$4 sm:$0xff]   ;;  %v6763_v28 = vpack.c.bf16 %v6758_v60, %v6758_v60 }
 0x8ef   :  { %v12004_v60 = vld [vmem:[#allocation20 + $0x44] ss:$8 sps:$4 sm:$0xff]  }
 0x8f1   :  { %7802 = vmatpush1.bf16.msra.mxu1 %v11882_v49  ;;  %7925 = vmatpush1.bf16.msra.mxu0 %v11885_v63  ;;  %v11950_v49 = vld [vmem:[#allocation17 + $0x424] ss:$16 sps:$4 sm:$0xff]   ;;  %v11953_v63 = vld [vmem:[#allocation17 + $0x42c] ss:$16 sps:$4 sm:$0xff]  }
 0x8f2   :  { %7803 = vmatprep.subr.bf16.mxu1 %v11890_v2  ;;  %7926 = vmatprep.subr.bf16.mxu0 %v11893_v10  ;;  %v11948_v2 = vld [vmem:[#allocation17 + $0x420] ss:$16 sps:$4 sm:$0xff]   ;;  %v11951_v10 = vld [vmem:[#allocation17 + $0x428] ss:$16 sps:$4 sm:$0xff]  }
 0x8f5   :  { %7804 = vmatpush1.bf16.msra.mxu1 %v11888_v3  ;;  %7927 = vmatpush1.bf16.msra.mxu0 %v11891_v4  ;;  %v11956_v3 = vld [vmem:[#allocation17 + $0x444] ss:$16 sps:$4 sm:$0xff]   ;;  %v11959_v4 = vld [vmem:[#allocation17 + $0x44c] ss:$16 sps:$4 sm:$0xff]  }
 0x8f6   :  { %7805 = vmatprep.subr.bf16.mxu1 %v11896_v5  ;;  %7928 = vmatprep.subr.bf16.mxu0 %v11899_v31  ;;  %v11954_v5 = vld [vmem:[#allocation17 + $0x440] ss:$16 sps:$4 sm:$0xff]   ;;  %v11957_v31 = vld [vmem:[#allocation17 + $0x448] ss:$16 sps:$4 sm:$0xff]  }
 0x8f9   :  { %7806 = vmatpush1.bf16.msra.mxu1 %v11894_v13  ;;  %7929 = vmatpush1.bf16.msra.mxu0 %v11897_v54  ;;  %v11965_v13 = vld [vmem:[#allocation17 + $0x46c] ss:$16 sps:$4 sm:$0xff]  }
 0x8fa   :  { %7807 = vmatprep.subr.bf16.mxu1 %v11902_v51  ;;  %7930 = vmatprep.subr.bf16.mxu0 %v11905_v15 }
 0x8fd   :  { %7808 = vmatpush1.bf16.msra.mxu1 %v11900_v18  ;;  %7931 = vmatpush1.bf16.msra.mxu0 %v11903_v19  ;;  %v11960_v18 = vld [vmem:[#allocation17 + $0x460] ss:$16 sps:$4 sm:$0xff]   ;;  %v11963_v19 = vld [vmem:[#allocation17 + $0x468] ss:$16 sps:$4 sm:$0xff]  }
 0x8fe   :  { %7809 = vmatprep.subr.bf16.mxu1 %v11908_v20  ;;  %7932 = vmatprep.subr.bf16.mxu0 %v11911_v45  ;;  %v11971_v45 = vld [vmem:[#allocation17 + $0x48c] ss:$16 sps:$4 sm:$0xff]  }
 0x900   :  { %v10382_v34 = vpop.f32.mrb[40].mxu0 }
 0x901   :  { %v10383_v36 = vpop.f32.mrb[41].mxu0  ;;  %7810 = vmatpush1.bf16.msra.mxu1 %v11906_v23  ;;  %7933 = vmatpush1.bf16.msra.mxu0 %v11909_v24  ;;  %v11969_v23 = vld [vmem:[#allocation17 + $0x488] ss:$16 sps:$4 sm:$0xff]   ;;  %v11974_v24 = vld [vmem:[#allocation17 + $0x4a4] ss:$16 sps:$4 sm:$0xff]  }
 0x902   :  { %v10384_v30 = vadd.f32 %v10383_v36, %v10382_v34  ;;  %v10385_v29 = vpop.f32.mrb[42].mxu0  ;;  %7811 = vmatprep.subr.bf16.mxu1 %v11914_v27  ;;  %7934 = vmatprep.subr.bf16.mxu0 %v11917_v38  ;;  %v11977_v27 = vld [vmem:[#allocation17 + $0x4ac] ss:$16 sps:$4 sm:$0xff]   ;;  %v11972_v38 = vld [vmem:[#allocation17 + $0x4a0] ss:$16 sps:$4 sm:$0xff]  }
 0x903   :  { %v10386_v0 = vpop.f32.mrb[43].mxu0  ;;  %v11975_v34 = vld [vmem:[#allocation17 + $0x4a8] ss:$16 sps:$4 sm:$0xff]   ;;  %v11980_v36 = vld [vmem:[#allocation17 + $0x4c4] ss:$16 sps:$4 sm:$0xff]  }
 0x904   :  { %v13292_v41 = vadd.f32 %v10384_v30, %v6611_v37  ;;  %v11983_v37 = vld [vmem:[#allocation17 + $0x4cc] ss:$16 sps:$4 sm:$0xff]   ;;  %v11978_v30 = vld [vmem:[#allocation17 + $0x4c0] ss:$16 sps:$4 sm:$0xff]   ;;  %v11981_v29 = vld [vmem:[#allocation17 + $0x4c8] ss:$16 sps:$4 sm:$0xff]  }
 0x905   :  { %7812 = vmatpush1.bf16.msra.mxu1 %v11912_v40  ;;  %7935 = vmatpush1.bf16.msra.mxu0 %v11915_v14  ;;  %v11986_v40 = vld [vmem:[#allocation17 + $0x4e4] ss:$16 sps:$4 sm:$0xff]   ;;  %v11989_v14 = vld [vmem:[#allocation17 + $0x4ec] ss:$16 sps:$4 sm:$0xff]   ;;  %v11984_v0 = vld [vmem:[#allocation17 + $0x4e0] ss:$16 sps:$4 sm:$0xff]  }
 0x906   :  { %7813 = vmatprep.subr.bf16.mxu1 %v11920_v57  ;;  %7936 = vmatprep.subr.bf16.mxu0 %v11923_v35  ;;  %v11987_v57 = vld [vmem:[#allocation17 + $0x4e8] ss:$16 sps:$4 sm:$0xff]  }
 0x907   :  { %v11992_v35 = vld [vmem:[#allocation20 + $0x4] ss:$8 sps:$4 sm:$0xff]  }
 0x909   :  { %7814 = vmatpush1.bf16.msra.mxu1 %v11918_v42  ;;  %7937 = vmatpush1.bf16.msra.mxu0 %v11921_v33 }
 0x90a   :  { %7815 = vmatprep.subr.bf16.mxu1 %v11926_v32  ;;  %7938 = vmatprep.subr.bf16.mxu0 %v11929_v43 }
 0x90d   :  { %7816 = vmatpush1.bf16.msra.mxu1 %v11924_v44  ;;  %7939 = vmatpush1.bf16.msra.mxu0 %v11927_v46 }
 0x90e   :  { %7817 = vmatprep.subr.bf16.mxu1 %v11932_v47  ;;  %7940 = vmatprep.subr.bf16.mxu0 %v11935_v6 }
 0x911   :  { %7818 = vmatpush1.bf16.msra.mxu1 %v11930_v26  ;;  %7941 = vmatpush1.bf16.msra.mxu0 %v11933_v52  ;;  %v11990_v26 = vld [vmem:[#allocation20] ss:$8 sps:$4 sm:$0xff]  }
 0x912   :  { %7819 = vmatprep.subr.bf16.mxu1 %v11938_v53  ;;  %7942 = vmatprep.subr.bf16.mxu0 %v11941_v55  ;;  %v11993_v53 = vld [vmem:[#allocation20 + $0x10] ss:$8 sps:$4 sm:$0xff]   ;;  %v11998_v55 = vld [vmem:[#allocation20 + $0x24] ss:$8 sps:$4 sm:$0xff]  }
 0x915   :  { %7820 = vmatpush1.bf16.msra.mxu1 %v11936_v56  ;;  %7943 = vmatpush1.bf16.msra.mxu0 %v11939_v59  ;;  %v12001_v56 = vld [vmem:[#allocation20 + $0x34] ss:$8 sps:$4 sm:$0xff]   ;;  %v11999_v59 = vld [vmem:[#allocation20 + $0x30] ss:$8 sps:$4 sm:$0xff]  }
 0x916   :  { %7830 = vmatprep.subr.bf16.mxu1 %v11944_v58  ;;  %7953 = vmatprep.subr.bf16.mxu0 %v11947_v62  ;;  %v12002_v58 = vld [vmem:[#allocation20 + $0x40] ss:$8 sps:$4 sm:$0xff]   ;;  %v12007_v62 = vld [vmem:[#allocation20 + $0x54] ss:$8 sps:$4 sm:$0xff]  }
 0x918   :  { %7822 = vmatmul.mubr.bf16.vlgmr.msra.gmra.mrb[20].mxu1 %v6763_v28  ;;  %7945 = vmatmul.mubr.bf16.vlgmr.msra.gmra.mrb[52].mxu0 %v6763_v28  ;;  %v12008_v28 = vld [vmem:[#allocation20 + $0x60] ss:$8 sps:$4 sm:$0xff]  }
 0x919   :  { %7831 = vmatpush1.bf16.msra.mxu1 %v11942_v61  ;;  %7954 = vmatpush1.bf16.msra.mxu0 %v11945_v8  ;;  %v12005_v61 = vld [vmem:[#allocation20 + $0x50] ss:$8 sps:$4 sm:$0xff]   ;;  %v12010_v8 = vld [vmem:[#allocation20 + $0x64] ss:$8 sps:$4 sm:$0xff]  }
 0x91a   :  { %7832 = vmatprep.subr.bf16.mxu1 %v11950_v49  ;;  %7955 = vmatprep.subr.bf16.mxu0 %v11953_v63  ;;  %v12013_v49 = vld [vmem:[#allocation20 + $0x74] ss:$8 sps:$4 sm:$0xff]   ;;  %v12011_v63 = vld [vmem:[#allocation20 + $0x70] ss:$8 sps:$4 sm:$0xff]  }
 0x91b   :  { %7862 = vmatprep.mubr.bf16.mxu1 %v12810_v39  ;;  %7985 = vmatprep.mubr.bf16.mxu0 %v12810_v39  ;;  %v11968_v39 = vld [vmem:[#allocation17 + $0x484] ss:$16 sps:$4 sm:$0xff]  }
 0x91d   :  { %7833 = vmatpush1.bf16.msra.mxu1 %v11948_v2  ;;  %7956 = vmatpush1.bf16.msra.mxu0 %v11951_v10  ;;  %v12016_v2 = vld [vmem:[#allocation20 + $0x84] ss:$8 sps:$4 sm:$0xff]   ;;  %v12014_v10 = vld [vmem:[#allocation20 + $0x80] ss:$8 sps:$4 sm:$0xff]  }
 0x91e   :  { %7834 = vmatprep.subr.bf16.mxu1 %v11956_v3  ;;  %7957 = vmatprep.subr.bf16.mxu0 %v11959_v4  ;;  %v12019_v3 = vld [vmem:[#allocation20 + $0x94] ss:$8 sps:$4 sm:$0xff]   ;;  %v12017_v4 = vld [vmem:[#allocation20 + $0x90] ss:$8 sps:$4 sm:$0xff]  }
 0x920   :  { %v10404_v54 = vpop.f32.mrb[44].mxu0 }
 0x921   :  { %v10405_v51 = vpop.f32.mrb[45].mxu0  ;;  %7835 = vmatpush1.bf16.msra.mxu1 %v11954_v5  ;;  %7958 = vmatpush1.bf16.msra.mxu0 %v11957_v31  ;;  %v12022_v5 = vld [vmem:[#allocation20 + $0xa4] ss:$8 sps:$4 sm:$0xff]   ;;  %v12020_v31 = vld [vmem:[#allocation20 + $0xa0] ss:$8 sps:$4 sm:$0xff]  }
 0x922   :  { %v10406_v15 = vadd.f32 %v10405_v51, %v10404_v54  ;;  %v10407_v16 = vpop.f32.mrb[46].mxu0  ;;  %7836 = vmatprep.subr.bf16.mxu1 %v11962_v7  ;;  %7959 = vmatprep.subr.bf16.mxu0 %v11965_v13  ;;  %v12025_v7 = vld [vmem:[#allocation20 + $0xb4] ss:$8 sps:$4 sm:$0xff]   ;;  %v12023_v13 = vld [vmem:[#allocation20 + $0xb0] ss:$8 sps:$4 sm:$0xff]  }
 0x923   :  { %v10408_v20 = vpop.f32.mrb[47].mxu0  ;;  %v12028_v54 = vld [vmem:[#allocation20 + $0xc4] ss:$8 sps:$4 sm:$0xff]   ;;  %v12026_v51 = vld [vmem:[#allocation20 + $0xc0] ss:$8 sps:$4 sm:$0xff]  }
 0x924   :  { %v6691_v21 = vadd.f32 %v10406_v15, %v13292_v41  ;;  %v12031_v15 = vld [vmem:[#allocation20 + $0xd4] ss:$8 sps:$4 sm:$0xff]   ;;  %v12029_v16 = vld [vmem:[#allocation20 + $0xd0] ss:$8 sps:$4 sm:$0xff]  }
 0x925   :  { %7837 = vmatpush1.bf16.msra.mxu1 %v11960_v18  ;;  %7960 = vmatpush1.bf16.msra.mxu0 %v11963_v19  ;;  %v12034_v18 = vld [vmem:[#allocation20 + $0xe4] ss:$8 sps:$4 sm:$0xff]   ;;  %v12032_v19 = vld [vmem:[#allocation20 + $0xe0] ss:$8 sps:$4 sm:$0xff]   ;;  %v12037_v20 = vld [vmem:[#allocation20 + $0xf4] ss:$8 sps:$4 sm:$0xff]  }
 0x926   :  { %7838 = vmatprep.subr.bf16.mxu1 %v11968_v39  ;;  %7961 = vmatprep.subr.bf16.mxu0 %v11971_v45  ;;  %v12035_v39 = vld [vmem:[#allocation20 + $0xf0] ss:$8 sps:$4 sm:$0xff]   ;;  %v12040_v45 = vld [vmem:[#allocation20 + $0x104] ss:$8 sps:$4 sm:$0xff]  }
 0x929   :  { %7839 = vmatpush1.bf16.msra.mxu1 %v11966_v22  ;;  %7962 = vmatpush1.bf16.msra.mxu0 %v11969_v23  ;;  %v12087_v22 = vld [vmem:[#allocation23] sm:$0xff]   ;;  %v12088_v23 = vld [vmem:[#allocation23 + $0x48] sm:$0xff]  }
 0x92a   :  { %7840 = vmatprep.subr.bf16.mxu1 %v11974_v24  ;;  %7963 = vmatprep.subr.bf16.mxu0 %v11977_v27  ;;  %v12089_v24 = vld [vmem:[#allocation23 + $0x8] sm:$0xff]   ;;  %v13297_v27 = vld [vmem:[#allocation19] sm:$0xf] }
 0x92d   :  { %7841 = vmatpush1.bf16.msra.mxu1 %v11972_v38  ;;  %7964 = vmatpush1.bf16.msra.mxu0 %v11975_v34  ;;  %v6931_v38 = vrot.slane %v13297_v27, %v13094_v9  ;;  %v6935_v34 = vrot.slane %v13297_v27, %v13099_v11 }
 0x92e   :  { %7842 = vmatprep.subr.bf16.mxu1 %v11980_v36  ;;  %7965 = vmatprep.subr.bf16.mxu0 %v11983_v37  ;;  %v6943_v36 = vrot.slane %v13297_v27, %v13102_v12 }
 0x931   :  { %7843 = vmatpush1.bf16.msra.mxu1 %v11978_v30  ;;  %7966 = vmatpush1.bf16.msra.mxu0 %v11981_v29 }
 0x932   :  { %7844 = vmatprep.subr.bf16.mxu1 %v11986_v40  ;;  %7967 = vmatprep.subr.bf16.mxu0 %v11989_v14 }
 0x935   :  { %7845 = vmatpush1.bf16.msra.mxu1 %v11984_v0  ;;  %7968 = vmatpush1.bf16.msra.mxu0 %v11987_v57 }
 0x936   :  { %8414 = vmatprep.subr.bf16.mxu1 %v11992_v35 }
 0x940   :  { %v6730_v41 = vpop.f32.mrb[48].mxu0 }
 0x941   :  { %v6731_v42 = vadd.f32 %v6730_v41, %v6691_v21  ;;  %v10490_v33 = vpop.f32.mrb[49].mxu0  ;;  %v12086_v21 = vld [vmem:[#allocation23 + $0x40] sm:$0xff]  }
 0x942   :  { %v6733_v32 = vpop.f32.mrb[50].mxu0  ;;  %10419 = vmatprep.subr.bf16.mxu0 %v12086_v21  ;;  %v12068_v21 = vld [vmem:[#allocation20 + $0x1a0] ss:$8 sps:$4 sm:$0xff]  }
 0x943   :  { %v6745_v43 = vmul.f32 0.70710677, %v6731_v42  ;;  %v10491_v44 = vpop.f32.mrb[51].mxu0  ;;  %v6740_v47 = vmul.f32 0.5, %v6731_v42 }
 0x945   :  { %12159 = verf.f32 %v6745_v43 }
 0x94f   :  { %v12160_v46 = vpop.eup %12159 }
 0x950   :  { %v6755_v6 = vadd.f32 1.0, %v12160_v46 }
 0x952   :  { %v6760_v50 = vmul.f32 %v6755_v6, %v6740_v47 }
 0x954   :  { %v6765_v52 = vpack.c.bf16 %v6760_v50, %v6760_v50 }
 0x956   :  { %7863 = vmatmul.mubr.bf16.vlgmr.msra.gmra.mrb[20].mxu1 %v6765_v52  ;;  %7986 = vmatmul.mubr.bf16.vlgmr.msra.gmra.mrb[52].mxu0 %v6765_v52 }
 0x957   :  { %8415 = vmatpush1.bf16.msra.mxu1 %v11990_v26  ;;  %10420 = vmatpush3.bf16.msra.mxu0 %v12087_v22  ;;  %v12073_v22 = vld [vmem:[#allocation20 + $0x1b4] ss:$8 sps:$4 sm:$0xff]  }
 0x958   :  { %8416 = vmatprep.subr.bf16.mxu1 %v11995_v48  ;;  %10421 = vmatprep.subr.bf16.mxu0 %v12088_v23  ;;  %v12071_v23 = vld [vmem:[#allocation20 + $0x1b0] ss:$8 sps:$4 sm:$0xff]  }
 0x95b   :  { %8417 = vmatpush1.bf16.msra.mxu1 %v11993_v53  ;;  %10422 = vmatpush3.bf16.msra.mxu0 %v12089_v24  ;;  %v12074_v24 = vld [vmem:[#allocation20 + $0x1c0] ss:$8 sps:$4 sm:$0xff]  }
 0x95c   :  { %8418 = vmatprep.subr.bf16.mxu1 %v11998_v55 }
 0x95f   :  { %8419 = vmatpush1.bf16.msra.mxu1 %v11996_v17 }
 0x960   :  { %8420 = vmatprep.subr.bf16.mxu1 %v12001_v56 }
 0x963   :  { %8421 = vmatpush1.bf16.msra.mxu1 %v11999_v59 }
 0x964   :  { %8422 = vmatprep.subr.bf16.mxu1 %v12004_v60  ;;  %v12038_v60 = vld [vmem:[#allocation20 + $0x100] ss:$8 sps:$4 sm:$0xff]  }
 0x967   :  { %8423 = vmatpush1.bf16.msra.mxu1 %v12002_v58 }
 0x968   :  { %8424 = vmatprep.subr.bf16.mxu1 %v12007_v62  ;;  %v12043_v62 = vld [vmem:[#allocation20 + $0x114] ss:$8 sps:$4 sm:$0xff]  }
 0x96b   :  { %8425 = vmatpush1.bf16.msra.mxu1 %v12005_v61 }
 0x96c   :  { %8426 = vmatprep.subr.bf16.mxu1 %v12010_v8  ;;  %v12041_v8 = vld [vmem:[#allocation20 + $0x110] ss:$8 sps:$4 sm:$0xff]  }
 0x96f   :  { %8427 = vmatpush1.bf16.msra.mxu1 %v12008_v28  ;;  %v12046_v28 = vld [vmem:[#allocation20 + $0x124] ss:$8 sps:$4 sm:$0xff]  }
 0x970   :  { %8428 = vmatprep.subr.bf16.mxu1 %v12013_v49  ;;  %v12044_v49 = vld [vmem:[#allocation20 + $0x120] ss:$8 sps:$4 sm:$0xff]  }
 0x973   :  { %8429 = vmatpush1.bf16.msra.mxu1 %v12011_v63  ;;  %v12049_v63 = vld [vmem:[#allocation20 + $0x134] ss:$8 sps:$4 sm:$0xff]  }
 0x974   :  { %8430 = vmatprep.subr.bf16.mxu1 %v12016_v2  ;;  %v12047_v2 = vld [vmem:[#allocation20 + $0x130] ss:$8 sps:$4 sm:$0xff]  }
 0x977   :  { %8431 = vmatpush1.bf16.msra.mxu1 %v12014_v10  ;;  %v12052_v10 = vld [vmem:[#allocation20 + $0x144] ss:$8 sps:$4 sm:$0xff]  }
 0x978   :  { %8432 = vmatprep.subr.bf16.mxu1 %v12019_v3  ;;  %v12050_v3 = vld [vmem:[#allocation20 + $0x140] ss:$8 sps:$4 sm:$0xff]  }
 0x97b   :  { %8433 = vmatpush1.bf16.msra.mxu1 %v12017_v4  ;;  %v12055_v4 = vld [vmem:[#allocation20 + $0x154] ss:$8 sps:$4 sm:$0xff]  }
 0x97c   :  { %8434 = vmatprep.subr.bf16.mxu1 %v12022_v5  ;;  %v12053_v5 = vld [vmem:[#allocation20 + $0x150] ss:$8 sps:$4 sm:$0xff]  }
 0x97f   :  { %8435 = vmatpush1.bf16.msra.mxu1 %v12020_v31  ;;  %v12058_v31 = vld [vmem:[#allocation20 + $0x164] ss:$8 sps:$4 sm:$0xff]  }
 0x980   :  { %8436 = vmatprep.subr.bf16.mxu1 %v12025_v7  ;;  %v12056_v7 = vld [vmem:[#allocation20 + $0x160] ss:$8 sps:$4 sm:$0xff]  }
 0x983   :  { %8437 = vmatpush1.bf16.msra.mxu1 %v12023_v13  ;;  %v12061_v13 = vld [vmem:[#allocation20 + $0x174] ss:$8 sps:$4 sm:$0xff]  }
 0x984   :  { %8438 = vmatprep.subr.bf16.mxu1 %v12028_v54  ;;  %v12059_v54 = vld [vmem:[#allocation20 + $0x170] ss:$8 sps:$4 sm:$0xff]  }
 0x987   :  { %8439 = vmatpush1.bf16.msra.mxu1 %v12026_v51  ;;  %v12064_v51 = vld [vmem:[#allocation20 + $0x184] ss:$8 sps:$4 sm:$0xff]  }
 0x988   :  { %8440 = vmatprep.subr.bf16.mxu1 %v12031_v15  ;;  %v6939_v15 = vrot.slane %v13297_v27, %v13133_v25  ;;  %v12076_v25 = vld [vmem:[#allocation20 + $0x1c4] ss:$8 sps:$4 sm:$0xff]   ;;  %v12079_v27 = vld [vmem:[#allocation20 + $0x1d4] ss:$8 sps:$4 sm:$0xff]  }
 0x98b   :  { %8441 = vmatpush1.bf16.msra.mxu1 %v12029_v16  ;;  %v12062_v16 = vld [vmem:[#allocation20 + $0x180] ss:$8 sps:$4 sm:$0xff]  }
 0x98c   :  { %8442 = vmatprep.subr.bf16.mxu1 %v12034_v18  ;;  %v12067_v18 = vld [vmem:[#allocation20 + $0x194] ss:$8 sps:$4 sm:$0xff]  }
 0x98f   :  { %8443 = vmatpush1.bf16.msra.mxu1 %v12032_v19 }
 0x990   :  { %8444 = vmatprep.subr.bf16.mxu1 %v12037_v20  ;;  %v12065_v20 = vld [vmem:[#allocation20 + $0x190] ss:$8 sps:$4 sm:$0xff]  }
 0x993   :  { %8445 = vmatpush1.bf16.msra.mxu1 %v12035_v39  ;;  %v12070_v39 = vld [vmem:[#allocation20 + $0x1a4] ss:$8 sps:$4 sm:$0xff]  }
 0x994   :  { %8455 = vmatprep.subr.bf16.mxu1 %v12040_v45 }
 0xa29   :  { %v7864_v37 = vpop.f32.mrb[20].mxu1  ;;  %v13305_v30 = vpop.f32.mrb[52].mxu0 }
 0xa2a   :  { %v10560_v29 = vadd.f32 %v7864_v37, %v6931_v38  ;;  %v7866_v40 = vpop.f32.mrb[21].mxu1  ;;  %v7989_v14 = vpop.f32.mrb[53].mxu0  ;;  %v10562_v19 = vadd.f32 %v13305_v30, %v6939_v15  ;;  %v12077_v38 = vld [vmem:[#allocation20 + $0x1d0] ss:$8 sps:$4 sm:$0xff]   ;;  %v12080_v37 = vld [vmem:[#allocation20 + $0x1e0] ss:$8 sps:$4 sm:$0xff]  }
 0xa2b   :  { %v10561_v0 = vadd.f32 %v7866_v40, %v6935_v34  ;;  %v10563_v57 = vadd.f32 %v7989_v14, %v6943_v36  ;;  %v7868_v35 = vpop.f32.mrb[22].mxu1  ;;  %v7991_v41 = vpop.f32.mrb[54].mxu0  ;;  %v12082_v34 = vld [vmem:[#allocation20 + $0x1e4] ss:$8 sps:$4 sm:$0xff]   ;;  %v12083_v14 = vld [vmem:[#allocation20 + $0x1f0] ss:$8 sps:$4 sm:$0xff]  }
 0xa2c   :  { %v7998_v42 = vmul.f32 0.70710677, %v10560_v29  ;;  %v7869_v43 = vpop.f32.mrb[23].mxu1  ;;  %v7992_v44 = vpop.f32.mrb[55].mxu0  ;;  %v7994_v6 = vmul.f32 0.5, %v10560_v29  ;;  %v7996_v40 = vmul.f32 0.5, %v10562_v19 }
 0xa2d   :  { %v7999_v33 = vmul.f32 0.70710677, %v10561_v0  ;;  %v8001_v32 = vmul.f32 0.70710677, %v10563_v57  ;;  %v7995_v26 = vmul.f32 0.5, %v10561_v0  ;;  %v7997_v53 = vmul.f32 0.5, %v10563_v57 }
 0xa2e   :  { %12161 = verf.f32 %v7998_v42  ;;  %v8000_v45 = vmul.f32 0.70710677, %v10562_v19  ;;  %v12085_v29 = vld [vmem:[#allocation20 + $0x1f4] ss:$8 sps:$4 sm:$0xff]   ;;  %v12095_v43 = vld [vmem:[#allocation23 + $0x20] sm:$0xff]   ;;  %v12096_v44 = vld [vmem:[#allocation23 + $0x68] sm:$0xff]  }
 0xa2f   :  { %12163 = verf.f32 %v7999_v33  ;;  %v12090_v35 = vld [vmem:[#allocation23 + $0x50] sm:$0xff]   ;;  %v12092_v42 = vld [vmem:[#allocation23 + $0x58] sm:$0xff]   ;;  %v12109_v15 = vld [vmem:[%s13397_s29 + $0x38] sm:$0xff]  }
 0xa30   :  { %12165 = verf.f32 %v8001_v32  ;;  %v12091_v41 = vld [vmem:[#allocation23 + $0x10] sm:$0xff]   ;;  %10423 = vmatprep.subr.bf16.mxu0 %v12090_v35  ;;  %v12093_v33 = vld [vmem:[#allocation23 + $0x18] sm:$0xff]   ;;  %v12094_v32 = vld [vmem:[#allocation23 + $0x60] sm:$0xff]  }
 0xa31   :  { %12167 = verf.f32 %v8000_v45  ;;  %10424 = vmatpush3.bf16.msra.mxu0 %v12091_v41 }
 0xa32   :  { %10425 = vmatprep.subr.bf16.mxu0 %v12092_v42 }
 0xa35   :  { %10426 = vmatpush3.bf16.msra.mxu0 %v12093_v33 }
 0xa36   :  { %10427 = vmatprep.subr.bf16.mxu0 %v12094_v32 }
 0xa38   :  { %v12162_v46 = vpop.eup %12161 }
 0xa39   :  { %v8006_v12 = vadd.f32 1.0, %v12162_v46  ;;  %v12164_v47 = vpop.eup %12163  ;;  %10428 = vmatpush3.bf16.msra.mxu0 %v12095_v43  ;;  %v12097_v46 = vld [vmem:[#allocation23 + $0x28] sm:$0xff]  }
 0xa3a   :  { %v12166_v50 = vpop.eup %12165  ;;  %v8007_v52 = vadd.f32 1.0, %v12164_v47  ;;  %10429 = vmatprep.subr.bf16.mxu0 %v12096_v44  ;;  %v12099_v47 = vld [vmem:[#allocation23 + $0x30] sm:$0xff]  }
 0xa3b   :  { %v8010_v48 = vmul.f32 %v8006_v12, %v7994_v6  ;;  %v8009_v55 = vadd.f32 1.0, %v12166_v50  ;;  %v12168_v36 = vpop.eup %12167  ;;  %v12098_v12 = vld [vmem:[#allocation23 + $0x70] sm:$0xff]   ;;  %v12100_v6 = vld [vmem:[#allocation23 + $0x78] sm:$0xff]  }
 0xa3c   :  { %v8011_v17 = vmul.f32 %v8007_v52, %v7995_v26  ;;  %v8008_v30 = vadd.f32 1.0, %v12168_v36  ;;  %v12101_v50 = vld [vmem:[#allocation23 + $0x38] sm:$0xff]  }
 0xa3d   :  { %v8013_v56 = vmul.f32 %v8009_v55, %v7997_v53  ;;  %v8014_v58 = vpack.c.bf16 %v8010_v48, %v8010_v48  ;;  %10430 = vmatpush3.bf16.msra.mxu0 %v12097_v46  ;;  %v8082_v26 = vld [vmem:[#allocation22] sm:$0x3]  ;;  %v12111_v36 = vld [vmem:[%s13398_s4 + $0x8] sm:$0xff]   ;;  %v12114_v46 = vld [vmem:[%s13399_s26] sm:$0xff]  }
 0xa3e   :  { %v8015_v59 = vpack.c.bf16 %v8011_v17, %v8011_v17  ;;  %v8012_v0 = vmul.f32 %v8008_v30, %v7996_v40  ;;  %10431 = vmatprep.subr.bf16.mxu0 %v12098_v12  ;;  %v8087_v52 = vrot.slane %v8082_v26, %v13094_v9  ;;  %v8091_v48 = vrot.slane %v8082_v26, %v13099_v11  ;;  %v12113_v30 = vld [vmem:[%s13398_s4 + $0x18] sm:$0xff]   ;;  %v12115_v12 = vld [vmem:[%s13399_s26 + $0x8] sm:$0xff]  }
 0xa3f   :  { %v8017_v61 = vpack.c.bf16 %v8013_v56, %v8013_v56 }
 0xa40   :  { %8446 = vmatprep.mubr.bf16.mxu1 %v8015_v59  ;;  %v8016_v57 = vpack.c.bf16 %v8012_v0, %v8012_v0 }
 0xa41   :  { %8447 = vmatmul.mubr.bf16.vlgmr.msra.gmra.mrb[24].mxu1 %v8014_v58  ;;  %10432 = vmatpush3.bf16.msra.mxu0 %v12099_v47  ;;  %v10234_v47 = vld [vmem:[#allocation28] ss:$0 sm:$0xff] }
 0xa42   :  { %8456 = vmatpush1.bf16.msra.mxu1 %v12038_v60  ;;  %8487 = vmatprep.mubr.bf16.mxu1 %v8017_v61 }
 0xa43   :  { %8457 = vmatprep.subr.bf16.mxu1 %v12043_v62  ;;  %10433 = vmatprep.subr.bf16.mxu0 %v12100_v6 }
 0xa45   :  { %10434 = vmatpush3.bf16.msra.mxu0 %v12101_v50 }
 0xa46   :  { %8458 = vmatpush1.bf16.msra.mxu1 %v12041_v8  ;;  %10492 = vmatprep.subr.bf16.mxu0 %v12808_v1 }
 0xa47   :  { %8459 = vmatprep.subr.bf16.mxu1 %v12046_v28 }
 0xa4a   :  { %8460 = vmatpush1.bf16.msra.mxu1 %v12044_v49 }
 0xa4b   :  { %8461 = vmatprep.subr.bf16.mxu1 %v12049_v63 }
 0xa4e   :  { %8462 = vmatpush1.bf16.msra.mxu1 %v12047_v2 }
 0xa4f   :  { %8463 = vmatprep.subr.bf16.mxu1 %v12052_v10 }
 0xa52   :  { %8464 = vmatpush1.bf16.msra.mxu1 %v12050_v3  ;;  %v12102_v3 = vld [vmem:[%s13397_s29] sm:$0xff]  }
 0xa53   :  { %8465 = vmatprep.subr.bf16.mxu1 %v12055_v4 }
 0xa56   :  { %8466 = vmatpush1.bf16.msra.mxu1 %v12053_v5  ;;  %v12103_v5 = vld [vmem:[%s13397_s29 + $0x8] sm:$0xff]  }
 0xa57   :  { %8467 = vmatprep.subr.bf16.mxu1 %v12058_v31  ;;  %v12104_v31 = vld [vmem:[%s13397_s29 + $0x10] sm:$0xff]  }
 0xa5a   :  { %8468 = vmatpush1.bf16.msra.mxu1 %v12056_v7  ;;  %v12105_v7 = vld [vmem:[%s13397_s29 + $0x18] sm:$0xff]  }
 0xa5b   :  { %8469 = vmatprep.subr.bf16.mxu1 %v12061_v13  ;;  %v12106_v13 = vld [vmem:[%s13397_s29 + $0x20] sm:$0xff]  }
 0xa5e   :  { %8470 = vmatpush1.bf16.msra.mxu1 %v12059_v54  ;;  %v12107_v54 = vld [vmem:[%s13397_s29 + $0x28] sm:$0xff]  }
 0xa5f   :  { %8471 = vmatprep.subr.bf16.mxu1 %v12064_v51  ;;  %v12108_v51 = vld [vmem:[%s13397_s29 + $0x30] sm:$0xff]  }
 0xa62   :  { %8472 = vmatpush1.bf16.msra.mxu1 %v12062_v16 }
 0xa63   :  { %8473 = vmatprep.subr.bf16.mxu1 %v12067_v18  ;;  %v10208_v18 = vld [vmem:[#allocation25] ss:$0 sm:$0xff] }
 0xa66   :  { %8474 = vmatpush1.bf16.msra.mxu1 %v12065_v20 }
 0xa67   :  { %8475 = vmatprep.subr.bf16.mxu1 %v12070_v39 }
 0xa6a   :  { %8476 = vmatpush1.bf16.msra.mxu1 %v12068_v21 }
 0xa6b   :  { %8477 = vmatprep.subr.bf16.mxu1 %v12073_v22 }
 0xa6e   :  { %8478 = vmatpush1.bf16.msra.mxu1 %v12071_v23 }
 0xa6f   :  { %8479 = vmatprep.subr.bf16.mxu1 %v12076_v25 }
 0xa72   :  { %8480 = vmatpush1.bf16.msra.mxu1 %v12074_v24 }
 0xa73   :  { %8481 = vmatprep.subr.bf16.mxu1 %v12079_v27 }
 0xa76   :  { %8482 = vmatpush1.bf16.msra.mxu1 %v12077_v38 }
 0xa77   :  { %8483 = vmatprep.subr.bf16.mxu1 %v12082_v34  ;;  %v12110_v34 = vld [vmem:[%s13398_s4] sm:$0xff]  }
 0xa7a   :  { %8484 = vmatpush1.bf16.msra.mxu1 %v12080_v37  ;;  %v12112_v37 = vld [vmem:[%s13398_s4 + $0x10] sm:$0xff]  }
 0xa7b   :  { %8485 = vmatprep.subr.bf16.mxu1 %v12085_v29  ;;  %v10225_v29 = vld [vmem:[#allocation26] ss:$0 sm:$0xff] }
 0xa7e   :  { %8486 = vmatpush1.bf16.msra.mxu1 %v12083_v14 }
 0xa81   :  { %8488 = vmatmul.mubr.bf16.vlgmr.msra.gmra.mrb[24].mxu1 %v8016_v57 }
 0xb54   :  { %v8489_v53 = vpop.f32.mrb[24].mxu1 }
 0xb55   :  { %v10564_v55 = vadd.f32 %v8489_v53, %v8087_v52  ;;  %v8491_v17 = vpop.f32.mrb[25].mxu1 }
 0xb56   :  { %v10565_v56 = vadd.f32 %v8491_v17, %v8091_v48  ;;  %v8493_v59 = vpop.f32.mrb[26].mxu1 }
 0xb57   :  { %v8498_v60 = vmul.f32 0.70710677, %v10564_v55  ;;  %v8494_v58 = vpop.f32.mrb[27].mxu1  ;;  %v8496_v28 = vmul.f32 0.5, %v10564_v55 }
 0xb58   :  { %v8499_v62 = vmul.f32 0.70710677, %v10565_v56  ;;  %v8497_v9 = vmul.f32 0.5, %v10565_v56  ;;  %v12116_v58 = vld [vmem:[%s13400_s1] sm:$0xff]  }
 0xb59   :  { %12169 = verf.f32 %v8498_v60 }
 0xb5a   :  { %12171 = verf.f32 %v8499_v62  ;;  %v10240_v62 = vld [vmem:[#allocation29] ss:$0 sm:$0xff] }
 0xb63   :  { %v12170_v61 = vpop.eup %12169 }
 0xb64   :  { %v12172_v8 = vpop.eup %12171  ;;  %v8502_v49 = vadd.f32 1.0, %v12170_v61 }
 0xb65   :  { %v8503_v63 = vadd.f32 1.0, %v12172_v8 }
 0xb66   :  { %v8504_v11 = vmul.f32 %v8502_v49, %v8496_v28 }
 0xb67   :  { %v8505_v2 = vmul.f32 %v8503_v63, %v8497_v9 }
 0xb68   :  { %v8506_v4 = vpack.c.bf16 %v8504_v11, %v8504_v11 }
 0xb69   :  { %v8507_v10 = vpack.c.bf16 %v8505_v2, %v8505_v2 }
 0xb6b   :  { %8675 = vmatprep.mubr.bf16.mxu0 %v8507_v10 }
 0xb6c   :  { %8676 = vmatmul.mubr.bf16.vlgmr.msra.gmra.mrb[56].mxu0 %v8506_v4 }
 0xb6d   :  { %10493 = vmatpush3.bf16.msra.mxu0 %v12102_v3  ;;  %10508 = vmatprep.mubr.msk.bf16.mxu0 %vm12809_vm0, %v12808_v1 }
 0xb6e   :  { %10494 = vmatprep.subr.bf16.mxu0 %v12808_v1 }
 0xb71   :  { %10495 = vmatpush3.bf16.msra.mxu0 %v12103_v5  ;;  %v9032_v5 = vld [vmem:[%s13401_s15] sm:$0xf] }
 0xb72   :  { %10496 = vmatprep.subr.bf16.mxu0 %v12808_v1 }
 0xb75   :  { %10497 = vmatpush3.bf16.msra.mxu0 %v12104_v31  ;;  %v9046_v31 = vsel %vm9044_vm4, %v9032_v5, 0 }
 0xb76   :  { %10498 = vmatprep.subr.bf16.mxu0 %v12808_v1 }
 0xb79   :  { %10499 = vmatpush3.bf16.msra.mxu0 %v12105_v7  ;;  %v10244_v7 = vld [vmem:[#allocation31] ss:$0 sm:$0xff] }
 0xb7a   :  { %10500 = vmatprep.subr.bf16.mxu0 %v12808_v1 }
 0xb7d   :  { %10501 = vmatpush3.bf16.msra.mxu0 %v12106_v13 }
 0xb7e   :  { %10502 = vmatprep.subr.bf16.mxu0 %v12808_v1 }
 0xb81   :  { %10503 = vmatpush3.bf16.msra.mxu0 %v12107_v54 }
 0xb82   :  { %10504 = vmatprep.subr.bf16.mxu0 %v12808_v1 }
 0xb85   :  { %10505 = vmatpush3.bf16.msra.mxu0 %v12108_v51 }
 0xb86   :  { %10506 = vmatprep.subr.bf16.mxu0 %v12808_v1 }
 0xb89   :  { %10507 = vmatpush3.bf16.msra.mxu0 %v12109_v15 }
 0xb8a   :  { %10512 = vmatprep.subr.bf16.mxu0 %v12808_v1 }
 0xc3f   :  { %v10435_v16 = vpop.f32.mrb[56].mxu0 }
 0xc40   :  { %v10436_v19 = vpop.f32.mrb[57].mxu0 }
 0xc41   :  { %v10437_v20 = vadd.f32 %v10436_v19, %v10435_v16  ;;  %v10438_v39 = vpop.f32.mrb[58].mxu0 }
 0xc42   :  { %v10439_v45 = vpop.f32.mrb[59].mxu0 }
 0xc43   :  { %v8678_v21 = vadd.f32 %v10437_v20, %v10208_v18 }
 0xc45   :  { %v8684_v22 = vmul.f32 0.70710677, %v8678_v21  ;;  %v8683_v25 = vmul.f32 0.5, %v8678_v21 }
 0xc47   :  { %12173 = verf.f32 %v8684_v22  ;;  %v10247_v22 = vld [vmem:[#allocation32] ss:$0 sm:$0xff] }
 0xc51   :  { %v12174_v23 = vpop.eup %12173 }
 0xc52   :  { %v8686_v24 = vadd.f32 1.0, %v12174_v23 }
 0xc54   :  { %v8687_v27 = vmul.f32 %v8686_v24, %v8683_v25 }
 0xc56   :  { %v8688_v38 = vpack.c.bf16 %v8687_v27, %v8687_v27 }
 0xc58   :  { %10509 = vmatmul.mubr.bf16.vlgmr.msra.gmra.mrb[60].mxu0 %v8688_v38 }
 0xc59   :  { %10520 = vmatprep.mubr.msk.bf16.mxu0 %vm12809_vm0, %v12808_v1  ;;  %10513 = vmatpush3.bf16.msra.mxu0 %v12110_v34 }
 0xc5a   :  { %10514 = vmatprep.subr.bf16.mxu0 %v12808_v1 }
 0xc5d   :  { %10515 = vmatpush3.bf16.msra.mxu0 %v12111_v36 }
 0xc5e   :  { %10516 = vmatprep.subr.bf16.mxu0 %v12808_v1 }
 0xc61   :  { %10517 = vmatpush3.bf16.msra.mxu0 %v12112_v37 }
 0xc62   :  { %10518 = vmatprep.subr.bf16.mxu0 %v12808_v1 }
 0xc65   :  { %10519 = vmatpush3.bf16.msra.mxu0 %v12113_v30 }
 0xc66   :  { %10524 = vmatprep.subr.bf16.mxu0 %v12808_v1 }
 0xd2b   :  { %v8794_v40 = vpop.f32.mrb[60].mxu0 }
 0xd2c   :  { %v8795_v14 = vadd.f32 %v10225_v29, %v8794_v40  ;;  %v10510_v0 = vpop.f32.mrb[61].mxu0 }
 0xd2d   :  { %v8797_v57 = vpop.f32.mrb[62].mxu0 }
 0xd2e   :  { %v8801_v35 = vmul.f32 0.70710677, %v8795_v14  ;;  %v10511_v41 = vpop.f32.mrb[63].mxu0  ;;  %v8800_v33 = vmul.f32 0.5, %v8795_v14 }
 0xd2f   :  { %v9125_v41 = vld [vmem:[%s13402_s13] sm:$0x3] }
 0xd30   :  { %12175 = verf.f32 %v8801_v35 }
 0xd3a   :  { %v12176_v42 = vpop.eup %12175 }
 0xd3b   :  { %v8803_v32 = vadd.f32 1.0, %v12176_v42  ;;  %v9138_v42 = vsel %vm9136_vm7, %v9125_v41, 0 }
 0xd3d   :  { %v8804_v43 = vmul.f32 %v8803_v32, %v8800_v33 }
 0xd3f   :  { %v8805_v44 = vpack.c.bf16 %v8804_v43, %v8804_v43 }
 0xd41   :  { %10521 = vmatmul.mubr.msk.bf16.vlgmr.msra.gmra.mrb[64].mxu0 %vm8845_vm2, %v8805_v44 }
 0xd42   :  { %10528 = vmatprep.mubr.msk.bf16.mxu0 %vm12809_vm0, %v12808_v1  ;;  %10525 = vmatpush3.bf16.msra.mxu0 %v12114_v46  ;;  %v10249_v46 = vld [vmem:[#allocation37] ss:$0 sm:$0xff] }
 0xd43   :  { %10526 = vmatprep.subr.bf16.mxu0 %v12808_v1 }
 0xd46   :  { %10527 = vmatpush3.bf16.msra.mxu0 %v12115_v12 }
 0xd47   :  { %10532 = vmatprep.subr.bf16.mxu0 %v12808_v1 }
 0xe14   :  { %v8883_v6 = vpop.f32.mrb[64].mxu0 }
 0xe15   :  { %v8884_v50 = vadd.f32 %v10234_v47, %v8883_v6  ;;  %v10522_v26 = vpop.f32.mrb[65].mxu0  ;;  %v10250_v47 = vld [vmem:[#allocation38] ss:$0 sm:$0xff] }
 0xe16   :  { %v8886_v52 = vpop.f32.mrb[66].mxu0 }
 0xe17   :  { %v8890_v48 = vmul.f32 0.70710677, %v8884_v50  ;;  %v10523_v53 = vpop.f32.mrb[67].mxu0  ;;  %v8889_v17 = vmul.f32 0.5, %v8884_v50  ;;  %v10251_v52 = vld [vmem:[#allocation2] ss:$0 sm:$0xff] }
 0xe19   :  { %12177 = verf.f32 %v8890_v48 }
 0xe23   :  { %v12178_v55 = vpop.eup %12177 }
 0xe24   :  { %v8892_v56 = vadd.f32 1.0, %v12178_v55 }
 0xe26   :  { %v8893_v59 = vmul.f32 %v8892_v56, %v8889_v17 }
 0xe28   :  { %v8894_v60 = vpack.c.bf16 %v8893_v59, %v8893_v59 }
 0xe2a   :  { %10529 = vmatmul.mubr.msk.bf16.vlgmr.msra.gmra.mrb[68].mxu0 %vm449_vm1, %v8894_v60 }
 0xe2b   :  { %10534 = vmatprep.mubr.msk.bf16.mxu0 %vm12809_vm0, %v12808_v1  ;;  %10533 = vmatpush3.bf16.msra.mxu0 %v12116_v58 }
 0xe2c   :  { %10538 = vmatprep.subr.bf16.mxu0 %v12808_v1 }
 0xefd   :  { %v8955_v61 = vpop.f32.mrb[68].mxu0 }
 0xefe   :  { %v8956_v8 = vadd.f32 %v10240_v62, %v8955_v61  ;;  %v10530_v28 = vpop.f32.mrb[69].mxu0 }
 0xeff   :  { %v8958_v49 = vpop.f32.mrb[70].mxu0 }
 0xf00   :  { %v8962_v9 = vmul.f32 0.70710677, %v8956_v8  ;;  %v10531_v63 = vpop.f32.mrb[71].mxu0  ;;  %v8961_v2 = vmul.f32 0.5, %v8956_v8 }
 0xf02   :  { %12179 = verf.f32 %v8962_v9 }
 0xf0c   :  { %v12180_v11 = vpop.eup %12179 }
 0xf0d   :  { %v8964_v10 = vadd.f32 1.0, %v12180_v11 }
 0xf0f   :  { %v8965_v3 = vmul.f32 %v8964_v10, %v8961_v2 }
 0xf11   :  { %v8966_v4 = vpack.c.bf16 %v8965_v3, %v8965_v3 }
 0xf13   :  { %10535 = vmatmul.mubr.msk.bf16.vlgmr.msra.gmra.mrb[72].mxu0 %vm8982_vm3, %v8966_v4 }
 0xf14   :  { %10540 = vmatprep.mubr.msk.bf16.mxu0 %vm12809_vm0, %v12808_v1  ;;  %10539 = vmatpush3.bf16.msra.mxu0 %v9046_v31 }
 0xf15   :  { %10544 = vmatprep.subr.bf16.mxu0 %v12808_v1 }
 0xfe6   :  { %v9020_v13 = vpop.f32.mrb[72].mxu0 }
 0xfe7   :  { %v9021_v54 = vadd.f32 %v10244_v7, %v9020_v13  ;;  %v10536_v51 = vpop.f32.mrb[73].mxu0 }
 0xfe8   :  { %v9023_v15 = vpop.f32.mrb[74].mxu0 }
 0xfe9   :  { %v9027_v16 = vmul.f32 0.70710677, %v9021_v54  ;;  %v10537_v18 = vpop.f32.mrb[75].mxu0  ;;  %v9026_v20 = vmul.f32 0.5, %v9021_v54 }
 0xfeb   :  { %12181 = verf.f32 %v9027_v16 }
 0xff5   :  { %v12182_v19 = vpop.eup %12181 }
 0xff6   :  { %v9029_v39 = vadd.f32 1.0, %v12182_v19 }
 0xff8   :  { %v9030_v45 = vmul.f32 %v9029_v39, %v9026_v20 }
 0xffa   :  { %v9031_v21 = vpack.c.bf16 %v9030_v45, %v9030_v45 }
 0xffc   :  { %10541 = vmatmul.mubr.msk.bf16.vlgmr.msra.gmra.mrb[76].mxu0 %vm9040_vm5, %v9031_v21 }
 0xffd   :  { %10546 = vmatprep.mubr.msk.bf16.mxu0 %vm12809_vm0, %v12808_v1  ;;  %10545 = vmatpush3.bf16.msra.mxu0 %v9138_v42 }
0x10cf   :  { %v9082_v23 = vpop.f32.mrb[76].mxu0 }
0x10d0   :  { %v9083_v25 = vadd.f32 %v10247_v22, %v9082_v23  ;;  %v10542_v24 = vpop.f32.mrb[77].mxu0 }
0x10d1   :  { %v9085_v27 = vpop.f32.mrb[78].mxu0 }
0x10d2   :  { %v9089_v38 = vmul.f32 0.70710677, %v9083_v25  ;;  %v10543_v34 = vpop.f32.mrb[79].mxu0  ;;  %v9088_v37 = vmul.f32 0.5, %v9083_v25 }
0x10d4   :  { %12183 = verf.f32 %v9089_v38 }
0x10de   :  { %v12184_v36 = vpop.eup %12183 }
0x10df   :  { %v9091_v30 = vadd.f32 1.0, %v12184_v36 }
0x10e1   :  { %v9092_v29 = vmul.f32 %v9091_v30, %v9088_v37 }
0x10e3   :  { %v9094_v40 = vsel %vm9093_vm6, %v9092_v29, 0.0 }
0x10e4   :  { %9095 = vadd.xlane.f32.xlu1 %v9094_v40 }
0x1171   :  { %v9096_v14 = vpop.xlane.xlu1 %9095 }
0x1172   :  { %v9098_v0 = vmul.f32 0.25, %v9096_v14 }
0x1174   :  { %v9099_v1 = vsub.f32 %v9092_v29, %v9098_v0 }
0x1176   :  { %v9100_v57 = vmul.f32 %v9099_v1, %v9099_v1 }
0x1178   :  { %v9101_v35 = vsel %vm9093_vm6, %v9100_v57, 0.0 }
0x1179   :  { %9102 = vadd.xlane.f32.xlu1 %v9101_v35 }
0x1206   :  { %v9103_v33 = vpop.xlane.xlu1 %9102 }
0x1207   :  { %v9104_v32 = vmul.f32 0.25, %v9103_v33 }
0x1209   :  { %v9105_v43 = vadd.f32 1e-05, %v9104_v32 }
0x120b   :  { %12185 = vrsqrt.f32 %v9105_v43 }
0x1215   :  { %v12186_v44 = vpop.eup %12185 }
0x1216   :  { %v9107_v12 = vmul.f32 %v12186_v44, %v9099_v1 }
0x1218   :  { %v9115_v6 = vmul.f32 %v10249_v46, %v9107_v12 }
0x121a   :  { %v9123_v50 = vadd.f32 %v10250_v47, %v9115_v6 }
0x121c   :  { %v9124_v26 = vpack.c.bf16 %v9123_v50, %v9123_v50 }
0x121e   :  { %10547 = vmatmul.mubr.msk.bf16.vlgmr.msra.gmra.mrb[80].mxu0 %vm9093_vm6, %v9124_v26 }
0x12f1   :  { %v9174_v48 = vpop.f32.mrb[80].mxu0 }
0x12f2   :  { %v9175_v53 = vadd.f32 %v10251_v52, %v9174_v48  ;;  %v10548_v55 = vpop.f32.mrb[81].mxu0 }
0x12f3   :  { %v9177_v17 = vpop.f32.mrb[82].mxu0 }
0x12f4   :  { %9181 = vst.msk [vmem:[%s12972_s20] sm:$0xff] %vm9180_vm8, %v9175_v53  ;;  %v10549_v56 = vpop.f32.mrb[83].mxu0 }
0x12f5   :  { %9186 = vsyncpa [#allocation4], 1 }
0x12f6   :  { %9187 = vsyncpa [#allocation6], 1 }
0x12f7   :  { %9188 = vsyncpa [#allocation9], 1 }
0x12f8   :  { %9189 = vsyncpa [#allocation12], 1 }
0x12f9   :  { %9190 = vsyncpa [#allocation15], 1 }
0x12fa   :  { %9191 = vsyncpa [#allocation18], 1 }
0x12fb   :  { %9192 = vsyncpa [#allocation21], 1 }
0x12fc   :  { %9193 = vsyncpa [#allocation24], 1 }
0x12fd   :  { %9194 = vsyncpa [#allocation27], 1 }
0x12fe   :  { %9195 = vsyncpa [#allocation30], 1 }
0x12ff   :  { %9196 = vsyncpa [#allocation33], 1 }
0x1300   :  { %9197 = vsyncpa [#allocation36], 1 }
0x1301   :  { %9198 = vsyncpa [#allocation39], 1 }

</bundles_post_ra>
